<compile_context>
chip_gen: v5e
topology: v5e:2x2
jax: 0.10.0
libtpu: 0.0.40
codegen_flags: <defaults>
</compile_context>

<pallas_src>
import functools

import jax
import jax.numpy as jnp
from jax.experimental import pallas as pl
from jax.experimental.pallas import tpu as pltpu

LANE = 128


def _round_up(x, m):
    return (x + m - 1) // m * m


# ------------------------------- fused kernel -------------------------------

def bottleneck_kernel(x_ref, wA_ref, shA_ref, w2_ref, sh2_ref,
                      w3_ref, sh3_ref, o_ref, r_ref, *, H, W, Pp):
    HW = H * W
    x = x_ref[0]                                           # [HW, Cin_p] bf16

    # ---- fused (conv1 | skip) 1x1: one MXU pass, N = Pp + Cout_p -----------
    a = jnp.dot(x, wA_ref[...], preferred_element_type=jnp.float32)
    a = jnp.maximum(a + shA_ref[...], 0.0)                 # BN scale pre-folded
    o1 = a[:, :Pp]                                         # conv1 out [HW, Pp]
    r_ref[...] = a[:, Pp:]                                 # skip branch -> VMEM
                                                           # (short live range)

    # ---- conv2 (3x3, stride 1, pad 1): 9 accumulating dots -----------------
    # Zero-pad o1 once along the flattened HW axis; each (dy,dx) tap is a
    # static sublane-offset slice + a W-boundary mask.  No scratch, no concat.
    o1p = jnp.concatenate(
        [jnp.zeros((W + 1, Pp), jnp.float32), o1,
         jnp.zeros((W + 1, Pp), jnp.float32)], axis=0)     # [(HW+2W+2), Pp]
    w_col = jax.lax.broadcasted_iota(jnp.int32, (HW, 1), 0) % W
    acc2 = None
    for k in range(9):
        dy, dx = divmod(k, 3)
        start = dy * W + dx
        tap = o1p[start:start + HW, :]                     # shifted view
        if dx == 0:                                        # input col w-1 < 0
            tap = jnp.where(w_col == 0, 0.0, tap)
        elif dx == 2:                                      # input col w+1 >= W
            tap = jnp.where(w_col == W - 1, 0.0, tap)
        d = jnp.dot(tap.astype(jnp.bfloat16), w2_ref[k],
                    preferred_element_type=jnp.float32)
        acc2 = d if acc2 is None else acc2 + d
    o2 = jnp.maximum(acc2 + sh2_ref[...], 0.0)             # [HW, Pp] f32

    # ---- conv3 (1x1) + residual add -----------------------------------------
    o3 = jnp.dot(o2.astype(jnp.bfloat16), w3_ref[...],
                 preferred_element_type=jnp.float32)
    o3 = jnp.maximum(o3 + sh3_ref[...], 0.0) + r_ref[...]
    o_ref[0] = o3.astype(o_ref.dtype)


# ----------------------------- wrapper / glue --------------------------------

def fold_bn(gamma, beta, mean, var, eps=1e-5):
    scale = gamma / jnp.sqrt(var + eps)
    shift = beta - mean * scale
    return (scale.reshape(1, -1).astype(jnp.float32),
            shift.reshape(1, -1).astype(jnp.float32))


def _fold_all(p):
    """Fold BN scale into conv output channels; keep only per-channel shifts."""
    s_sk, sh_sk = p['bn_skip']
    s1, sh1 = p['bn1']
    s2, sh2 = p['bn2']
    s3, sh3 = p['bn3']
    return {
        'w_skip': p['w_skip'] * s_sk,                       # (Cin, Cout)
        'w1': p['w1'] * s1,                                 # (Cin, P)
        'w2': p['w2_hwio'] * s2.reshape(1, 1, 1, -1),       # (3,3,P,P)
        'w3': p['w3'] * s3,                                 # (P, Cout)
        'sh_skip': sh_sk, 'sh1': sh1, 'sh2': sh2, 'sh3': sh3,
    }


def bottleneck_forward(x_nchw, p):
    N, Cin, H, W = x_nchw.shape
    P = p['w1'].shape[1]
    Cout = p['w3'].shape[1]
    Cin_p, P_p, Cout_p = (_round_up(c, LANE) for c in (Cin, P, Cout))
    HW = H * W
    f = _fold_all(p)

    # NCHW -> flattened channels-last; channels padded to lane width; bf16.
    x = jnp.transpose(x_nchw, (0, 2, 3, 1)).reshape(N, HW, Cin)
    x = jnp.pad(x, ((0, 0), (0, 0), (0, Cin_p - Cin))).astype(jnp.bfloat16)

    def pad2d(w, rows, cols):
        return jnp.pad(w, ((0, rows - w.shape[0]), (0, cols - w.shape[1])))

    # Fused conv1|skip weight: x is streamed through the MXU once with a
    # 256-wide output tile (fills the 2x256x256 MXU on v6e/v7x).
    wA = jnp.concatenate([pad2d(f['w1'], Cin_p, P_p),
                          pad2d(f['w_skip'], Cin_p, Cout_p)],
                         axis=1).astype(jnp.bfloat16)       # [Cin_p, Pp+Cout_p]
    shA = jnp.concatenate([jnp.pad(f['sh1'], ((0, 0), (0, P_p - P))),
                           jnp.pad(f['sh_skip'], ((0, 0), (0, Cout_p - Cout)))],
                          axis=1)                           # [1, Pp+Cout_p] f32

    w2 = f['w2'].reshape(9, P, P)
    w2 = jnp.pad(w2, ((0, 0), (0, P_p - P), (0, P_p - P))).astype(jnp.bfloat16)
    sh2 = jnp.pad(f['sh2'], ((0, 0), (0, P_p - P)))
    w3 = pad2d(f['w3'], P_p, Cout_p).astype(jnp.bfloat16)
    sh3 = jnp.pad(f['sh3'], ((0, 0), (0, Cout_p - Cout)))

    kernel = functools.partial(bottleneck_kernel, H=H, W=W, Pp=P_p)

    def full_spec(a):        # small constant block, resident across the grid
        nd = a.ndim
        return pl.BlockSpec(a.shape, lambda n, _nd=nd: (0,) * _nd)

    in_specs = [
        pl.BlockSpec((1, HW, Cin_p), lambda n: (n, 0, 0)),  # x, one image/step
        full_spec(wA), full_spec(shA),
        full_spec(w2), full_spec(sh2),
        full_spec(w3), full_spec(sh3),
    ]
    out_specs = pl.BlockSpec((1, HW, Cout_p), lambda n: (n, 0, 0))

    weights = (wA, shA, w2, sh2, w3, sh3)
    cost = pl.CostEstimate(
        flops=2 * N * HW * (Cin_p * (P_p + Cout_p) + 9 * P_p * P_p
                            + P_p * Cout_p),
        transcendentals=0,
        bytes_accessed=int(x.size) * 2 + N * HW * Cout_p * 4
        + sum(int(a.size) * a.dtype.itemsize for a in weights),
    )

    out = pl.pallas_call(
        kernel,
        # f32 output for exact reference parity; switch to bf16 for a free
        # HBM-writeback win (esp. v5e) if the consumer accepts it.
        out_shape=jax.ShapeDtypeStruct((N, HW, Cout_p), jnp.float32),
        grid_spec=pltpu.PrefetchScalarGridSpec(
            num_scalar_prefetch=0,
            grid=(N,),
            in_specs=in_specs,
            out_specs=out_specs,
            scratch_shapes=[pltpu.VMEM((HW, Cout_p), jnp.float32)],  # skip spill
        ),
        compiler_params=pltpu.CompilerParams(
            dimension_semantics=("parallel",),
            vmem_limit_bytes=32 * 1024 * 1024,
        ),
        cost_estimate=cost,
    )(x, *weights)

    out = out[:, :, :Cout].reshape(N, H, W, Cout)
    return jnp.transpose(out, (0, 3, 1, 2))                 # NHWC -> NCHW


# ------------------------------- reference -----------------------------------

def ref_forward(x_nchw, p):
    """Plain-JAX reference using the SAME BN-folded bf16 weights / f32 accum."""
    N, Cin, H, W = x_nchw.shape
    P = p['w1'].shape[1]
    Cout = p['w3'].shape[1]
    f = _fold_all(p)
    x = jnp.transpose(x_nchw, (0, 2, 3, 1)).reshape(N, H * W, Cin)

    def cbr(y, w, shift):
        acc = jnp.einsum('nmc,co->nmo',
                         y.astype(jnp.bfloat16), w.astype(jnp.bfloat16),
                         preferred_element_type=jnp.float32)
        return jnp.maximum(acc + shift.reshape(1, 1, -1), 0.0)

    residual = cbr(x, f['w_skip'], f['sh_skip'])
    o1 = cbr(x, f['w1'], f['sh1'])

    o1p = jnp.pad(o1.reshape(N, H, W, P), ((0, 0), (1, 1), (1, 1), (0, 0)))
    acc = jnp.zeros((N, H * W, P), jnp.float32)
    for ky in range(3):
        for kx in range(3):
            tap = o1p[:, ky:ky + H, kx:kx + W, :].reshape(N, H * W, P)
            acc = acc + jnp.einsum('nmc,co->nmo',
                                   tap.astype(jnp.bfloat16),
                                   f['w2'][ky, kx].astype(jnp.bfloat16),
                                   preferred_element_type=jnp.float32)
    o2 = jnp.maximum(acc + f['sh2'].reshape(1, 1, -1), 0.0)

    o3 = cbr(o2, f['w3'], f['sh3']) + residual
    return jnp.transpose(o3.reshape(N, H, W, Cout), (0, 3, 1, 2))


def make_params(key, inplanes, planes, expansion):
    ks = jax.random.split(key, 8)
    out_c = planes * expansion

    def bn_params(k, c):
        k1, k2, k3, k4 = jax.random.split(k, 4)
        gamma = 0.5 + jax.random.uniform(k1, (c,), jnp.float32)
        beta = 0.1 * jax.random.normal(k2, (c,), jnp.float32)
        mean = 0.1 * jax.random.normal(k3, (c,), jnp.float32)
        var = 0.5 + jax.random.uniform(k4, (c,), jnp.float32)
        return fold_bn(gamma, beta, mean, var)

    return {
        'w_skip': 0.1 * jax.random.normal(ks[0], (inplanes, out_c), jnp.float32),
        'w1': 0.1 * jax.random.normal(ks[1], (inplanes, planes), jnp.float32),
        'w2_hwio': 0.1 * jax.random.normal(ks[2], (3, 3, planes, planes),
                                           jnp.float32),
        'w3': 0.1 * jax.random.normal(ks[3], (planes, out_c), jnp.float32),
        'bn_skip': bn_params(ks[4], out_c),
        'bn1': bn_params(ks[5], planes),
        'bn2': bn_params(ks[6], planes),
        'bn3': bn_params(ks[7], out_c),
    }


if __name__ == "__main__":
    inplanes, planes, expansion = 16, 8, 4
    N, H, W = 2, 16, 16

    key = jax.random.PRNGKey(0)
    kx, kp = jax.random.split(key)
    x = jax.random.normal(kx, (N, inplanes, H, W), jnp.float32)   # NCHW input
    params = make_params(kp, inplanes, planes, expansion)

    fwd = jax.jit(bottleneck_forward)
    out = jax.block_until_ready(fwd(x, params))
    ref = jax.block_until_ready(ref_forward(x, params))

    assert out.shape == (N, planes * expansion, H, W), out.shape
    err = float(jnp.max(jnp.abs(out - ref)))
    assert jnp.allclose(out, ref, atol=1e-2, rtol=1e-2), err
    print("KERNEL_OK")
</pallas_src>

<mosaic_0001>
module attributes {stable_mosaic.version = 11 : i64} {
  func.func @bottleneck_kernel(%arg0: i32, %arg1: memref<1x256x128xbf16, #tpu.memory_space<vmem>>, %arg2: memref<128x256xbf16, #tpu.memory_space<vmem>>, %arg3: memref<1x256xf32, #tpu.memory_space<vmem>>, %arg4: memref<9x128x128xbf16, #tpu.memory_space<vmem>>, %arg5: memref<1x128xf32, #tpu.memory_space<vmem>>, %arg6: memref<128x128xbf16, #tpu.memory_space<vmem>>, %arg7: memref<1x128xf32, #tpu.memory_space<vmem>>, %arg8: memref<1x256x128xf32, #tpu.memory_space<vmem>>, %arg9: memref<256x128xf32, #tpu.memory_space<vmem>>) attributes {dimension_semantics = [#tpu.dimension_semantics<parallel>], iteration_bounds = array<i64: 2>, scalar_prefetch = 0 : i64, scratch_operands = 1 : i64, tpu.core_type = #tpu.core_type<tc>, window_params = [{transform_indices = @transform_0, window_bounds = array<i64: 1, 256, 128>}, {pipeline_mode = #tpu.pipeline_mode<synchronous>, transform_indices = @transform_1, window_bounds = array<i64: 128, 256>}, {pipeline_mode = #tpu.pipeline_mode<synchronous>, transform_indices = @transform_2, window_bounds = array<i64: 1, 256>}, {pipeline_mode = #tpu.pipeline_mode<synchronous>, transform_indices = @transform_3, window_bounds = array<i64: 9, 128, 128>}, {pipeline_mode = #tpu.pipeline_mode<synchronous>, transform_indices = @transform_4, window_bounds = array<i64: 1, 128>}, {pipeline_mode = #tpu.pipeline_mode<synchronous>, transform_indices = @transform_5, window_bounds = array<i64: 128, 128>}, {pipeline_mode = #tpu.pipeline_mode<synchronous>, transform_indices = @transform_6, window_bounds = array<i64: 1, 128>}, {transform_indices = @transform_7, window_bounds = array<i64: 1, 256, 128>}]} {
    %c0 = arith.constant 0 : index
    %c0_0 = arith.constant 0 : index
    %c0_1 = arith.constant 0 : index
    %0 = vector.load %arg1[%c0, %c0_0, %c0_1] : memref<1x256x128xbf16, #tpu.memory_space<vmem>>, vector<1x256x128xbf16>
    %1 = vector.shape_cast %0 : vector<1x256x128xbf16> to vector<256x128xbf16>
    %c0_2 = arith.constant 0 : index
    %c0_3 = arith.constant 0 : index
    %2 = vector.load %arg2[%c0_2, %c0_3] : memref<128x256xbf16, #tpu.memory_space<vmem>>, vector<128x256xbf16>
    %cst = arith.constant dense<0.000000e+00> : vector<256x256xf32>
    %3 = tpu.matmul %1, %2, %cst {dimension_numbers = #tpu.dot_dimension_numbers<[1], [0], [0], [1], [0, 0, 1, 1], [], []>} : vector<256x128xbf16>, vector<128x256xbf16>, vector<256x256xf32> -> vector<256x256xf32>
    %c0_4 = arith.constant 0 : index
    %c0_5 = arith.constant 0 : index
    %4 = vector.load %arg3[%c0_4, %c0_5] : memref<1x256xf32, #tpu.memory_space<vmem>>, vector<1x256xf32>
    %5 = vector.broadcast %4 : vector<1x256xf32> to vector<256x256xf32>
    %6 = arith.addf %3, %5 : vector<256x256xf32>
    %cst_6 = arith.constant 0.000000e+00 : f32
    %7 = vector.broadcast %cst_6 : f32 to vector<256x256xf32>
    %8 = arith.maximumf %6, %7 : vector<256x256xf32>
    %9 = vector.extract_strided_slice %8 {offsets = [0, 0], sizes = [256, 128], strides = [1, 1]} : vector<256x256xf32> to vector<256x128xf32>
    %10 = vector.extract_strided_slice %8 {offsets = [0, 128], sizes = [256, 128], strides = [1, 1]} : vector<256x256xf32> to vector<256x128xf32>
    %c0_7 = arith.constant 0 : index
    %c0_8 = arith.constant 0 : index
    %11 = vector.load %arg9[%c0_7, %c0_8] : memref<256x128xf32, #tpu.memory_space<vmem>>, vector<256x128xf32>
    tpu.vector_store %arg9[%c0_7, %c0_8], %10 {strides = array<i32>} : memref<256x128xf32, #tpu.memory_space<vmem>>, vector<256x128xf32>,
    %cst_9 = arith.constant 0.000000e+00 : f32
    %12 = vector.broadcast %cst_9 : f32 to vector<17x128xf32>
    %cst_10 = arith.constant 0.000000e+00 : f32
    %13 = vector.broadcast %cst_10 : f32 to vector<17x128xf32>
    %14 = tpu.concatenate %12, %9, %13 in 0 : vector<17x128xf32>, vector<256x128xf32>, vector<17x128xf32> -> vector<290x128xf32>
    %15 = tpu.iota {dimensions = array<i32: 0>} : vector<256x1xi32>
    %c16_i32 = arith.constant 16 : i32
    %c0_i32 = arith.constant 0 : i32
    %16 = arith.cmpi eq, %c16_i32, %c0_i32 : i32
    %c1_i32 = arith.constant 1 : i32
    %17 = arith.select %16, %c1_i32, %c16_i32 : i32
    %18 = vector.broadcast %17 : i32 to vector<256x1xi32>
    %19 = arith.remsi %15, %18 : vector<256x1xi32>
    %c0_i32_11 = arith.constant 0 : i32
    %20 = vector.broadcast %c0_i32_11 : i32 to vector<256x1xi32>
    %21 = arith.cmpi ne, %19, %20 : vector<256x1xi32>
    %c0_i32_12 = arith.constant 0 : i32
    %22 = vector.broadcast %c0_i32_12 : i32 to vector<256x1xi32>
    %23 = arith.cmpi slt, %19, %22 : vector<256x1xi32>
    %c0_i32_13 = arith.constant 0 : i32
    %24 = arith.cmpi slt, %17, %c0_i32_13 : i32
    %25 = vector.broadcast %24 : i1 to vector<256x1xi1>
    %26 = vector.broadcast %25 : vector<256x1xi1> to vector<256x1xi1>
    %27 = arith.xori %23, %26 : vector<256x1xi1>
    %28 = arith.andi %27, %21 : vector<256x1xi1>
    %29 = vector.broadcast %17 : i32 to vector<256x1xi32>
    %30 = arith.addi %19, %29 : vector<256x1xi32>
    %31 = arith.select %28, %30, %19 : vector<256x1xi1>, vector<256x1xi32>
    %32 = vector.extract_strided_slice %14 {offsets = [0, 0], sizes = [256, 128], strides = [1, 1]} : vector<290x128xf32> to vector<256x128xf32>
    %c0_i32_14 = arith.constant 0 : i32
    %33 = vector.broadcast %c0_i32_14 : i32 to vector<256x1xi32>
    %34 = arith.cmpi eq, %31, %33 : vector<256x1xi32>
    %cst_15 = arith.constant 0.000000e+00 : f32
    %35 = vector.shape_cast %34 : vector<256x1xi1> to vector<256x1xi1>
    %36 = vector.broadcast %35 : vector<256x1xi1> to vector<256x128xi1>
    %37 = vector.broadcast %cst_15 : f32 to vector<256x128xf32>
    %38 = arith.select %36, %37, %32 : vector<256x128xi1>, vector<256x128xf32>
    %39 = arith.truncf %38 : vector<256x128xf32> to vector<256x128xbf16>
    %c0_16 = arith.constant 0 : index
    %c0_17 = arith.constant 0 : index
    %c0_18 = arith.constant 0 : index
    %40 = vector.load %arg4[%c0_16, %c0_17, %c0_18] : memref<9x128x128xbf16, #tpu.memory_space<vmem>>, vector<1x128x128xbf16>
    %41 = vector.shape_cast %40 : vector<1x128x128xbf16> to vector<128x128xbf16>
    %cst_19 = arith.constant dense<0.000000e+00> : vector<256x128xf32>
    %42 = tpu.matmul %39, %41, %cst_19 {dimension_numbers = #tpu.dot_dimension_numbers<[1], [0], [0], [1], [0, 0, 1, 1], [], []>} : vector<256x128xbf16>, vector<128x128xbf16>, vector<256x128xf32> -> vector<256x128xf32>
    %43 = vector.extract_strided_slice %14 {offsets = [1, 0], sizes = [256, 128], strides = [1, 1]} : vector<290x128xf32> to vector<256x128xf32>
    %44 = arith.truncf %43 : vector<256x128xf32> to vector<256x128xbf16>
    %c1 = arith.constant 1 : index
    %c0_20 = arith.constant 0 : index
    %c0_21 = arith.constant 0 : index
    %45 = vector.load %arg4[%c1, %c0_20, %c0_21] : memref<9x128x128xbf16, #tpu.memory_space<vmem>>, vector<1x128x128xbf16>
    %46 = vector.shape_cast %45 : vector<1x128x128xbf16> to vector<128x128xbf16>
    %cst_22 = arith.constant dense<0.000000e+00> : vector<256x128xf32>
    %47 = tpu.matmul %44, %46, %cst_22 {dimension_numbers = #tpu.dot_dimension_numbers<[1], [0], [0], [1], [0, 0, 1, 1], [], []>} : vector<256x128xbf16>, vector<128x128xbf16>, vector<256x128xf32> -> vector<256x128xf32>
    %48 = arith.addf %42, %47 : vector<256x128xf32>
    %49 = vector.extract_strided_slice %14 {offsets = [2, 0], sizes = [256, 128], strides = [1, 1]} : vector<290x128xf32> to vector<256x128xf32>
    %c15_i32 = arith.constant 15 : i32
    %50 = vector.broadcast %c15_i32 : i32 to vector<256x1xi32>
    %51 = arith.cmpi eq, %31, %50 : vector<256x1xi32>
    %cst_23 = arith.constant 0.000000e+00 : f32
    %52 = vector.shape_cast %51 : vector<256x1xi1> to vector<256x1xi1>
    %53 = vector.broadcast %52 : vector<256x1xi1> to vector<256x128xi1>
    %54 = vector.broadcast %cst_23 : f32 to vector<256x128xf32>
    %55 = arith.select %53, %54, %49 : vector<256x128xi1>, vector<256x128xf32>
    %56 = arith.truncf %55 : vector<256x128xf32> to vector<256x128xbf16>
    %c2 = arith.constant 2 : index
    %c0_24 = arith.constant 0 : index
    %c0_25 = arith.constant 0 : index
    %57 = vector.load %arg4[%c2, %c0_24, %c0_25] : memref<9x128x128xbf16, #tpu.memory_space<vmem>>, vector<1x128x128xbf16>
    %58 = vector.shape_cast %57 : vector<1x128x128xbf16> to vector<128x128xbf16>
    %cst_26 = arith.constant dense<0.000000e+00> : vector<256x128xf32>
    %59 = tpu.matmul %56, %58, %cst_26 {dimension_numbers = #tpu.dot_dimension_numbers<[1], [0], [0], [1], [0, 0, 1, 1], [], []>} : vector<256x128xbf16>, vector<128x128xbf16>, vector<256x128xf32> -> vector<256x128xf32>
    %60 = arith.addf %48, %59 : vector<256x128xf32>
    %61 = vector.extract_strided_slice %14 {offsets = [16, 0], sizes = [256, 128], strides = [1, 1]} : vector<290x128xf32> to vector<256x128xf32>
    %c0_i32_27 = arith.constant 0 : i32
    %62 = vector.broadcast %c0_i32_27 : i32 to vector<256x1xi32>
    %63 = arith.cmpi eq, %31, %62 : vector<256x1xi32>
    %cst_28 = arith.constant 0.000000e+00 : f32
    %64 = vector.shape_cast %63 : vector<256x1xi1> to vector<256x1xi1>
    %65 = vector.broadcast %64 : vector<256x1xi1> to vector<256x128xi1>
    %66 = vector.broadcast %cst_28 : f32 to vector<256x128xf32>
    %67 = arith.select %65, %66, %61 : vector<256x128xi1>, vector<256x128xf32>
    %68 = arith.truncf %67 : vector<256x128xf32> to vector<256x128xbf16>
    %c3 = arith.constant 3 : index
    %c0_29 = arith.constant 0 : index
    %c0_30 = arith.constant 0 : index
    %69 = vector.load %arg4[%c3, %c0_29, %c0_30] : memref<9x128x128xbf16, #tpu.memory_space<vmem>>, vector<1x128x128xbf16>
    %70 = vector.shape_cast %69 : vector<1x128x128xbf16> to vector<128x128xbf16>
    %cst_31 = arith.constant dense<0.000000e+00> : vector<256x128xf32>
    %71 = tpu.matmul %68, %70, %cst_31 {dimension_numbers = #tpu.dot_dimension_numbers<[1], [0], [0], [1], [0, 0, 1, 1], [], []>} : vector<256x128xbf16>, vector<128x128xbf16>, vector<256x128xf32> -> vector<256x128xf32>
    %72 = arith.addf %60, %71 : vector<256x128xf32>
    %73 = vector.extract_strided_slice %14 {offsets = [17, 0], sizes = [256, 128], strides = [1, 1]} : vector<290x128xf32> to vector<256x128xf32>
    %74 = arith.truncf %73 : vector<256x128xf32> to vector<256x128xbf16>
    %c4 = arith.constant 4 : index
    %c0_32 = arith.constant 0 : index
    %c0_33 = arith.constant 0 : index
    %75 = vector.load %arg4[%c4, %c0_32, %c0_33] : memref<9x128x128xbf16, #tpu.memory_space<vmem>>, vector<1x128x128xbf16>
    %76 = vector.shape_cast %75 : vector<1x128x128xbf16> to vector<128x128xbf16>
    %cst_34 = arith.constant dense<0.000000e+00> : vector<256x128xf32>
    %77 = tpu.matmul %74, %76, %cst_34 {dimension_numbers = #tpu.dot_dimension_numbers<[1], [0], [0], [1], [0, 0, 1, 1], [], []>} : vector<256x128xbf16>, vector<128x128xbf16>, vector<256x128xf32> -> vector<256x128xf32>
    %78 = arith.addf %72, %77 : vector<256x128xf32>
    %79 = vector.extract_strided_slice %14 {offsets = [18, 0], sizes = [256, 128], strides = [1, 1]} : vector<290x128xf32> to vector<256x128xf32>
    %c15_i32_35 = arith.constant 15 : i32
    %80 = vector.broadcast %c15_i32_35 : i32 to vector<256x1xi32>
    %81 = arith.cmpi eq, %31, %80 : vector<256x1xi32>
    %cst_36 = arith.constant 0.000000e+00 : f32
    %82 = vector.shape_cast %81 : vector<256x1xi1> to vector<256x1xi1>
    %83 = vector.broadcast %82 : vector<256x1xi1> to vector<256x128xi1>
    %84 = vector.broadcast %cst_36 : f32 to vector<256x128xf32>
    %85 = arith.select %83, %84, %79 : vector<256x128xi1>, vector<256x128xf32>
    %86 = arith.truncf %85 : vector<256x128xf32> to vector<256x128xbf16>
    %c5 = arith.constant 5 : index
    %c0_37 = arith.constant 0 : index
    %c0_38 = arith.constant 0 : index
    %87 = vector.load %arg4[%c5, %c0_37, %c0_38] : memref<9x128x128xbf16, #tpu.memory_space<vmem>>, vector<1x128x128xbf16>
    %88 = vector.shape_cast %87 : vector<1x128x128xbf16> to vector<128x128xbf16>
    %cst_39 = arith.constant dense<0.000000e+00> : vector<256x128xf32>
    %89 = tpu.matmul %86, %88, %cst_39 {dimension_numbers = #tpu.dot_dimension_numbers<[1], [0], [0], [1], [0, 0, 1, 1], [], []>} : vector<256x128xbf16>, vector<128x128xbf16>, vector<256x128xf32> -> vector<256x128xf32>
    %90 = arith.addf %78, %89 : vector<256x128xf32>
    %91 = vector.extract_strided_slice %14 {offsets = [32, 0], sizes = [256, 128], strides = [1, 1]} : vector<290x128xf32> to vector<256x128xf32>
    %c0_i32_40 = arith.constant 0 : i32
    %92 = vector.broadcast %c0_i32_40 : i32 to vector<256x1xi32>
    %93 = arith.cmpi eq, %31, %92 : vector<256x1xi32>
    %cst_41 = arith.constant 0.000000e+00 : f32
    %94 = vector.shape_cast %93 : vector<256x1xi1> to vector<256x1xi1>
    %95 = vector.broadcast %94 : vector<256x1xi1> to vector<256x128xi1>
    %96 = vector.broadcast %cst_41 : f32 to vector<256x128xf32>
    %97 = arith.select %95, %96, %91 : vector<256x128xi1>, vector<256x128xf32>
    %98 = arith.truncf %97 : vector<256x128xf32> to vector<256x128xbf16>
    %c6 = arith.constant 6 : index
    %c0_42 = arith.constant 0 : index
    %c0_43 = arith.constant 0 : index
    %99 = vector.load %arg4[%c6, %c0_42, %c0_43] : memref<9x128x128xbf16, #tpu.memory_space<vmem>>, vector<1x128x128xbf16>
    %100 = vector.shape_cast %99 : vector<1x128x128xbf16> to vector<128x128xbf16>
    %cst_44 = arith.constant dense<0.000000e+00> : vector<256x128xf32>
    %101 = tpu.matmul %98, %100, %cst_44 {dimension_numbers = #tpu.dot_dimension_numbers<[1], [0], [0], [1], [0, 0, 1, 1], [], []>} : vector<256x128xbf16>, vector<128x128xbf16>, vector<256x128xf32> -> vector<256x128xf32>
    %102 = arith.addf %90, %101 : vector<256x128xf32>
    %103 = vector.extract_strided_slice %14 {offsets = [33, 0], sizes = [256, 128], strides = [1, 1]} : vector<290x128xf32> to vector<256x128xf32>
    %104 = arith.truncf %103 : vector<256x128xf32> to vector<256x128xbf16>
    %c7 = arith.constant 7 : index
    %c0_45 = arith.constant 0 : index
    %c0_46 = arith.constant 0 : index
    %105 = vector.load %arg4[%c7, %c0_45, %c0_46] : memref<9x128x128xbf16, #tpu.memory_space<vmem>>, vector<1x128x128xbf16>
    %106 = vector.shape_cast %105 : vector<1x128x128xbf16> to vector<128x128xbf16>
    %cst_47 = arith.constant dense<0.000000e+00> : vector<256x128xf32>
    %107 = tpu.matmul %104, %106, %cst_47 {dimension_numbers = #tpu.dot_dimension_numbers<[1], [0], [0], [1], [0, 0, 1, 1], [], []>} : vector<256x128xbf16>, vector<128x128xbf16>, vector<256x128xf32> -> vector<256x128xf32>
    %108 = arith.addf %102, %107 : vector<256x128xf32>
    %109 = vector.extract_strided_slice %14 {offsets = [34, 0], sizes = [256, 128], strides = [1, 1]} : vector<290x128xf32> to vector<256x128xf32>
    %c15_i32_48 = arith.constant 15 : i32
    %110 = vector.broadcast %c15_i32_48 : i32 to vector<256x1xi32>
    %111 = arith.cmpi eq, %31, %110 : vector<256x1xi32>
    %cst_49 = arith.constant 0.000000e+00 : f32
    %112 = vector.shape_cast %111 : vector<256x1xi1> to vector<256x1xi1>
    %113 = vector.broadcast %112 : vector<256x1xi1> to vector<256x128xi1>
    %114 = vector.broadcast %cst_49 : f32 to vector<256x128xf32>
    %115 = arith.select %113, %114, %109 : vector<256x128xi1>, vector<256x128xf32>
    %116 = arith.truncf %115 : vector<256x128xf32> to vector<256x128xbf16>
    %c8 = arith.constant 8 : index
    %c0_50 = arith.constant 0 : index
    %c0_51 = arith.constant 0 : index
    %117 = vector.load %arg4[%c8, %c0_50, %c0_51] : memref<9x128x128xbf16, #tpu.memory_space<vmem>>, vector<1x128x128xbf16>
    %118 = vector.shape_cast %117 : vector<1x128x128xbf16> to vector<128x128xbf16>
    %cst_52 = arith.constant dense<0.000000e+00> : vector<256x128xf32>
    %119 = tpu.matmul %116, %118, %cst_52 {dimension_numbers = #tpu.dot_dimension_numbers<[1], [0], [0], [1], [0, 0, 1, 1], [], []>} : vector<256x128xbf16>, vector<128x128xbf16>, vector<256x128xf32> -> vector<256x128xf32>
    %120 = arith.addf %108, %119 : vector<256x128xf32>
    %c0_53 = arith.constant 0 : index
    %c0_54 = arith.constant 0 : index
    %121 = vector.load %arg5[%c0_53, %c0_54] : memref<1x128xf32, #tpu.memory_space<vmem>>, vector<1x128xf32>
    %122 = vector.broadcast %121 : vector<1x128xf32> to vector<256x128xf32>
    %123 = arith.addf %120, %122 : vector<256x128xf32>
    %cst_55 = arith.constant 0.000000e+00 : f32
    %124 = vector.broadcast %cst_55 : f32 to vector<256x128xf32>
    %125 = arith.maximumf %123, %124 : vector<256x128xf32>
    %126 = arith.truncf %125 : vector<256x128xf32> to vector<256x128xbf16>
    %c0_56 = arith.constant 0 : index
    %c0_57 = arith.constant 0 : index
    %127 = vector.load %arg6[%c0_56, %c0_57] : memref<128x128xbf16, #tpu.memory_space<vmem>>, vector<128x128xbf16>
    %cst_58 = arith.constant dense<0.000000e+00> : vector<256x128xf32>
    %128 = tpu.matmul %126, %127, %cst_58 {dimension_numbers = #tpu.dot_dimension_numbers<[1], [0], [0], [1], [0, 0, 1, 1], [], []>} : vector<256x128xbf16>, vector<128x128xbf16>, vector<256x128xf32> -> vector<256x128xf32>
    %c0_59 = arith.constant 0 : index
    %c0_60 = arith.constant 0 : index
    %129 = vector.load %arg7[%c0_59, %c0_60] : memref<1x128xf32, #tpu.memory_space<vmem>>, vector<1x128xf32>
    %130 = vector.broadcast %129 : vector<1x128xf32> to vector<256x128xf32>
    %131 = arith.addf %128, %130 : vector<256x128xf32>
    %cst_61 = arith.constant 0.000000e+00 : f32
    %132 = vector.broadcast %cst_61 : f32 to vector<256x128xf32>
    %133 = arith.maximumf %131, %132 : vector<256x128xf32>
    %c0_62 = arith.constant 0 : index
    %c0_63 = arith.constant 0 : index
    %134 = vector.load %arg9[%c0_62, %c0_63] : memref<256x128xf32, #tpu.memory_space<vmem>>, vector<256x128xf32>
    %135 = arith.addf %133, %134 : vector<256x128xf32>
    %c0_64 = arith.constant 0 : index
    %c0_65 = arith.constant 0 : index
    %c0_66 = arith.constant 0 : index
    %136 = vector.load %arg8[%c0_64, %c0_65, %c0_66] : memref<1x256x128xf32, #tpu.memory_space<vmem>>, vector<1x256x128xf32>
    %137 = vector.shape_cast %136 : vector<1x256x128xf32> to vector<256x128xf32>
    %138 = vector.shape_cast %135 : vector<256x128xf32> to vector<1x256x128xf32>
    tpu.vector_store %arg8[%c0_64, %c0_65, %c0_66], %138 {strides = array<i32>} : memref<1x256x128xf32, #tpu.memory_space<vmem>>, vector<1x256x128xf32>,
    return
  }
  func.func @transform_0(%arg0: i32) -> (i32, i32, i32) {
    %c0_i32 = arith.constant 0 : i32
    %c0_i32_0 = arith.constant 0 : i32
    %c0_i32_1 = arith.constant 0 : i32
    return %arg0, %c0_i32, %c0_i32_0 : i32, i32, i32
  }
  func.func @transform_1(%arg0: i32) -> (i32, i32) {
    %c0_i32 = arith.constant 0 : i32
    %c0_i32_0 = arith.constant 0 : i32
    %c0_i32_1 = arith.constant 0 : i32
    return %c0_i32, %c0_i32_0 : i32, i32
  }
  func.func @transform_2(%arg0: i32) -> (i32, i32) {
    %c0_i32 = arith.constant 0 : i32
    %c0_i32_0 = arith.constant 0 : i32
    %c0_i32_1 = arith.constant 0 : i32
    return %c0_i32, %c0_i32_0 : i32, i32
  }
  func.func @transform_3(%arg0: i32) -> (i32, i32, i32) {
    %c0_i32 = arith.constant 0 : i32
    %c0_i32_0 = arith.constant 0 : i32
    %c0_i32_1 = arith.constant 0 : i32
    %c0_i32_2 = arith.constant 0 : i32
    return %c0_i32, %c0_i32_0, %c0_i32_1 : i32, i32, i32
  }
  func.func @transform_4(%arg0: i32) -> (i32, i32) {
    %c0_i32 = arith.constant 0 : i32
    %c0_i32_0 = arith.constant 0 : i32
    %c0_i32_1 = arith.constant 0 : i32
    return %c0_i32, %c0_i32_0 : i32, i32
  }
  func.func @transform_5(%arg0: i32) -> (i32, i32) {
    %c0_i32 = arith.constant 0 : i32
    %c0_i32_0 = arith.constant 0 : i32
    %c0_i32_1 = arith.constant 0 : i32
    return %c0_i32, %c0_i32_0 : i32, i32
  }
  func.func @transform_6(%arg0: i32) -> (i32, i32) {
    %c0_i32 = arith.constant 0 : i32
    %c0_i32_0 = arith.constant 0 : i32
    %c0_i32_1 = arith.constant 0 : i32
    return %c0_i32, %c0_i32_0 : i32, i32
  }
  func.func @transform_7(%arg0: i32) -> (i32, i32, i32) {
    %c0_i32 = arith.constant 0 : i32
    %c0_i32_0 = arith.constant 0 : i32
    %c0_i32_1 = arith.constant 0 : i32
    return %arg0, %c0_i32, %c0_i32_0 : i32, i32, i32
  }
}

</mosaic_0001>

<bundles_post_ra>
// kernel: bottleneck_forward.1
= control target key start
LH: loop header
LB: loop body
LE: loop exit
PB: predicated region body
PF: predicated region fallthrough
CT: control target
= control target key end

     0   :  { %12 = vsyncpa [#allocation4], 0  ;;  %s7308_s0 = inlined_call_operand.vmem [shape: bf16[2,256,128], index: 0, kind: input, shape index: {}]   ;;  %s7309_s1 = inlined_call_operand.vmem [shape: bf16[128,256], index: 1, kind: input, shape index: {}]   ;;  %s7310_s2 = inlined_call_operand.vmem [shape: f32[1,256], index: 2, kind: input, shape index: {}]   ;;  %s7311_s3 = inlined_call_operand.vmem [shape: bf16[9,128,128], index: 3, kind: input, shape index: {}]   ;;  %s7312_s4 = inlined_call_operand.vmem [shape: f32[1,128], index: 4, kind: input, shape index: {}]   ;;  %s7313_s5 = inlined_call_operand.vmem [shape: bf16[128,128], index: 5, kind: input, shape index: {}]   ;;  %s7314_s6 = inlined_call_operand.vmem [shape: f32[1,128], index: 6, kind: input, shape index: {}]   ;;  %s7315_s7 = inlined_call_operand.hbm [shape: f32[2,256,128], index: 7, kind: output, shape index: {}]  }
   0x1   :  { %14 = vsyncpa [#allocation4 + $0x1], 0  ;;  %s5436_s24 = smov 0   ;;  %s5438_s25 = smov 0  }
   0x2   :  { %s5440_s26 = smov 0   ;;  %s5442_s27 = smov 0  }
   0x3 LB: > { %s5457_s28 = sadd.s32 4294967295, %s5388_s27   ;;  %s4164_s29 = sadd.s32 4294967294, %s5388_s27   ;;  %s5388_s27 = sphi %s5442_s27, %s7814_s27   ;;  %s5384_s26 = sphi %s5440_s26, %s7813_s26   ;;  %s5380_s25 = sphi %s5438_s25, %s7812_s25   ;;  %s5376_s24 = sphi %s5436_s24, %s7811_s24  }
   0x4   : > { %s5461_s30 = sadd.s32 1, %s5388_s27   ;;  %s179_s8 = sadd.s32 1, %s5384_s26 }
   0x5   : > { %s176_s9 = ssub.s32 %s5388_s27, %s5461_s30  ;;  %p189_p0 = scmp.ne.s32.totalorder %s5384_s26, %s5380_s25 }
   0x6   : > { %p177_p1 = scmp.eq.s32.totalorder %s176_s9, 0  ;;  %p190_p2 = scmp.eq.s32.totalorder %s5457_s28, 1 }
   0x7   : > { %p195_p3 = scmp.ne.s32.totalorder %s5380_s25, %s5376_s24  ;;  %p196_p4 = scmp.eq.s32.totalorder %s4164_s29, 1 }
   0x8   : > { %s5472_s10 = scalar_select %p177_p1, %s5384_s26, %s179_s8  }
   0x9   : > { %p5474_p5 = por %p190_p2, %p189_p0  ;;  %p5478_p6 = por %p196_p4, %p195_p3 }
   0xa   : > { %p4167_p7 = scmp.ge.s32.totalorder %s5388_s27, 1  ;;  %p240_p8 = scmp.lt.s32.totalorder %s5388_s27, 3 }
   0xc   : > { %p241_p9 = pnand %p4167_p7, %p240_p8 }
   0xe   : > { %244 = sbr.rel (%p241_p9) target bundleno = 1251 (0x4e3), region = 48 }
  0x13   : > { %v4293_v0 = vld [vmem:[%s7309_s1 + $0x70] sm:$0xf]  ;;  %v5164_v1 = vld [vmem:[%s7309_s1 + $0x74] sm:$0xf0]  ;;  %v5163_v2 = vld [vmem:[%s7309_s1 + $0x74] sm:$0xf] }
  0x14   : > { %v4294_v3 = vor.u32 %v5164_v1, %v4293_v0  ;;  %v4295_v4 = vld [vmem:[%s7309_s1 + $0x78] sm:$0xf0]  ;;  %v4285_v5 = vld [vmem:[%s7309_s1 + $0x60] sm:$0xf]  ;;  %v5162_v6 = vld [vmem:[%s7309_s1 + $0x64] sm:$0xf0] }
  0x15   : > { %v4298_v7 = vor.u32 %v5163_v2, %v4295_v4  ;;  %v5161_v8 = vld [vmem:[%s7309_s1 + $0x64] sm:$0xf]  ;;  %v4287_v9 = vld [vmem:[%s7309_s1 + $0x68] sm:$0xf0]  ;;  %v4286_v10 = vor.u32 %v5162_v6, %v4285_v5  ;;  %v4277_v12 = vld [vmem:[%s7309_s1 + $0x50] sm:$0xf] }
  0x16   : > { %507 = vmatpush.bf16.msra.mxu0 %v4294_v3  ;;  %v4290_v11 = vor.u32 %v5161_v8, %v4287_v9  ;;  %v5160_v13 = vld [vmem:[%s7309_s1 + $0x54] sm:$0xf0]  ;;  %v5159_v14 = vld [vmem:[%s7309_s1 + $0x54] sm:$0xf]  ;;  %v4279_v15 = vld [vmem:[%s7309_s1 + $0x58] sm:$0xf0] }
  0x17   : > { %596 = vmatpush.bf16.msra.mxu1 %v4298_v7  ;;  %v4278_v16 = vor.u32 %v5160_v13, %v4277_v12  ;;  %v4282_v17 = vor.u32 %v5159_v14, %v4279_v15  ;;  %v4269_v18 = vld [vmem:[%s7309_s1 + $0x40] sm:$0xf]  ;;  %v5158_v19 = vld [vmem:[%s7309_s1 + $0x44] sm:$0xf0]  ;;  %v5157_v20 = vld [vmem:[%s7309_s1 + $0x44] sm:$0xf] }
  0x18   : > { %v4271_v21 = vld [vmem:[%s7309_s1 + $0x48] sm:$0xf0]  ;;  %v4270_v22 = vor.u32 %v5158_v19, %v4269_v18  ;;  %v4261_v24 = vld [vmem:[%s7309_s1 + $0x30] sm:$0xf]  ;;  %v5156_v25 = vld [vmem:[%s7309_s1 + $0x34] sm:$0xf0] }
  0x19   : > { %v4274_v23 = vor.u32 %v5157_v20, %v4271_v21  ;;  %v5155_v26 = vld [vmem:[%s7309_s1 + $0x34] sm:$0xf]  ;;  %v4263_v27 = vld [vmem:[%s7309_s1 + $0x38] sm:$0xf0]  ;;  %v4262_v28 = vor.u32 %v5156_v25, %v4261_v24  ;;  %v4253_v30 = vld [vmem:[%s7309_s1 + $0x20] sm:$0xf] }
  0x1a   : > { %508 = vmatpush.bf16.msra.mxu0 %v4286_v10  ;;  %v4266_v29 = vor.u32 %v5155_v26, %v4263_v27  ;;  %v5154_v31 = vld [vmem:[%s7309_s1 + $0x24] sm:$0xf0]  ;;  %p272_p10 = scmp.lt.s32.totalorder %s5457_s28, 1  ;;  %v5153_v32 = vld [vmem:[%s7309_s1 + $0x24] sm:$0xf]  ;;  %v5172_v53 = vld [vmem:[%s7311_s3 + $0x38] sm:$0xff] }
  0x1b   : > { %597 = vmatpush.bf16.msra.mxu1 %v4290_v11  ;;  %v4255_v33 = vld [vmem:[%s7309_s1 + $0x28] sm:$0xf0]  ;;  %v4254_v34 = vor.u32 %v5154_v31, %v4253_v30  ;;  %v4245_v36 = vld [vmem:[%s7309_s1 + $0x10] sm:$0xf]  ;;  %v5152_v37 = vld [vmem:[%s7309_s1 + $0x14] sm:$0xf0]  ;;  %1854 = vmatpush.bf16.msra.mxu3 %v5172_v53  ;;  %v912_v11 = vlaneseq }
  0x1c   : > { %v4258_v35 = vor.u32 %v5153_v32, %v4255_v33  ;;  %s273_s23 = scalar_select %p272_p10, %s5457_s28, 1  ;;  %v5151_v38 = vld [vmem:[%s7309_s1 + $0x14] sm:$0xf]  ;;  %v4247_v39 = vld [vmem:[%s7309_s1 + $0x18] sm:$0xf0]  ;;  %v4246_v40 = vor.u32 %v5152_v37, %v4245_v36  ;;  %v5170_v55 = vld [vmem:[%s7311_s3 + $0x28] sm:$0xff] }
  0x1d   : > { %v4250_v41 = vor.u32 %v5151_v38, %v4247_v39  ;;  %v4237_v42 = vld [vmem:[%s7309_s1] sm:$0xf]  ;;  %v5150_v43 = vld [vmem:[%s7309_s1 + $0x4] sm:$0xf0]  ;;  %v5149_v44 = vld [vmem:[%s7309_s1 + $0x4] sm:$0xf] }
  0x1e   : > { %509 = vmatpush.bf16.msra.mxu0 %v4278_v16  ;;  %s5132_s18 = sshll.u32 %s273_s23, 7  ;;  %v4239_v45 = vld [vmem:[%s7309_s1 + $0x8] sm:$0xf0]  ;;  %v4238_v46 = vor.u32 %v5150_v43, %v4237_v42  ;;  %v5171_v54 = vld [vmem:[%s7311_s3 + $0x30] sm:$0xff]  ;;  %v5169_v56 = vld [vmem:[%s7311_s3 + $0x20] sm:$0xff]  ;;  %v5390_v2 = vmov 0.0|0.0  }
  0x1f   : > { %598 = vmatpush.bf16.msra.mxu1 %v4282_v17  ;;  %s5585_s9 = scalar_lea.vmem %s7308_s0, %s5132_s18  ;;  %v4242_v47 = vor.u32 %v5149_v44, %v4239_v45  ;;  %1855 = vmatpush.bf16.msra.mxu3 %v5171_v54  ;;  %v5168_v58 = vld [vmem:[%s7311_s3 + $0x18] sm:$0xff]  ;;  %v5167_v59 = vld [vmem:[%s7311_s3 + $0x10] sm:$0xff]  ;;  %v5166_v62 = vld [vmem:[%s7311_s3 + $0x8] sm:$0xff]  ;;  %v5652_v15 = vshrl.u32 %v912_v11, 7  ;;  %vm7331_vm0 = vcmask 1040384   ;;  %vm7319_vm2 = vmmov 1  }
  0x20   : > { %v5133_v48 = vld [vmem:[%s5585_s9] sm:$0xff]  ;;  %v5134_v49 = vld [vmem:[%s5585_s9 + $0x8] sm:$0xff]  ;;  %v5135_v50 = vld [vmem:[%s5585_s9 + $0x10] sm:$0xff]  ;;  %v7450_v31 = vmov 0  ;;  %vm7318_vm4 = vcmask 1045504   ;;  %v5392_v39 = vmov 0  }
  0x21   : > { %v5136_v51 = vld [vmem:[%s5585_s9 + $0x18] sm:$0xff]  ;;  %v5137_v52 = vld [vmem:[%s5585_s9 + $0x20] sm:$0xff]  ;;  %v5138_v57 = vld [vmem:[%s5585_s9 + $0x28] sm:$0xff]  ;;  %v915_v20 = vadd.s32 16, %v5652_v15  ;;  %vm7317_vm5 = vsmask.f32 7424 }
  0x22   : > { %510 = vmatpush.bf16.msra.mxu0 %v4270_v22  ;;  %v5180_v60 = vld [vmem:[%s7311_s3 + $0x78] sm:$0xff]  ;;  %v5179_v61 = vld [vmem:[%s7311_s3 + $0x70] sm:$0xff]  ;;  %v5165_v63 = vld [vmem:[%s7311_s3] sm:$0xff]  ;;  %v917_v45 = vadd.s32 32, %v5652_v15  ;;  %v919_v11 = vadd.s32 48, %v5652_v15  ;;  %s269_s17 = sand.u32 1, %s5380_s25  }
  0x23   : > { %599 = vmatpush.bf16.msra.mxu1 %v4274_v23  ;;  %1856 = vmatpush.bf16.msra.mxu3 %v5170_v55  ;;  %v5139_v0 = vld [vmem:[%s5585_s9 + $0x30] sm:$0xff]  ;;  %v5178_v1 = vld [vmem:[%s7311_s3 + $0x68] sm:$0xff]  ;;  %v5177_v3 = vld [vmem:[%s7311_s3 + $0x60] sm:$0xff]  ;;  %v963_v23 = vand.u32 15, %v915_v20  ;;  %s4168_s18 = sshll.u32 %s269_s17, 8  ;;  %s5245_s20 = sshll.u32 %s5457_s28, 8 }
  0x24   : > { %1717 = vmatpush.bf16.msra.mxu2 %v5180_v60  ;;  %v5176_v4 = vld [vmem:[%s7311_s3 + $0x58] sm:$0xff]  ;;  %v5175_v5 = vld [vmem:[%s7311_s3 + $0x50] sm:$0xff]  ;;  %v5174_v7 = vld [vmem:[%s7311_s3 + $0x48] sm:$0xff]  ;;  %v7456_v60 = vmov 0  ;;  %v991_v20 = vand.u32 15, %v919_v11  ;;  %s7118_s19 = scalar_lea.vmem [#allocation3], %s4168_s18  ;;  %s4098_s22 = scalar_lea.hbm %s7315_s7, %s5245_s20 }
  0x25   : > { %v5140_v6 = vld [vmem:[%s5585_s9 + $0x38] sm:$0xff]  ;;  %v5173_v8 = vld [vmem:[%s7311_s3 + $0x40] sm:$0xff]  ;;  %vm5246_vm1 = vcmp.ne.s32.totalorder %v963_v23, 0  ;;  %v5142_v32 = vld [vmem:[%s5585_s9 + $0x48] sm:$0xff]  ;;  %s4099_s29 = sshll.u32 %s7118_s19, 4  ;;  %s4101_s8 = sshll.u32 %s4098_s22, 4  ;;  %s4100_s29 = int_to_ptr.vmem [resolvable:$true] %s4099_s29  ;;  %s4102_s8 = int_to_ptr.hbm [resolvable:$true] %s4101_s8 }
  0x26   : > { %511 = vmatpush.bf16.msra.mxu0 %v4262_v28  ;;  %v5204_v9 = vld [vmem:[%s7311_s3 + $0x138] sm:$0xff]  ;;  %v325_v10 = vld [vmem:[%s7310_s2] sm:$0x3]  ;;  %vm5672_vm3 = vmpackc.low %vm7319_vm2, %vm5246_vm1  ;;  %vm5248_vm8 = vcmp.ne.s32.totalorder %v991_v20, 0  ;;  %s4087_s28 = scalar_lea.sflag [#allocation4], %s269_s17  ;;  %s5340_s23 = sshra.s32 %s4102_s8, 4  ;;  %s5341_s23 = int_to_ptr.hbm [resolvable:$true] %s5340_s23 }
  0x27   : > { %600 = vmatpush.bf16.msra.mxu1 %v4266_v29  ;;  %1857 = vmatpush.bf16.msra.mxu3 %v5169_v56  ;;  %v5649_v12 = vperm.slane %v325_v10, 0  ;;  %v5141_v13 = vld [vmem:[%s5585_s9 + $0x40] sm:$0xff]  ;;  %v5188_v16 = vld [vmem:[%s7311_s3 + $0xb8] sm:$0xff]  ;;  %v7451_v31 = vsel %vm5672_vm3, 4294967295, %v7450_v31  ;;  %vm5744_vm9 = vmpackc.low %vm7319_vm2, %vm5248_vm8  ;;  %s5342_s13 = scalar_lea.hbm %s5341_s23, 256  ;;  %s5346_s16 = scalar_lea.hbm %s7315_s7, 512 }
  0x28   : > { %1718 = vmatpush.bf16.msra.mxu2 %v5179_v61  ;;  %v5196_v17 = vld [vmem:[%s7311_s3 + $0xf8] sm:$0xff]  ;;  %7452 = vst [vmem:[#allocation8_spill] sm:$0xff] %v7451_v31  ;;  %v5143_v61 = vld [vmem:[%s5585_s9 + $0x50] sm:$0xff]  ;;  %p5343_p11 = scmp.ne.s32.totalorder %s5341_s23, %s5342_s13  ;;  %p5347_p0 = scmp.lt.s32.totalorder %s5341_s23, %s7315_s7 }
  0x29   : > { %p5348_p1 = scmp.lt.s32.totalorder %s5346_s16, %s5342_s13 }
  0x2a   : > { %512 = vmatpush.bf16.msra.mxu0 %v4254_v34  ;;  %p5344_p12 = pnand %p5343_p11, %p5474_p5 }
  0x2b   : > { %601 = vmatpush.bf16.msra.mxu1 %v4258_v35  ;;  %1858 = vmatpush.bf16.msra.mxu3 %v5168_v58  ;;  %p5349_p2 = por %p5348_p1, %p5347_p0 }
  0x2c   : > { %1719 = vmatpush.bf16.msra.mxu2 %v5178_v1  ;;  %v5187_v1 = vld [vmem:[%s7311_s3 + $0xb0] sm:$0xff]  ;;  %p5345_p13 = pneg %p5344_p12 }
  0x2e   : > { %513 = vmatpush.bf16.msra.mxu0 %v4246_v40  ;;  %v5687_v40 = vrot.slane %v5392_v39, 1  ;;  %p5350_p3 = pnand %p5349_p2, %p5345_p13 }
  0x2f   : > { %602 = vmatpush.bf16.msra.mxu1 %v4250_v41  ;;  %1859 = vmatpush.bf16.msra.mxu3 %v5167_v59 }
  0x30   : > { %1720 = vmatpush.bf16.msra.mxu2 %v5177_v3  ;;  %7454 = vst [vmem:[#allocation10_spill] sm:$0xff] %v5687_v40 }
  0x32   : > { %514 = vmatpush.bf16.msra.mxu0 %v4238_v46 }
  0x33   : > { %603 = vmatpush.bf16.msra.mxu1 %v4242_v47  ;;  %1860 = vmatpush.bf16.msra.mxu3 %v5166_v62 }
  0x34   : > { %1721 = vmatpush.bf16.msra.mxu2 %v5176_v4 }
  0x35   : > { %515 = vmatmul.bf16.vlgmr.msra.gmra.mxu0 %v5133_v48 }
  0x36   : > { %604 = vmatmul.bf16.vlgmr.msra.gmra.mxu1 %v5133_v48  ;;  %2251 = vmatpush.bf16.msrb.mxu0 %v5188_v16 }
  0x37   : > { %1861 = vmatpush.bf16.msra.mxu3 %v5165_v63  ;;  %2485 = vmatpush.bf16.msrb.mxu1 %v5196_v17 }
  0x38   : > { %1722 = vmatpush.bf16.msra.mxu2 %v5175_v5 }
  0x3a   : > { %1862 = vmatmul.bf16.vlgmr.msra.gmra.mxu3 %v5390_v2  ;;  %v5195_v2 = vld [vmem:[%s7311_s3 + $0xf0] sm:$0xff]  ;;  %2252 = vmatpush.bf16.msrb.mxu0 %v5187_v1 }
  0x3b   : > { %2486 = vmatpush.bf16.msrb.mxu1 %v5195_v2 }
  0x3c   : > { %1723 = vmatpush.bf16.msra.mxu2 %v5174_v7 }
  0x40   : > { %1724 = vmatpush.bf16.msra.mxu2 %v5173_v8 }
  0x44   : > { %2688 = vmatpush.bf16.msrb.mxu2 %v5204_v9 }
  0x45   : > { %520 = vmatmul.bf16.gmra.mxu0 %v5134_v49 }
  0x46   : > { %609 = vmatmul.bf16.gmra.mxu1 %v5134_v49 }
  0x55   : > { %525 = vmatmul.bf16.gmra.mxu0 %v5135_v50 }
  0x56   : > { %614 = vmatmul.bf16.gmra.mxu1 %v5135_v50 }
  0x65   : > { %530 = vmatmul.bf16.gmra.mxu0 %v5136_v51 }
  0x66   : > { %619 = vmatmul.bf16.gmra.mxu1 %v5136_v51  ;;  %v977_v51 = vand.u32 15, %v917_v45 }
  0x68   : > { %vm5247_vm6 = vcmp.ne.s32.totalorder %v977_v51, 0 }
  0x69   : > { %vm5708_vm7 = vmpackc.low %vm7319_vm2, %vm5247_vm6 }
  0x6a   : > { %v7457_v60 = vsel %vm5708_vm7, 4294967295, %v7456_v60 }
  0x6b   : > { %7458 = vst [vmem:[#allocation12_spill] sm:$0xff] %v7457_v60 }
  0x75   : > { %535 = vmatmul.bf16.gmra.mxu0 %v5137_v52 }
  0x76   : > { %624 = vmatmul.bf16.gmra.mxu1 %v5137_v52  ;;  %v5203_v52 = vld [vmem:[%s7311_s3 + $0x130] sm:$0xff] }
  0x77   : > { %2689 = vmatpush.bf16.msrb.mxu2 %v5203_v52 }
  0x85   : > { %540 = vmatmul.bf16.gmra.mxu0 %v5138_v57 }
  0x86   : > { %629 = vmatmul.bf16.gmra.mxu1 %v5138_v57 }
  0x95   : > { %545 = vmatmul.bf16.gmra.mxu0 %v5139_v0 }
  0x96   : > { %634 = vmatmul.bf16.gmra.mxu1 %v5139_v0 }
  0xa5   : > { %550 = vmatmul.bf16.gmra.mxu0 %v5140_v6 }
  0xa6   : > { %639 = vmatmul.bf16.gmra.mxu1 %v5140_v6 }
  0xb2   : > { %v516_v14 = vpop.f32.mrf.mxu0 }
  0xb3   : > { %v517_v18 = vadd.f32 %v516_v14, %v5649_v12  ;;  %v5661_v19 = vpop.f32.mrf.mxu1 }
  0xb4   : > { %7448 = vst [vmem:[#allocation6_spill] sm:$0xff] %v5661_v19 }
  0xb5   : > { %555 = vmatmul.bf16.gmra.mxu0 %v5141_v13  ;;  %v685_v21 = vmax.f32 %v517_v18, 0.0 }
  0xb6   : > { %644 = vmatmul.bf16.gmra.mxu1 %v5141_v13 }
  0xb7   : > { %v814_v24 = vrot.slane %v685_v21, 7 }
  0xb9   : > { %v5668_v28 = vsel %vm7331_vm0, 0.0, %v814_v24 }
  0xba   : > { %v518_v22 = vpop.f32.mrf.mxu0  ;;  %v7316_v33 = vrot.slane %v5668_v28, 2 }
  0xbb   : > { %v519_v25 = vadd.f32 %v518_v22, %v5649_v12  ;;  %v5665_v26 = vpop.f32.mrf.mxu1 }
  0xbc   : > { %7449 = vst [vmem:[#allocation7_spill] sm:$0xff] %v5665_v26 }
  0xbd   : > { %v687_v27 = vmax.f32 %v519_v25, 0.0 }
  0xbf   : > { %v815_v29 = vrot.slane %v687_v27, 7 }
  0xc1   : > { %v816_v30 = vsel %vm7331_vm0, %v814_v24, %v815_v29 }
  0xc2   : > { %v2046_v34 = vrot.slane %v816_v30, 2  ;;  %v521_v35 = vpop.f32.mrf.mxu0  ;;  %v5679_v36 = vpack.c.bf16 %v816_v30, %v5668_v28  ;;  %v7463_v30 = vmov 0 }
  0xc3   : > { %v522_v37 = vadd.f32 %v521_v35, %v5649_v12  ;;  %v5682_v38 = vpop.f32.mrf.mxu1  ;;  %v7464_v30 = vsel %vm5744_vm9, 4294967295, %v7463_v30 }
  0xc4   : > { %7453 = vst [vmem:[#allocation9_spill] sm:$0xff] %v5682_v38  ;;  %4382 = vmatmul.msk.bf16.gmra.mxu3 %vm5672_vm3, %v5679_v36  ;;  %v1529_v41 = vshll.u32 %v5679_v36, 16  ;;  %v2047_v42 = vsel %vm7318_vm4, %v7316_v33, %v2046_v34  ;;  %v1533_v5 = vshrl.u32 %v5679_v36, 16 }
  0xc5   : > { %v689_v43 = vmax.f32 %v522_v37, 0.0  ;;  %560 = vmatmul.bf16.gmra.mxu0 %v5142_v32  ;;  %7465 = vst [vmem:[#allocation17_spill] sm:$0xff] %v7464_v30 }
  0xc6   : > { %649 = vmatmul.bf16.gmra.mxu1 %v5142_v32  ;;  %v1531_v44 = vrot.slane %v1529_v41, 1  ;;  %v5144_v32 = vld [vmem:[%s5585_s9 + $0x58] sm:$0xff] }
  0xc7   : > { %v817_v46 = vrot.slane %v689_v43, 7 }
  0xc8   : > { %v1532_v47 = vsel %vm7317_vm5, %v5687_v40, %v1531_v44  ;;  %v1535_v9 = vor.u32 %v1533_v5, %v1531_v44  ;;  %v5145_v5 = vld [vmem:[%s5585_s9 + $0x60] sm:$0xff] }
  0xc9   : > { %v818_v48 = vsel %vm7331_vm0, %v815_v29, %v817_v46  ;;  %1725 = vmatmul.bf16.vlgmr.msra.gmra.mxu2 %v1532_v47 }
  0xca   : > { %v2048_v49 = vrot.slane %v818_v48, 2  ;;  %v523_v50 = vpop.f32.mrf.mxu0 }
  0xcb   : > { %v524_v53 = vadd.f32 %v523_v50, %v5649_v12  ;;  %v5701_v54 = vpop.f32.mrf.mxu1 }
  0xcc   : > { %7455 = vst [vmem:[#allocation11_spill] sm:$0xff] %v5701_v54  ;;  %v2049_v55 = vsel %vm7318_vm4, %v2046_v34, %v2048_v49 }
  0xcd   : > { %v691_v56 = vmax.f32 %v524_v53, 0.0  ;;  %v5704_v57 = vpack.c.bf16 %v2049_v55, %v2047_v42 }
  0xcf   : > { %v819_v58 = vrot.slane %v691_v56, 7  ;;  %v5202_v56 = vld [vmem:[%s7311_s3 + $0x128] sm:$0xff] }
  0xd0   : > { %2690 = vmatpush.bf16.msrb.mxu2 %v5202_v56 }
  0xd1   : > { %v820_v59 = vsel %vm7331_vm0, %v817_v46, %v819_v58 }
  0xd2   : > { %v5713_v62 = vpack.c.bf16 %v820_v59, %v818_v48  ;;  %v2050_v63 = vrot.slane %v820_v59, 2  ;;  %v526_v0 = vpop.f32.mrf.mxu0  ;;  %v921_v48 = vadd.s32 64, %v5652_v15 }
  0xd3   : > { %v527_v3 = vadd.f32 %v526_v0, %v5649_v12  ;;  %v5722_v4 = vpop.f32.mrf.mxu1 }
  0xd4   : > { %7459 = vst [vmem:[#allocation13_spill] sm:$0xff] %v5713_v62  ;;  %4386 = vmatmul.msk.bf16.gmra.mxu3 %vm5708_vm7, %v5713_v62  ;;  %v1537_v6 = vshll.u32 %v5713_v62, 16  ;;  %v2051_v7 = vsel %vm7318_vm4, %v2048_v49, %v2050_v63  ;;  %v1541_v42 = vshrl.u32 %v5713_v62, 16  ;;  %v1005_v55 = vand.u32 15, %v921_v48 }
  0xd5   : > { %7460 = vst [vmem:[#allocation14_spill] sm:$0xff] %v5722_v4  ;;  %v693_v8 = vmax.f32 %v527_v3, 0.0  ;;  %565 = vmatmul.bf16.gmra.mxu0 %v5143_v61  ;;  %v7470_v3 = vmov 0  ;;  %v7477_v48 = vmov 0 }
  0xd6   : > { %654 = vmatmul.bf16.gmra.mxu1 %v5143_v61  ;;  %v1539_v10 = vrot.slane %v1537_v6, 1  ;;  %vm5249_vm10 = vcmp.ne.s32.totalorder %v1005_v55, 0 }
  0xd7   : > { %v821_v13 = vrot.slane %v693_v8, 7  ;;  %vm5777_vm11 = vmpackc.low %vm7319_vm2, %vm5249_vm10 }
  0xd8   : > { %v5732_v14 = vsel %vm7317_vm5, %v1535_v9, %v1539_v10  ;;  %v1543_v46 = vor.u32 %v1541_v42, %v1539_v10  ;;  %v7471_v3 = vsel %vm5777_vm11, 4294967295, %v7470_v3  ;;  %v5186_v9 = vld [vmem:[%s7311_s3 + $0xa8] sm:$0xff] }
  0xd9   : > { %v822_v16 = vsel %vm7331_vm0, %v819_v58, %v821_v13  ;;  %1730 = vmatmul.bf16.gmra.mxu2 %v5732_v14  ;;  %7472 = vst [vmem:[#allocation22_spill] sm:$0xff] %v7471_v3  ;;  %v5194_v10 = vld [vmem:[%s7311_s3 + $0xe8] sm:$0xff]  ;;  %2253 = vmatpush.bf16.msrb.mxu0 %v5186_v9  ;;  %v5184_v9 = vld [vmem:[%s7311_s3 + $0x98] sm:$0xff] }
  0xda   : > { %v2052_v17 = vrot.slane %v822_v16, 2  ;;  %v528_v18 = vpop.f32.mrf.mxu0  ;;  %2487 = vmatpush.bf16.msrb.mxu1 %v5194_v10  ;;  %v5192_v10 = vld [vmem:[%s7311_s3 + $0xd8] sm:$0xff] }
  0xdb   : > { %v529_v21 = vadd.f32 %v528_v18, %v5649_v12  ;;  %v5737_v22 = vpop.f32.mrf.mxu1 }
  0xdc   : > { %7461 = vst [vmem:[#allocation15_spill] sm:$0xff] %v5737_v22  ;;  %v2053_v23 = vsel %vm7318_vm4, %v2050_v63, %v2052_v17 }
  0xdd   : > { %v695_v24 = vmax.f32 %v529_v21, 0.0  ;;  %v5740_v25 = vpack.c.bf16 %v2053_v23, %v2051_v7  ;;  %v923_v21 = vadd.s32 80, %v5652_v15 }
  0xdf   : > { %7462 = vst [vmem:[#allocation16_spill] sm:$0xff] %v5740_v25  ;;  %v823_v27 = vrot.slane %v695_v24, 7 }
  0xe1   : > { %v824_v29 = vsel %vm7331_vm0, %v821_v13, %v823_v27 }
  0xe2   : > { %v5749_v34 = vpack.c.bf16 %v824_v29, %v822_v16  ;;  %v2054_v35 = vrot.slane %v824_v29, 2  ;;  %v531_v37 = vpop.f32.mrf.mxu0 }
  0xe3   : > { %v532_v39 = vadd.f32 %v531_v37, %v5649_v12  ;;  %v5752_v41 = vpop.f32.mrf.mxu1 }
  0xe4   : > { %7466 = vst [vmem:[#allocation18_spill] sm:$0xff] %v5749_v34  ;;  %4390 = vmatmul.msk.bf16.gmra.mxu3 %vm5744_vm9, %v5749_v34  ;;  %v1545_v43 = vshll.u32 %v5749_v34, 16  ;;  %v2055_v44 = vsel %vm7318_vm4, %v2052_v17, %v2054_v35  ;;  %v1549_v16 = vshrl.u32 %v5749_v34, 16 }
  0xe5   : > { %7467 = vst [vmem:[#allocation19_spill] sm:$0xff] %v5752_v41  ;;  %v697_v45 = vmax.f32 %v532_v39, 0.0  ;;  %570 = vmatmul.bf16.gmra.mxu0 %v5144_v32 }
  0xe6   : > { %659 = vmatmul.bf16.gmra.mxu1 %v5144_v32  ;;  %v1547_v47 = vrot.slane %v1545_v43, 1 }
  0xe7   : > { %v825_v49 = vrot.slane %v697_v45, 7 }
  0xe8   : > { %v5762_v50 = vsel %vm7317_vm5, %v1543_v46, %v1547_v47  ;;  %v1551_v23 = vor.u32 %v1549_v16, %v1547_v47 }
  0xe9   : > { %v826_v51 = vsel %vm7331_vm0, %v823_v27, %v825_v49  ;;  %1735 = vmatmul.bf16.gmra.mxu2 %v5762_v50 }
  0xea   : > { %v2056_v52 = vrot.slane %v826_v51, 2  ;;  %v533_v53 = vpop.f32.mrf.mxu0 }
  0xeb   : > { %v534_v58 = vadd.f32 %v533_v53, %v5649_v12  ;;  %v5770_v59 = vpop.f32.mrf.mxu1  ;;  %v5193_v53 = vld [vmem:[%s7311_s3 + $0xe0] sm:$0xff] }
  0xec   : > { %7468 = vst [vmem:[#allocation20_spill] sm:$0xff] %v5770_v59  ;;  %v2057_v61 = vsel %vm7318_vm4, %v2054_v35, %v2056_v52  ;;  %v1019_v35 = vand.u32 15, %v923_v21  ;;  %2488 = vmatpush.bf16.msrb.mxu1 %v5193_v53  ;;  %v918_v59 = vadd.s32 40, %v5652_v15 }
  0xed   : > { %v699_v63 = vmax.f32 %v534_v58, 0.0  ;;  %v5773_v0 = vpack.c.bf16 %v2057_v61, %v2055_v44 }
  0xee   : > { %vm5250_vm12 = vcmp.ne.s32.totalorder %v1019_v35, 0  ;;  %v5201_v35 = vld [vmem:[%s7311_s3 + $0x120] sm:$0xff] }
  0xef   : > { %7469 = vst [vmem:[#allocation21_spill] sm:$0xff] %v5773_v0  ;;  %v827_v1 = vrot.slane %v699_v63, 7  ;;  %vm5812_vm13 = vmpackc.low %vm7319_vm2, %vm5250_vm12  ;;  %2691 = vmatpush.bf16.msrb.mxu2 %v5201_v35 }
  0xf0   : > { %v7478_v48 = vsel %vm5812_vm13, 4294967295, %v7477_v48  ;;  %2489 = vmatpush.bf16.msrb.mxu1 %v5192_v10 }
  0xf1   : > { %v828_v2 = vsel %vm7331_vm0, %v825_v49, %v827_v1  ;;  %7479 = vst [vmem:[#allocation27_spill] sm:$0xff] %v7478_v48 }
  0xf2   : > { %v5782_v6 = vpack.c.bf16 %v828_v2, %v826_v51  ;;  %v2058_v7 = vrot.slane %v828_v2, 2  ;;  %v536_v8 = vpop.f32.mrf.mxu0  ;;  %v5146_v51 = vld [vmem:[%s5585_s9 + $0x68] sm:$0xff] }
  0xf3   : > { %v537_v11 = vadd.f32 %v536_v8, %v5649_v12  ;;  %v5791_v13 = vpop.f32.mrf.mxu1  ;;  %v925_v8 = vadd.s32 96, %v5652_v15 }
  0xf4   : > { %7473 = vst [vmem:[#allocation23_spill] sm:$0xff] %v5782_v6  ;;  %4394 = vmatmul.msk.bf16.gmra.mxu3 %vm5777_vm11, %v5782_v6  ;;  %v1553_v17 = vshll.u32 %v5782_v6, 16  ;;  %v2059_v18 = vsel %vm7318_vm4, %v2056_v52, %v2058_v7  ;;  %v5185_v52 = vld [vmem:[%s7311_s3 + $0xa0] sm:$0xff] }
  0xf5   : > { %7474 = vst [vmem:[#allocation24_spill] sm:$0xff] %v5791_v13  ;;  %v701_v20 = vmax.f32 %v537_v11, 0.0  ;;  %575 = vmatmul.bf16.gmra.mxu0 %v5145_v5  ;;  %v1033_v21 = vand.u32 15, %v925_v8  ;;  %v7517_v13 = vmov 0 }
  0xf6   : > { %664 = vmatmul.bf16.gmra.mxu1 %v5145_v5  ;;  %v1555_v24 = vrot.slane %v1553_v17, 1  ;;  %2254 = vmatpush.bf16.msrb.mxu0 %v5185_v52  ;;  %v7485_v52 = vmov 0 }
  0xf7   : > { %v829_v27 = vrot.slane %v701_v20, 7  ;;  %vm5251_vm14 = vcmp.ne.s32.totalorder %v1033_v21, 0 }
  0xf8   : > { %v5801_v29 = vsel %vm7317_vm5, %v1551_v23, %v1555_v24  ;;  %v5183_v23 = vld [vmem:[%s7311_s3 + $0x90] sm:$0xff]  ;;  %vm5869_vm15 = vmpackc.low %vm7319_vm2, %vm5251_vm14 }
  0xf9   : > { %v830_v32 = vsel %vm7331_vm0, %v827_v1, %v829_v27  ;;  %1740 = vmatmul.bf16.gmra.mxu2 %v5801_v29  ;;  %v1557_v1 = vshrl.u32 %v5782_v6, 16  ;;  %v7486_v52 = vsel %vm5869_vm15, 4294967295, %v7485_v52 }
  0xfa   : > { %v2060_v37 = vrot.slane %v830_v32, 2  ;;  %v538_v39 = vpop.f32.mrf.mxu0  ;;  %2255 = vmatpush.bf16.msrb.mxu0 %v5184_v9  ;;  %7487 = vst [vmem:[#allocation33_spill] sm:$0xff] %v7486_v52 }
  0xfb   : > { %v539_v42 = vadd.f32 %v538_v39, %v5649_v12  ;;  %v5806_v43 = vpop.f32.mrf.mxu1  ;;  %v1559_v11 = vor.u32 %v1557_v1, %v1555_v24  ;;  %v5191_v24 = vld [vmem:[%s7311_s3 + $0xd0] sm:$0xff] }
  0xfc   : > { %7475 = vst [vmem:[#allocation25_spill] sm:$0xff] %v5806_v43  ;;  %v2061_v44 = vsel %vm7318_vm4, %v2058_v7, %v2060_v37  ;;  %2490 = vmatpush.bf16.msrb.mxu1 %v5191_v24 }
  0xfd   : > { %v703_v45 = vmax.f32 %v539_v42, 0.0  ;;  %v5809_v46 = vpack.c.bf16 %v2061_v44, %v2059_v18 }
  0xfe   : > { %2256 = vmatpush.bf16.msrb.mxu0 %v5183_v23  ;;  %v927_v23 = vadd.s32 112, %v5652_v15 }
  0xff   : > { %7476 = vst [vmem:[#allocation26_spill] sm:$0xff] %v5809_v46  ;;  %v831_v47 = vrot.slane %v703_v45, 7  ;;  %v5182_v45 = vld [vmem:[%s7311_s3 + $0x88] sm:$0xff] }
 0x101   : > { %v832_v49 = vsel %vm7331_vm0, %v829_v27, %v831_v47 }
 0x102   : > { %v5824_v55 = vpack.c.bf16 %v832_v49, %v830_v32  ;;  %v2062_v56 = vrot.slane %v832_v49, 2  ;;  %v541_v58 = vpop.f32.mrf.mxu0  ;;  %2257 = vmatpush.bf16.msrb.mxu0 %v5182_v45 }
 0x103   : > { %v542_v61 = vadd.f32 %v541_v58, %v5649_v12  ;;  %v5827_v63 = vpop.f32.mrf.mxu1  ;;  %v5181_v58 = vld [vmem:[%s7311_s3 + $0x80] sm:$0xff] }
 0x104   : > { %7480 = vst [vmem:[#allocation28_spill] sm:$0xff] %v5824_v55  ;;  %4398 = vmatmul.msk.bf16.gmra.mxu3 %vm5812_vm13, %v5824_v55  ;;  %v1561_v2 = vshll.u32 %v5824_v55, 16  ;;  %v2063_v5 = vsel %vm7318_vm4, %v2060_v37, %v2062_v56  ;;  %v1565_v9 = vshrl.u32 %v5824_v55, 16 }
 0x105   : > { %7481 = vst [vmem:[#allocation29_spill] sm:$0xff] %v5827_v63  ;;  %v705_v7 = vmax.f32 %v542_v61, 0.0  ;;  %580 = vmatmul.bf16.gmra.mxu0 %v5146_v51  ;;  %v5189_v61 = vld [vmem:[%s7311_s3 + $0xc0] sm:$0xff] }
 0x106   : > { %669 = vmatmul.bf16.gmra.mxu1 %v5146_v51  ;;  %v1563_v16 = vrot.slane %v1561_v2, 1  ;;  %2258 = vmatpush.bf16.msrb.mxu0 %v5181_v58 }
 0x107   : > { %v833_v17 = vrot.slane %v705_v7, 7 }
 0x108   : > { %v5843_v18 = vsel %vm7317_vm5, %v1559_v11, %v1563_v16 }
 0x109   : > { %7482 = vst [vmem:[#allocation30_spill] sm:$0xff] %v5843_v18  ;;  %v834_v20 = vsel %vm7331_vm0, %v831_v47, %v833_v17  ;;  %1745 = vmatmul.bf16.gmra.mxu2 %v5843_v18  ;;  %v5190_v47 = vld [vmem:[%s7311_s3 + $0xc8] sm:$0xff] }
 0x10a   : > { %v2064_v27 = vrot.slane %v834_v20, 2  ;;  %v543_v32 = vpop.f32.mrf.mxu0  ;;  %2491 = vmatpush.bf16.msrb.mxu1 %v5190_v47 }
 0x10b   : > { %v544_v37 = vadd.f32 %v543_v32, %v5649_v12  ;;  %v5857_v39 = vpop.f32.mrf.mxu1 }
 0x10c   : > { %7483 = vst [vmem:[#allocation31_spill] sm:$0xff] %v5857_v39  ;;  %v2065_v42 = vsel %vm7318_vm4, %v2062_v56, %v2064_v27  ;;  %v5147_v56 = vld [vmem:[%s5585_s9 + $0x70] sm:$0xff] }
 0x10d   : > { %v707_v44 = vmax.f32 %v544_v37, 0.0  ;;  %v5866_v49 = vpack.c.bf16 %v2065_v42, %v2063_v5 }
 0x10e   : > { %2492 = vmatpush.bf16.msrb.mxu1 %v5189_v61  ;;  %v5148_v61 = vld [vmem:[%s5585_s9 + $0x78] sm:$0xff] }
 0x10f   : > { %7484 = vst [vmem:[#allocation32_spill] sm:$0xff] %v5866_v49  ;;  %v835_v51 = vrot.slane %v707_v44, 7  ;;  %v1047_v44 = vand.u32 15, %v927_v23 }
 0x111   : > { %v836_v53 = vsel %vm7331_vm0, %v833_v17, %v835_v51  ;;  %vm5252_vm1 = vcmp.ne.s32.totalorder %v1047_v44, 0 }
 0x112   : > { %v5881_v1 = vpack.c.bf16 %v836_v53, %v834_v20  ;;  %v2066_v2 = vrot.slane %v836_v53, 2  ;;  %v546_v5 = vpop.f32.mrf.mxu0  ;;  %v1567_v20 = vor.u32 %v1565_v9, %v1563_v16  ;;  %vm5906_vm6 = vmpackc.low %vm7319_vm2, %vm5252_vm1 }
 0x113   : > { %v547_v7 = vadd.f32 %v546_v5, %v5649_v12  ;;  %v5884_v8 = vpop.f32.mrf.mxu1 }
 0x114   : > { %7488 = vst [vmem:[#allocation34_spill] sm:$0xff] %v5881_v1  ;;  %4402 = vmatmul.msk.bf16.gmra.mxu3 %vm5869_vm15, %v5881_v1  ;;  %v1569_v10 = vshll.u32 %v5881_v1, 16  ;;  %v2067_v17 = vsel %vm7318_vm4, %v2064_v27, %v2066_v2 }
 0x115   : > { %7489 = vst [vmem:[#allocation35_spill] sm:$0xff] %v5884_v8  ;;  %v709_v11 = vmax.f32 %v547_v7, 0.0  ;;  %585 = vmatmul.bf16.gmra.mxu0 %v5147_v56 }
 0x116   : > { %674 = vmatmul.bf16.gmra.mxu1 %v5147_v56  ;;  %v1571_v21 = vrot.slane %v1569_v10, 1 }
 0x117   : > { %v837_v24 = vrot.slane %v709_v11, 7  ;;  %v1573_v11 = vshrl.u32 %v5881_v1, 16 }
 0x118   : > { %v5894_v32 = vsel %vm7317_vm5, %v1567_v20, %v1571_v21 }
 0x119   : > { %7490 = vst [vmem:[#allocation36_spill] sm:$0xff] %v5894_v32  ;;  %v838_v35 = vsel %vm7331_vm0, %v835_v51, %v837_v24  ;;  %1750 = vmatmul.bf16.gmra.mxu2 %v5894_v32  ;;  %v7493_v51 = vmov 0 }
 0x11a   : > { %v2068_v37 = vrot.slane %v838_v35, 2  ;;  %v548_v42 = vpop.f32.mrf.mxu0  ;;  %v7494_v51 = vsel %vm5906_vm6, 4294967295, %v7493_v51 }
 0x11b   : > { %v549_v45 = vadd.f32 %v548_v42, %v5649_v12  ;;  %v5899_v27 = vpop.f32.mrf.mxu1  ;;  %7495 = vst [vmem:[#allocation39_spill] sm:$0xff] %v7494_v51  ;;  %v929_v42 = vadd.s32 128, %v5652_v15 }
 0x11c   : > { %7491 = vst [vmem:[#allocation37_spill] sm:$0xff] %v5899_v27  ;;  %v2069_v16 = vsel %vm7318_vm4, %v2066_v2, %v2068_v37  ;;  %v7502_v27 = vrot.slane %v5668_v28, 2 }
 0x11d   : > { %v711_v47 = vmax.f32 %v549_v45, 0.0  ;;  %v5902_v53 = vpack.c.bf16 %v2069_v16, %v2067_v17  ;;  %v914_v45 = vadd.s32 8, %v5652_v15 }
 0x11f   : > { %7492 = vst [vmem:[#allocation38_spill] sm:$0xff] %v5902_v53  ;;  %v839_v56 = vrot.slane %v711_v47, 7 }
 0x121   : > { %v840_v58 = vsel %vm7331_vm0, %v837_v24, %v839_v56  ;;  %v1575_v24 = vor.u32 %v1573_v11, %v1571_v21  ;;  %v5200_v21 = vld [vmem:[%s7311_s3 + $0x118] sm:$0xff]  ;;  %v956_v11 = vand.u32 15, %v914_v45 }
 0x122   : > { %v5911_v5 = vpack.c.bf16 %v840_v58, %v838_v35  ;;  %v2070_v7 = vrot.slane %v840_v58, 2  ;;  %v551_v9 = vpop.f32.mrf.mxu0  ;;  %2692 = vmatpush.bf16.msrb.mxu2 %v5200_v21 }
 0x123   : > { %v552_v10 = vadd.f32 %v551_v9, %v5649_v12  ;;  %v5914_v2 = vpop.f32.mrf.mxu1  ;;  %vm5261_vm10 = vcmp.ne.s32.totalorder %v956_v11, 15 }
 0x124   : > { %7496 = vst [vmem:[#allocation40_spill] sm:$0xff] %v5911_v5  ;;  %4406 = vmatmul.msk.bf16.gmra.mxu3 %vm5906_vm6, %v5911_v5  ;;  %v1577_v17 = vshll.u32 %v5911_v5, 16  ;;  %v2071_v23 = vsel %vm7318_vm4, %v2068_v37, %v2070_v7  ;;  %vm5954_vm1 = vmpackc.low %vm5261_vm10, %vm7319_vm2 }
 0x125   : > { %7497 = vst [vmem:[#allocation41_spill] sm:$0xff] %v5914_v2  ;;  %v713_v20 = vmax.f32 %v552_v10, 0.0  ;;  %590 = vmatmul.bf16.gmra.mxu0 %v5148_v61  ;;  %v1061_v10 = vand.u32 15, %v929_v42 }
 0x126   : > { %679 = vmatmul.bf16.gmra.mxu1 %v5148_v61  ;;  %v1579_v35 = vrot.slane %v1577_v17, 1  ;;  %v5393_v17 = vmov 0.0  }
 0x127   : > { %v841_v44 = vrot.slane %v713_v20, 7  ;;  %v5935_v20 = vrot.slane %v5393_v17, 2  ;;  %vm5253_vm8 = vcmp.ne.s32.totalorder %v1061_v10, 0  ;;  %v7503_v17 = vmov 0 }
 0x128   : > { %v5925_v16 = vsel %vm7317_vm5, %v1575_v24, %v1579_v35  ;;  %v949_v24 = vand.u32 15, %v5652_v15  ;;  %vm5947_vm14 = vmpackc.low %vm7319_vm2, %vm5253_vm8 }
 0x129   : > { %7498 = vst [vmem:[#allocation42_spill] sm:$0xff] %v5925_v16  ;;  %v842_v47 = vsel %vm7331_vm0, %v839_v56, %v841_v44  ;;  %1755 = vmatmul.bf16.gmra.mxu2 %v5925_v16  ;;  %v7504_v17 = vsel %vm5947_vm14, 4294967295, %v7503_v17 }
 0x12a   : > { %v2072_v58 = vrot.slane %v842_v47, 2  ;;  %v553_v9 = vpop.f32.mrf.mxu0  ;;  %7500 = vst [vmem:[#allocation44_spill] sm:$0xff] %v5935_v20  ;;  %vm5277_vm12 = vcmp.ne.s32.totalorder %v949_v24, 0 }
 0x12b   : > { %v554_v37 = vadd.f32 %v553_v9, %v5649_v12  ;;  %v5933_v61 = vpop.f32.mrf.mxu1  ;;  %v2045_v9 = vsel %vm7318_vm4, %v5935_v20, %v7502_v27  ;;  %7505 = vst [vmem:[#allocation46_spill] sm:$0xff] %v7504_v17  ;;  %vm5963_vm8 = vmpackc.low %vm7319_vm2, %vm5277_vm12  ;;  %v5214_v17 = vld [vmem:[%s7311_s3 + $0x188] sm:$0xff] }
 0x12c   : > { %7499 = vst [vmem:[#allocation43_spill] sm:$0xff] %v5933_v61  ;;  %v2073_v56 = vsel %vm7318_vm4, %v2070_v7, %v2072_v58  ;;  %v4489_v28 = vpack.c.bf16 %v2045_v9, %v5935_v20  ;;  %v916_v61 = vadd.s32 24, %v5652_v15 }
 0x12d   : > { %v715_v33 = vmax.f32 %v554_v37, 0.0  ;;  %v5939_v2 = vpack.c.bf16 %v2073_v56, %v2071_v23  ;;  %v1581_v37 = vshrl.u32 %v5911_v5, 16 }
 0x12f   : > { %7501 = vst [vmem:[#allocation45_spill] sm:$0xff] %v5939_v2  ;;  %v843_v42 = vrot.slane %v715_v33, 7  ;;  %v7507_v33 = vmov 0  ;;  %v1583_v9 = vor.u32 %v1581_v37, %v1579_v35  ;;  %v970_v35 = vand.u32 15, %v916_v61 }
 0x130   : > { %v7508_v33 = vsel %vm5954_vm1, 4294967295, %v7507_v33 }
 0x131   : > { %v844_v45 = vsel %vm7331_vm0, %v841_v44, %v843_v42  ;;  %7509 = vst [vmem:[#allocation48_spill] sm:$0xff] %v7508_v33  ;;  %v7511_v44 = vmov 0  ;;  %vm5262_vm12 = vcmp.ne.s32.totalorder %v970_v35, 15 }
 0x132   : > { %v5951_v7 = vpack.c.bf16 %v844_v45, %v842_v47  ;;  %v2074_v23 = vrot.slane %v844_v45, 2  ;;  %v556_v21 = vpop.f32.mrf.mxu0  ;;  %v7512_v44 = vsel %vm5963_vm8, 4294967295, %v7511_v44  ;;  %v5967_v47 = vpop.f32.mrf.mxu3 }
 0x133   : > { %v557_v27 = vadd.f32 %v556_v21, %v5649_v12  ;;  %v5960_v10 = vpop.f32.mrf.mxu1  ;;  %7513 = vst [vmem:[#allocation50_spill] sm:$0xff] %v7512_v44  ;;  %v931_v21 = vadd.s32 144, %v5652_v15 }
 0x134   : > { %7506 = vst [vmem:[#allocation47_spill] sm:$0xff] %v5951_v7  ;;  %4410 = vmatmul.msk.bf16.gmra.mxu3 %vm5947_vm14, %v5951_v7  ;;  %v1585_v11 = vshll.u32 %v5951_v7, 16  ;;  %v2075_v56 = vsel %vm7318_vm4, %v2072_v58, %v2074_v23 }
 0x135   : > { %7510 = vst [vmem:[#allocation49_spill] sm:$0xff] %v5960_v10  ;;  %v717_v24 = vmax.f32 %v557_v27, 0.0  ;;  %4490 = vmatmul.msk.bf16.vlgmr.msrb.gmra.mxu0 %vm5954_vm1, %v4489_v28  ;;  %v1075_v39 = vand.u32 15, %v931_v21 }
 0x136   : > { %4602 = vmatmul.msk.bf16.vlgmr.msrb.gmra.mxu1 %vm5963_vm8, %v5679_v36  ;;  %v1587_v45 = vrot.slane %v1585_v11, 1 }
 0x137   : > { %v845_v10 = vrot.slane %v717_v24, 7  ;;  %vm5254_vm10 = vcmp.ne.s32.totalorder %v1075_v39, 0  ;;  %v5212_v39 = vld [vmem:[%s7311_s3 + $0x178] sm:$0xff] }
 0x138   : > { %v5983_v8 = vsel %vm7317_vm5, %v1583_v9, %v1587_v45  ;;  %vm5995_vm5 = vmpackc.low %vm7319_vm2, %vm5254_vm10  ;;  %2929 = vmatpush.bf16.msrb.mxu3 %v5212_v39  ;;  %vm7524_vm10 = vcmask 1045504  }
 0x139   : > { %7514 = vst [vmem:[#allocation51_spill] sm:$0xff] %v5983_v8  ;;  %v846_v27 = vsel %vm7331_vm0, %v843_v42, %v845_v10  ;;  %1760 = vmatmul.bf16.gmra.mxu2 %v5983_v8  ;;  %v7518_v13 = vsel %vm5995_vm5, 4294967295, %v7517_v13 }
 0x13a   : > { %v2076_v28 = vrot.slane %v846_v27, 2  ;;  %v558_v58 = vpop.f32.mrf.mxu0  ;;  %v1865_v24 = vpop.f32.mrf.mxu3  ;;  %7519 = vst [vmem:[#allocation54_spill] sm:$0xff] %v7518_v13 }
 0x13b   : > { %v559_v63 = vadd.f32 %v558_v58, %v5649_v12  ;;  %v5988_v36 = vpop.f32.mrf.mxu1 }
 0x13c   : > { %7515 = vst [vmem:[#allocation52_spill] sm:$0xff] %v5988_v36  ;;  %v2077_v37 = vsel %vm7318_vm4, %v2074_v23, %v2076_v28  ;;  %vm6002_vm4 = vmpackc.low %vm5262_vm12, %vm7319_vm2  ;;  %vm7525_vm12 = vsmask.f32 7424 }
 0x13d   : > { %v719_v11 = vmax.f32 %v559_v63, 0.0  ;;  %v5991_v43 = vpack.c.bf16 %v2077_v37, %v2075_v56  ;;  %v7520_v63 = vmov 0  ;;  %v1589_v56 = vshrl.u32 %v5951_v7, 16 }
 0x13e   : > { %v7521_v63 = vsel %vm6002_vm4, 4294967295, %v7520_v63 }
 0x13f   : > { %7516 = vst [vmem:[#allocation53_spill] sm:$0xff] %v5991_v43  ;;  %v847_v9 = vrot.slane %v719_v11, 7  ;;  %v1591_v11 = vor.u32 %v1589_v56, %v1587_v45  ;;  %v5199_v45 = vld [vmem:[%s7311_s3 + $0x110] sm:$0xff] }
 0x140   : > { %7522 = vst [vmem:[#allocation55_spill] sm:$0xff] %v7521_v63  ;;  %2693 = vmatpush.bf16.msrb.mxu2 %v5199_v45 }
 0x141   : > { %v848_v42 = vsel %vm7331_vm0, %v845_v10, %v847_v9 }
 0x142   : > { %v5999_v21 = vpack.c.bf16 %v848_v42, %v846_v27  ;;  %v2078_v58 = vrot.slane %v848_v42, 2  ;;  %v561_v61 = vpop.f32.mrf.mxu0 }
 0x143   : > { %v562_v23 = vadd.f32 %v561_v61, %v5649_v12  ;;  %v6010_v10 = vpop.f32.mrf.mxu1  ;;  %v933_v61 = vadd.s32 160, %v5652_v15 }
 0x144   : > { %7523 = vst [vmem:[#allocation56_spill] sm:$0xff] %v6010_v10  ;;  %4414 = vmatmul.msk.bf16.gmra.mxu3 %vm5995_vm5, %v5999_v21  ;;  %v1593_v27 = vshll.u32 %v5999_v21, 16  ;;  %v2079_v37 = vsel %vm7524_vm10, %v2076_v28, %v2078_v58 }
 0x145   : > { %v721_v35 = vmax.f32 %v562_v23, 0.0  ;;  %4494 = vmatmul.msk.bf16.gmra.mxu0 %vm6002_vm4, %v5704_v57  ;;  %v1089_v22 = vand.u32 15, %v933_v61 }
 0x146   : > { %4606 = vmatmul.msk.bf16.gmra.mxu1 %vm5672_vm3, %v5713_v62  ;;  %v1595_v42 = vrot.slane %v1593_v27, 1  ;;  %vm7529_vm3 = vmmov 1  }
 0x147   : > { %v849_v10 = vrot.slane %v721_v35, 7  ;;  %v1868_v36 = vpop.f32.mrf.mxu3  ;;  %v984_v35 = vand.u32 15, %v918_v59 }
 0x148   : > { %v6027_v23 = vsel %vm7525_vm12, %v1591_v11, %v1595_v42  ;;  %vm5255_vm12 = vcmp.ne.s32.totalorder %v1089_v22, 0 }
 0x149   : > { %7526 = vst [vmem:[#allocation57_spill] sm:$0xff] %v6027_v23  ;;  %v850_v41 = vsel %vm7331_vm0, %v847_v9, %v849_v10  ;;  %1765 = vmatmul.bf16.gmra.mxu2 %v6027_v23  ;;  %vm5263_vm2 = vcmp.ne.s32.totalorder %v984_v35, 15  ;;  %vm6045_vm8 = vmpackc.low %vm7529_vm3, %vm5255_vm12  ;;  %vm7539_vm12 = vsmask.f32 7424 }
 0x14a   : > { %v2080_v28 = vrot.slane %v850_v41, 2  ;;  %v563_v39 = vpop.f32.mrf.mxu0 }
 0x14b   : > { %v564_v56 = vadd.f32 %v563_v39, %v5649_v12  ;;  %v6035_v27 = vpop.f32.mrf.mxu1  ;;  %v7530_v39 = vmov 0 }
 0x14c   : > { %7527 = vst [vmem:[#allocation58_spill] sm:$0xff] %v6035_v27  ;;  %v1726_v4 = vpop.f32.mrf.mxu2  ;;  %v2081_v11 = vsel %vm7524_vm10, %v2078_v58, %v2080_v28  ;;  %v7531_v39 = vsel %vm6045_vm8, 4294967295, %v7530_v39  ;;  %vm6052_vm10 = vmpackc.low %vm5263_vm2, %vm7529_vm3  ;;  %vm7538_vm2 = vcmask 1045504  }
 0x14d   : > { %v723_v54 = vmax.f32 %v564_v56, 0.0  ;;  %v6039_v9 = vadd.f32 %v5967_v47, %v1726_v4  ;;  %v6041_v38 = vpack.c.bf16 %v2081_v11, %v2079_v37  ;;  %7532 = vst [vmem:[#allocation60_spill] sm:$0xff] %v7531_v39  ;;  %v7534_v4 = vmov 0 }
 0x14e   : > { %v7535_v4 = vsel %vm6052_vm10, 4294967295, %v7534_v4 }
 0x14f   : > { %7528 = vst [vmem:[#allocation59_spill] sm:$0xff] %v6041_v38  ;;  %v851_v61 = vrot.slane %v723_v54, 7  ;;  %v1870_v26 = vpop.f32.mrf.mxu3 }
 0x150   : > { %7536 = vst [vmem:[#allocation62_spill] sm:$0xff] %v7535_v4 }
 0x151   : > { %v852_v19 = vsel %vm7331_vm0, %v849_v10, %v851_v61  ;;  %v1597_v10 = vshrl.u32 %v5999_v21, 16 }
 0x152   : > { %v6049_v59 = vpack.c.bf16 %v852_v19, %v850_v41  ;;  %v2082_v58 = vrot.slane %v852_v19, 2  ;;  %v566_v45 = vpop.f32.mrf.mxu0 }
 0x153   : > { %v567_v54 = vadd.f32 %v566_v45, %v5649_v12  ;;  %v6057_v22 = vpop.f32.mrf.mxu1  ;;  %v1599_v35 = vor.u32 %v1597_v10, %v1595_v42  ;;  %v935_v45 = vadd.s32 176, %v5652_v15 }
 0x154   : > { %7533 = vst [vmem:[#allocation61_spill] sm:$0xff] %v6049_v59  ;;  %v1728_v47 = vpop.f32.mrf.mxu2  ;;  %4418 = vmatmul.msk.bf16.gmra.mxu3 %vm6045_vm8, %v6049_v59  ;;  %v1601_v41 = vshll.u32 %v6049_v59, 16  ;;  %v2083_v56 = vsel %vm7538_vm2, %v2080_v28, %v2082_v58 }
 0x155   : > { %7537 = vst [vmem:[#allocation63_spill] sm:$0xff] %v6057_v22  ;;  %v725_v19 = vmax.f32 %v567_v54, 0.0  ;;  %v6064_v37 = vadd.f32 %v1865_v24, %v1728_v47  ;;  %4498 = vmatmul.msk.bf16.gmra.mxu0 %vm6052_vm10, %v5740_v25  ;;  %v920_v54 = vadd.s32 56, %v5652_v15  ;;  %v1103_v40 = vand.u32 15, %v935_v45 }
 0x156   : > { %4610 = vmatmul.msk.bf16.gmra.mxu1 %vm5708_vm7, %v5749_v34  ;;  %v1603_v11 = vrot.slane %v1601_v41, 1  ;;  %vm7543_vm7 = vcmask 1040384  }
 0x157   : > { %v853_v22 = vrot.slane %v725_v19, 7  ;;  %v1873_v27 = vpop.f32.mrf.mxu3  ;;  %v998_v10 = vand.u32 15, %v920_v54 }
 0x158   : > { %v6076_v24 = vsel %vm7539_vm12, %v1599_v35, %v1603_v11  ;;  %vm5256_vm12 = vcmp.ne.s32.totalorder %v1103_v40, 0 }
 0x159   : > { %7540 = vst [vmem:[#allocation64_spill] sm:$0xff] %v6076_v24  ;;  %v854_v47 = vsel %vm7331_vm0, %v851_v61, %v853_v22  ;;  %1770 = vmatmul.bf16.gmra.mxu2 %v6076_v24  ;;  %vm5264_vm0 = vcmp.ne.s32.totalorder %v998_v10, 15  ;;  %vm6090_vm8 = vmpackc.low %vm7529_vm3, %vm5256_vm12  ;;  %vm7555_vm12 = vcmask 1040384  }
 0x15a   : > { %v2084_v28 = vrot.slane %v854_v47, 2  ;;  %v568_v20 = vpop.f32.mrf.mxu0 }
 0x15b   : > { %v569_v60 = vadd.f32 %v568_v20, %v5649_v12  ;;  %v6081_v42 = vpop.f32.mrf.mxu1  ;;  %v7544_v20 = vmov 0 }
 0x15c   : > { %7541 = vst [vmem:[#allocation65_spill] sm:$0xff] %v6081_v42  ;;  %v1731_v41 = vpop.f32.mrf.mxu2  ;;  %v2085_v19 = vsel %vm7538_vm2, %v2082_v58, %v2084_v28  ;;  %v7545_v20 = vsel %vm6090_vm8, 4294967295, %v7544_v20  ;;  %vm6097_vm2 = vmpackc.low %vm5264_vm0, %vm7529_vm3  ;;  %vm7552_vm0 = vcmask 1045504  }
 0x15d   : > { %v727_v31 = vmax.f32 %v569_v60, 0.0  ;;  %v6084_v34 = vadd.f32 %v1868_v36, %v1731_v41  ;;  %v6086_v35 = vpack.c.bf16 %v2085_v19, %v2083_v56  ;;  %7546 = vst [vmem:[#allocation67_spill] sm:$0xff] %v7545_v20  ;;  %v7548_v60 = vmov 0 }
 0x15e   : > { %v7549_v60 = vsel %vm6097_vm2, 4294967295, %v7548_v60  ;;  %v1605_v56 = vshrl.u32 %v6049_v59, 16 }
 0x15f   : > { %7542 = vst [vmem:[#allocation66_spill] sm:$0xff] %v6086_v35  ;;  %v855_v61 = vrot.slane %v727_v31, 7  ;;  %v1875_v23 = vpop.f32.mrf.mxu3  ;;  %v5211_v31 = vld [vmem:[%s7311_s3 + $0x170] sm:$0xff] }
 0x160   : > { %7550 = vst [vmem:[#allocation69_spill] sm:$0xff] %v7549_v60  ;;  %2930 = vmatpush.bf16.msrb.mxu3 %v5211_v31  ;;  %v1607_v19 = vor.u32 %v1605_v56, %v1603_v11  ;;  %v5198_v11 = vld [vmem:[%s7311_s3 + $0x108] sm:$0xff] }
 0x161   : > { %v856_v24 = vsel %vm7543_vm7, %v853_v22, %v855_v61  ;;  %vm7553_vm7 = vsmask.f32 7424  ;;  %2694 = vmatpush.bf16.msrb.mxu2 %v5198_v11 }
 0x162   : > { %v6094_v45 = vpack.c.bf16 %v856_v24, %v854_v47  ;;  %v2086_v54 = vrot.slane %v856_v24, 2  ;;  %v571_v58 = vpop.f32.mrf.mxu0 }
 0x163   : > { %v572_v40 = vadd.f32 %v571_v58, %v5649_v12  ;;  %v6105_v36 = vpop.f32.mrf.mxu1 }
 0x164   : > { %7547 = vst [vmem:[#allocation68_spill] sm:$0xff] %v6094_v45  ;;  %v1733_v22 = vpop.f32.mrf.mxu2  ;;  %4422 = vmatmul.msk.bf16.gmra.mxu3 %vm6090_vm8, %v6094_v45  ;;  %v1609_v24 = vshll.u32 %v6094_v45, 16  ;;  %v2087_v41 = vsel %vm7552_vm0, %v2084_v28, %v2086_v54 }
 0x165   : > { %7551 = vst [vmem:[#allocation70_spill] sm:$0xff] %v6105_v36  ;;  %v729_v47 = vmax.f32 %v572_v40, 0.0  ;;  %v6112_v10 = vadd.f32 %v1870_v26, %v1733_v22  ;;  %4502 = vmatmul.msk.bf16.gmra.mxu0 %vm6097_vm2, %v5773_v0  ;;  %v937_v36 = vadd.s32 192, %v5652_v15  ;;  %v922_v26 = vadd.s32 72, %v5652_v15 }
 0x166   : > { %4614 = vmatmul.msk.bf16.gmra.mxu1 %vm5744_vm9, %v5782_v6  ;;  %v1611_v58 = vrot.slane %v1609_v24, 1  ;;  %vm7557_vm9 = vcmask 1040384  }
 0x167   : > { %v857_v42 = vrot.slane %v729_v47, 7  ;;  %v1878_v44 = vpop.f32.mrf.mxu3  ;;  %v1117_v62 = vand.u32 15, %v937_v36  ;;  %v1012_v47 = vand.u32 15, %v922_v26 }
 0x168   : > { %v6124_v40 = vsel %vm7553_vm7, %v1607_v19, %v1611_v58 }
 0x169   : > { %7554 = vst [vmem:[#allocation71_spill] sm:$0xff] %v6124_v40  ;;  %v858_v22 = vsel %vm7555_vm12, %v855_v61, %v857_v42  ;;  %1775 = vmatmul.bf16.gmra.mxu2 %v6124_v40  ;;  %vm5257_vm7 = vcmp.ne.s32.totalorder %v1117_v62, 0  ;;  %vm5265_vm12 = vcmp.ne.s32.totalorder %v1012_v47, 15 }
 0x16a   : > { %v2088_v28 = vrot.slane %v858_v22, 2  ;;  %v573_v31 = vpop.f32.mrf.mxu0  ;;  %vm6141_vm8 = vmpackc.low %vm7529_vm3, %vm5257_vm7  ;;  %vm7567_vm7 = vsmask.f32 7424 }
 0x16b   : > { %v574_v56 = vadd.f32 %v573_v31, %v5649_v12  ;;  %v6132_v24 = vpop.f32.mrf.mxu1  ;;  %v7558_v31 = vmov 0 }
 0x16c   : > { %7556 = vst [vmem:[#allocation72_spill] sm:$0xff] %v6132_v24  ;;  %v1736_v30 = vpop.f32.mrf.mxu2  ;;  %v2089_v19 = vsel %vm7552_vm0, %v2086_v54, %v2088_v28  ;;  %v7559_v31 = vsel %vm6141_vm8, 4294967295, %v7558_v31  ;;  %vm6148_vm0 = vmpackc.low %vm5265_vm12, %vm7529_vm3  ;;  %vm7569_vm12 = vcmask 1040384  }
 0x16d   : > { %v731_v6 = vmax.f32 %v574_v56, 0.0  ;;  %v6135_v61 = vadd.f32 %v1873_v27, %v1736_v30  ;;  %v6137_v40 = vpack.c.bf16 %v2089_v19, %v2087_v41  ;;  %7560 = vst [vmem:[#allocation73_spill] sm:$0xff] %v7559_v31  ;;  %v7562_v30 = vmov 0 }
 0x16e   : > { %v7563_v30 = vsel %vm6148_vm0, 4294967295, %v7562_v30 }
 0x16f   : > { %v859_v36 = vrot.slane %v731_v6, 7  ;;  %v1880_v8 = vpop.f32.mrf.mxu3  ;;  %7564 = vst [vmem:[#allocation75_spill] sm:$0xff] %v7563_v30 }
 0x171   : > { %v860_v16 = vsel %vm7557_vm9, %v857_v42, %v859_v36  ;;  %v1613_v42 = vshrl.u32 %v6094_v45, 16  ;;  %vm7566_vm9 = vcmask 1045504  }
 0x172   : > { %v6145_v26 = vpack.c.bf16 %v860_v16, %v858_v22  ;;  %v2090_v11 = vrot.slane %v860_v16, 2  ;;  %v576_v54 = vpop.f32.mrf.mxu0 }
 0x173   : > { %v577_v62 = vadd.f32 %v576_v54, %v5649_v12  ;;  %v6153_v6 = vpop.f32.mrf.mxu1  ;;  %v1615_v47 = vor.u32 %v1613_v42, %v1611_v58  ;;  %v939_v54 = vadd.s32 208, %v5652_v15 }
 0x174   : > { %7561 = vst [vmem:[#allocation74_spill] sm:$0xff] %v6145_v26  ;;  %v1738_v27 = vpop.f32.mrf.mxu2  ;;  %4426 = vmatmul.msk.bf16.gmra.mxu3 %vm6141_vm8, %v6145_v26  ;;  %v1617_v41 = vshll.u32 %v6145_v26, 16  ;;  %v2091_v56 = vsel %vm7566_vm9, %v2088_v28, %v2090_v11 }
 0x175   : > { %7565 = vst [vmem:[#allocation76_spill] sm:$0xff] %v6153_v6  ;;  %v733_v16 = vmax.f32 %v577_v62, 0.0  ;;  %v6160_v22 = vadd.f32 %v1875_v23, %v1738_v27  ;;  %4506 = vmatmul.msk.bf16.gmra.mxu0 %vm6148_vm0, %v5809_v46  ;;  %v924_v23 = vadd.s32 88, %v5652_v15  ;;  %v1131_v3 = vand.u32 15, %v939_v54 }
 0x176   : > { %4618 = vmatmul.msk.bf16.gmra.mxu1 %vm5777_vm11, %v5824_v55  ;;  %v1619_v19 = vrot.slane %v1617_v41, 1  ;;  %v5210_v55 = vld [vmem:[%s7311_s3 + $0x168] sm:$0xff]  ;;  %vm7572_vm11 = vcmask 1040384  }
 0x177   : > { %v861_v6 = vrot.slane %v733_v16, 7  ;;  %v6170_v24 = vpop.f32.mrf.mxu3  ;;  %v1026_v41 = vand.u32 15, %v924_v23  ;;  %2931 = vmatpush.bf16.msrb.mxu3 %v5210_v55  ;;  %v7577_v55 = vmov 0 }
 0x178   : > { %v6174_v62 = vsel %vm7567_vm7, %v1615_v47, %v1619_v19  ;;  %vm5258_vm7 = vcmp.ne.s32.totalorder %v1131_v3, 0 }
 0x179   : > { %7568 = vst [vmem:[#allocation77_spill] sm:$0xff] %v6174_v62  ;;  %v862_v27 = vsel %vm7569_vm12, %v859_v36, %v861_v6  ;;  %1780 = vmatmul.bf16.gmra.mxu2 %v6174_v62  ;;  %vm5266_vm12 = vcmp.ne.s32.totalorder %v1026_v41, 15  ;;  %vm6196_vm8 = vmpackc.low %vm7529_vm3, %vm5258_vm7  ;;  %vm7582_vm7 = vsmask.f32 7424 }
 0x17a   : > { %v2092_v28 = vrot.slane %v862_v27, 2  ;;  %v578_v32 = vpop.f32.mrf.mxu0 }
 0x17b   : > { %v579_v58 = vadd.f32 %v578_v32, %v5649_v12  ;;  %v6179_v42 = vpop.f32.mrf.mxu1  ;;  %v5209_v32 = vld [vmem:[%s7311_s3 + $0x160] sm:$0xff] }
 0x17c   : > { %7570 = vst [vmem:[#allocation78_spill] sm:$0xff] %v6179_v42  ;;  %v1741_v16 = vpop.f32.mrf.mxu2  ;;  %v2093_v47 = vsel %vm7566_vm9, %v2090_v11, %v2092_v28  ;;  %v7573_v11 = vmov 0  ;;  %vm6203_vm9 = vmpackc.low %vm5266_vm12, %vm7529_vm3  ;;  %2932 = vmatpush.bf16.msrb.mxu3 %v5209_v32  ;;  %v941_v42 = vadd.s32 224, %v5652_v15  ;;  %vm7584_vm12 = vcmask 1040384  }
 0x17d   : > { %v735_v18 = vmax.f32 %v579_v58, 0.0  ;;  %v6185_v31 = vadd.f32 %v1878_v44, %v1741_v16  ;;  %v6187_v36 = vpack.c.bf16 %v2093_v47, %v2091_v56  ;;  %v7574_v11 = vsel %vm6196_vm8, 4294967295, %v7573_v11  ;;  %v5208_v16 = vld [vmem:[%s7311_s3 + $0x158] sm:$0xff] }
 0x17e   : > { %7575 = vst [vmem:[#allocation80_spill] sm:$0xff] %v7574_v11  ;;  %v7578_v55 = vsel %vm6203_vm9, 4294967295, %v7577_v55 }
 0x17f   : > { %7571 = vst [vmem:[#allocation79_spill] sm:$0xff] %v6187_v36  ;;  %v863_v54 = vrot.slane %v735_v18, 7  ;;  %v6189_v62 = vpop.f32.mrf.mxu3 }
 0x180   : > { %7579 = vst [vmem:[#allocation82_spill] sm:$0xff] %v7578_v55  ;;  %2933 = vmatpush.bf16.msrb.mxu3 %v5208_v16  ;;  %v5197_v16 = vld [vmem:[%s7311_s3 + $0x100] sm:$0xff] }
 0x181   : > { %v864_v23 = vsel %vm7572_vm11, %v861_v6, %v863_v54  ;;  %vm7581_vm11 = vcmask 1045504   ;;  %2695 = vmatpush.bf16.msrb.mxu2 %v5197_v16 }
 0x182   : > { %v6200_v44 = vpack.c.bf16 %v864_v23, %v862_v27  ;;  %v2094_v56 = vrot.slane %v864_v23, 2  ;;  %v581_v3 = vpop.f32.mrf.mxu0  ;;  %v1621_v27 = vshrl.u32 %v6145_v26, 16 }
 0x183   : > { %v582_v18 = vadd.f32 %v581_v3, %v5649_v12  ;;  %v6208_v58 = vpop.f32.mrf.mxu1 }
 0x184   : > { %7576 = vst [vmem:[#allocation81_spill] sm:$0xff] %v6200_v44  ;;  %v1743_v6 = vpop.f32.mrf.mxu2  ;;  %4430 = vmatmul.msk.bf16.gmra.mxu3 %vm6196_vm8, %v6200_v44  ;;  %v1625_v41 = vshll.u32 %v6200_v44, 16  ;;  %v2095_v32 = vsel %vm7581_vm11, %v2092_v28, %v2094_v56  ;;  %v1623_v3 = vor.u32 %v1621_v27, %v1619_v19  ;;  %v5207_v28 = vld [vmem:[%s7311_s3 + $0x150] sm:$0xff] }
 0x185   : > { %7580 = vst [vmem:[#allocation83_spill] sm:$0xff] %v6208_v58  ;;  %v737_v47 = vmax.f32 %v582_v18, 0.0  ;;  %v6218_v23 = vadd.f32 %v1880_v8, %v1743_v6  ;;  %4510 = vmatmul.msk.bf16.gmra.mxu0 %vm6203_vm9, %v5866_v49  ;;  %v926_v8 = vadd.s32 104, %v5652_v15  ;;  %2934 = vmatpush.bf16.msrb.mxu3 %v5207_v28 }
 0x186   : > { %4622 = vmatmul.msk.bf16.gmra.mxu1 %vm5812_vm13, %v5881_v1  ;;  %v1627_v58 = vrot.slane %v1625_v41, 1  ;;  %v1145_v41 = vand.u32 15, %v941_v42  ;;  %vm7587_vm13 = vcmask 1040384  }
 0x187   : > { %v865_v11 = vrot.slane %v737_v47, 7  ;;  %v6228_v36 = vpop.f32.mrf.mxu3  ;;  %v1040_v48 = vand.u32 15, %v926_v8  ;;  %v5205_v8 = vld [vmem:[%s7311_s3 + $0x140] sm:$0xff] }
 0x188   : > { %v6232_v18 = vsel %vm7582_vm7, %v1623_v3, %v1627_v58  ;;  %vm5259_vm7 = vcmp.ne.s32.totalorder %v1145_v41, 0 }
 0x189   : > { %7583 = vst [vmem:[#allocation84_spill] sm:$0xff] %v6232_v18  ;;  %v866_v6 = vsel %vm7584_vm12, %v863_v54, %v865_v11  ;;  %1785 = vmatmul.bf16.gmra.mxu2 %v6232_v18  ;;  %v5206_v54 = vld [vmem:[%s7311_s3 + $0x148] sm:$0xff]  ;;  %vm5267_vm12 = vcmp.ne.s32.totalorder %v1040_v48, 15  ;;  %vm6259_vm8 = vmpackc.low %vm7529_vm3, %vm5259_vm7  ;;  %vm7597_vm7 = vsmask.f32 7424 }
 0x18a   : > { %v2096_v19 = vrot.slane %v866_v6, 2  ;;  %v583_v27 = vpop.f32.mrf.mxu0  ;;  %2935 = vmatpush.bf16.msrb.mxu3 %v5206_v54 }
 0x18b   : > { %v584_v47 = vadd.f32 %v583_v27, %v5649_v12  ;;  %v6243_v3 = vpop.f32.mrf.mxu1 }
 0x18c   : > { %7585 = vst [vmem:[#allocation85_spill] sm:$0xff] %v6243_v3  ;;  %v1746_v1 = vpop.f32.mrf.mxu2  ;;  %v2097_v18 = vsel %vm7581_vm11, %v2094_v56, %v2096_v19  ;;  %v7588_v56 = vmov 0  ;;  %vm6266_vm11 = vmpackc.low %vm5267_vm12, %vm7529_vm3  ;;  %vm7599_vm12 = vcmask 1040384  }
 0x18d   : > { %v739_v55 = vmax.f32 %v584_v47, 0.0  ;;  %v6250_v42 = vadd.f32 %v6170_v24, %v1746_v1  ;;  %v6252_v30 = vpack.c.bf16 %v2097_v18, %v2095_v32  ;;  %v7589_v56 = vsel %vm6259_vm8, 4294967295, %v7588_v56 }
 0x18e   : > { %7590 = vst [vmem:[#allocation87_spill] sm:$0xff] %v7589_v56  ;;  %2936 = vmatpush.bf16.msrb.mxu3 %v5205_v8 }
 0x18f   : > { %7586 = vst [vmem:[#allocation86_spill] sm:$0xff] %v6252_v30  ;;  %v867_v28 = vrot.slane %v739_v55, 7  ;;  %v1890_v27 = vpop.f32.mrf.mxu3  ;;  %v7592_v55 = vmov 0 }
 0x190   : > { %v7593_v55 = vsel %vm6266_vm11, 4294967295, %v7592_v55 }
 0x191   : > { %v868_v16 = vsel %vm7587_vm13, %v865_v11, %v867_v28  ;;  %7594 = vst [vmem:[#allocation89_spill] sm:$0xff] %v7593_v55  ;;  %vm7596_vm13 = vcmask 1045504  }
 0x192   : > { %v6263_v1 = vpack.c.bf16 %v868_v16, %v866_v6  ;;  %v2098_v24 = vrot.slane %v868_v16, 2  ;;  %v586_v32 = vpop.f32.mrf.mxu0  ;;  %v1629_v6 = vshrl.u32 %v6200_v44, 16 }
 0x193   : > { %v587_v48 = vadd.f32 %v586_v32, %v5649_v12  ;;  %v6271_v18 = vpop.f32.mrf.mxu1 }
 0x194   : > { %7591 = vst [vmem:[#allocation88_spill] sm:$0xff] %v6263_v1  ;;  %v1748_v11 = vpop.f32.mrf.mxu2  ;;  %4434 = vmatmul.msk.bf16.gmra.mxu3 %vm6259_vm8, %v6263_v1  ;;  %v1633_v41 = vshll.u32 %v6263_v1, 16  ;;  %v2099_v8 = vsel %vm7596_vm13, %v2096_v19, %v2098_v24  ;;  %v1631_v16 = vor.u32 %v1629_v6, %v1627_v58 }
 0x195   : > { %7595 = vst [vmem:[#allocation90_spill] sm:$0xff] %v6271_v18  ;;  %v741_v47 = vmax.f32 %v587_v48, 0.0  ;;  %v6279_v54 = vadd.f32 %v6189_v62, %v1748_v11  ;;  %4514 = vmatmul.msk.bf16.gmra.mxu0 %vm6266_vm11, %v5902_v53  ;;  %v943_v18 = vadd.s32 240, %v5652_v15  ;;  %v928_v48 = vadd.s32 120, %v5652_v15 }
 0x196   : > { %4626 = vmatmul.msk.bf16.gmra.mxu1 %vm5869_vm15, %v5911_v5  ;;  %v1635_v32 = vrot.slane %v1633_v41, 1  ;;  %vm7602_vm15 = vcmask 1040384   ;;  %v7654_v13 = vld [vmem:[#allocation86_spill] sm:$0xff] }
 0x197   : > { %v869_v3 = vrot.slane %v741_v47, 7  ;;  %v1893_v56 = vpop.f32.mrf.mxu3  ;;  %v1159_v30 = vand.u32 15, %v943_v18  ;;  %v1054_v6 = vand.u32 15, %v928_v48 }
 0x198   : > { %v6291_v62 = vsel %vm7597_vm7, %v1631_v16, %v1635_v32 }
 0x199   : > { %7598 = vst [vmem:[#allocation91_spill] sm:$0xff] %v6291_v62  ;;  %v870_v11 = vsel %vm7599_vm12, %v867_v28, %v869_v3  ;;  %1790 = vmatmul.bf16.gmra.mxu2 %v6291_v62  ;;  %vm5260_vm7 = vcmp.ne.s32.totalorder %v1159_v30, 0  ;;  %vm5268_vm12 = vcmp.ne.s32.totalorder %v1054_v6, 15 }
 0x19a   : > { %v2100_v19 = vrot.slane %v870_v11, 2  ;;  %v588_v55 = vpop.f32.mrf.mxu0  ;;  %vm6308_vm8 = vmpackc.low %vm7529_vm3, %vm5260_vm7  ;;  %vm7612_vm7 = vsmask.f32 7424 }
 0x19b   : > { %v589_v52 = vadd.f32 %v588_v55, %v5649_v12  ;;  %v6296_v58 = vpop.f32.mrf.mxu1  ;;  %v7603_v55 = vmov 0 }
 0x19c   : > { %7600 = vst [vmem:[#allocation92_spill] sm:$0xff] %v6296_v58  ;;  %v1751_v41 = vpop.f32.mrf.mxu2  ;;  %v2101_v47 = vsel %vm7596_vm13, %v2098_v24, %v2100_v19  ;;  %v7604_v55 = vsel %vm6308_vm8, 4294967295, %v7603_v55  ;;  %vm6315_vm13 = vmpackc.low %vm5268_vm12, %vm7529_vm3  ;;  %vm7614_vm12 = vcmask 1040384  }
 0x19d   : > { %v743_v5 = vmax.f32 %v589_v52, 0.0  ;;  %v6300_v53 = vadd.f32 %v6228_v36, %v1751_v41  ;;  %v6302_v16 = vpack.c.bf16 %v2101_v47, %v2099_v8  ;;  %7605 = vst [vmem:[#allocation94_spill] sm:$0xff] %v7604_v55  ;;  %v7607_v36 = vmov 0 }
 0x19e   : > { %v7608_v36 = vsel %vm6315_vm13, 4294967295, %v7607_v36  ;;  %v930_v55 = vadd.s32 136, %v5652_v15 }
 0x19f   : > { %7601 = vst [vmem:[#allocation93_spill] sm:$0xff] %v6302_v16  ;;  %v871_v28 = vrot.slane %v743_v5, 7  ;;  %v6304_v62 = vpop.f32.mrf.mxu3  ;;  %v5228_v16 = vld [vmem:[%s7311_s3 + $0x1f8] sm:$0xff] }
 0x1a0   : > { %7609 = vst [vmem:[#allocation96_spill] sm:$0xff] %v7608_v36  ;;  %3360 = vmatpush.bf16.msra.mxu1 %v5228_v16 }
 0x1a1   : > { %v872_v18 = vsel %vm7602_vm15, %v869_v3, %v871_v28  ;;  %v1637_v3 = vshrl.u32 %v6263_v1, 16  ;;  %vm7611_vm15 = vcmask 1045504  }
 0x1a2   : > { %v6312_v48 = vpack.c.bf16 %v872_v18, %v870_v11  ;;  %v2102_v52 = vrot.slane %v872_v18, 2  ;;  %v591_v24 = vpop.f32.mrf.mxu0 }
 0x1a3   : > { %v592_v5 = vadd.f32 %v591_v24, %v5649_v12  ;;  %v6320_v30 = vpop.f32.mrf.mxu1  ;;  %v1639_v18 = vor.u32 %v1637_v3, %v1635_v32 }
 0x1a4   : > { %7606 = vst [vmem:[#allocation95_spill] sm:$0xff] %v6312_v48  ;;  %v1753_v8 = vpop.f32.mrf.mxu2  ;;  %4438 = vmatmul.msk.bf16.gmra.mxu3 %vm6308_vm8, %v6312_v48  ;;  %v1641_v11 = vshll.u32 %v6312_v48, 16  ;;  %v2103_v47 = vsel %vm7611_vm15, %v2100_v19, %v2102_v52  ;;  %v5236_v19 = vld [vmem:[%s7311_s3 + $0x238] sm:$0xff] }
 0x1a5   : > { %7610 = vst [vmem:[#allocation97_spill] sm:$0xff] %v6320_v30  ;;  %v745_v6 = vmax.f32 %v592_v5, 0.0  ;;  %v6327_v41 = vadd.f32 %v1890_v27, %v1753_v8  ;;  %4518 = vmatmul.msk.bf16.gmra.mxu0 %vm6315_vm13, %v5939_v2  ;;  %3596 = vmatpush.bf16.msra.mxu2 %v5236_v19 }
 0x1a6   : > { %4630 = vmatmul.msk.bf16.gmra.mxu1 %vm5906_vm6, %v5951_v7  ;;  %v1643_v24 = vrot.slane %v1641_v11, 1  ;;  %v1068_v11 = vand.u32 15, %v930_v55 }
 0x1a7   : > { %v873_v30 = vrot.slane %v745_v6, 7  ;;  %v6336_v58 = vpop.f32.mrf.mxu3 }
 0x1a8   : > { %v6340_v27 = vsel %vm7612_vm7, %v1639_v18, %v1643_v24  ;;  %vm5269_vm7 = vcmp.ne.s32.totalorder %v1068_v11, 15 }
 0x1a9   : > { %7613 = vst [vmem:[#allocation98_spill] sm:$0xff] %v6340_v27  ;;  %v874_v5 = vsel %vm7614_vm12, %v871_v28, %v873_v30  ;;  %1795 = vmatmul.bf16.gmra.mxu2 %v6340_v27  ;;  %v5220_v27 = vld [vmem:[%s7311_s3 + $0x1b8] sm:$0xff]  ;;  %vm6370_vm6 = vmpackc.low %vm5269_vm7, %vm7529_vm3 }
 0x1aa   : > { %v2104_v8 = vrot.slane %v874_v5, 2  ;;  %v593_v51 = vpop.f32.mrf.mxu0  ;;  %v1502_v7 = vpack.c.bf16 %v874_v5, %v874_v5  ;;  %3162 = vmatpush.bf16.msra.mxu0 %v5220_v27  ;;  %v1645_v27 = vshrl.u32 %v6312_v48, 16 }
 0x1ab   : > { %v594_v32 = vadd.f32 %v593_v51, %v5649_v12  ;;  %v6348_v3 = vpop.f32.mrf.mxu1 }
 0x1ac   : > { %7615 = vst [vmem:[#allocation99_spill] sm:$0xff] %v6348_v3  ;;  %v1756_v6 = vpop.f32.mrf.mxu2  ;;  %v2105_v18 = vsel %vm7611_vm15, %v2102_v52, %v2104_v8  ;;  %v1649_v19 = vshll.u32 %v1502_v7, 16  ;;  %vm7617_vm15 = vmmov %vm7614_vm12 }
 0x1ad   : > { %v747_v36 = vmax.f32 %v594_v32, 0.0  ;;  %v6351_v28 = vadd.f32 %v1893_v56, %v1756_v6  ;;  %v6359_v12 = vpack.c.bf16 %v2105_v18, %v2103_v47 }
 0x1ae   : > { %v1651_v11 = vrot.slane %v1649_v19, 1 }
 0x1af   : > { %7616 = vst [vmem:[#allocation100_spill] sm:$0xff] %v6359_v12  ;;  %v875_v51 = vrot.slane %v747_v36, 7  ;;  %v1900_v55 = vpop.f32.mrf.mxu3  ;;  %v7620_v36 = vmov 0 }
 0x1b0   : > { %v7621_v36 = vsel %vm6370_vm6, 4294967295, %v7620_v36 }
 0x1b1   : > { %v876_v52 = vsel %vm7614_vm12, %v873_v30, %v875_v51  ;;  %v6363_v56 = vsel %vm7617_vm15, %v875_v51, 0.0  ;;  %7622 = vst [vmem:[#allocation103_spill] sm:$0xff] %v7621_v36  ;;  %vm7624_vm12 = vcmask 1045504   ;;  %vm7628_vm15 = vsmask.f32 7424 }
 0x1b2   : > { %7618 = vst [vmem:[#allocation101_spill] sm:$0xff] %v6363_v56  ;;  %v2810_v32 = vrot.slane %v876_v52, 2  ;;  %v7404_v6 = vrot.slane %v6363_v56, 2  ;;  %v6367_v3 = vpack.c.bf16 0.0, %v6363_v56  ;;  %v2260_v2 = vpop.f32.mrf.mxu0  ;;  %v6375_v47 = vpack.c.bf16 %v876_v52, %v874_v5  ;;  %vm7625_vm7 = vmmov %vm7624_vm12 }
 0x1b3   : > { %v2340_v16 = vadd.f32 %v2260_v2, %v6039_v9  ;;  %v2494_v7 = vpop.f32.mrf.mxu1 }
 0x1b4   : > { %7619 = vst [vmem:[#allocation102_spill] sm:$0xff] %v6367_v3  ;;  %v1758_v30 = vpop.f32.mrf.mxu2  ;;  %4762 = vmatmul.msk.bf16.vlgmr.msrb.gmra.mxu3 %vm5954_vm1, %v5704_v57  ;;  %v2811_v18 = vsel %vm7624_vm12, %v2104_v8, %v2810_v32  ;;  %v2813_v51 = vsel %vm7625_vm7, %v2810_v32, %v7404_v6  ;;  %v6398_v57 = vor.u32 %v1645_v27, %v1643_v24  ;;  %v2626_v5 = vshll.u32 %v6375_v47, 16  ;;  %vm7632_vm12 = vmmov %vm7628_vm15 }
 0x1b5   : > { %7623 = vst [vmem:[#allocation104_spill] sm:$0xff] %v6375_v47  ;;  %v6385_v12 = vadd.f32 %v2494_v7, %v2340_v16  ;;  %v6388_v2 = vadd.f32 %v6304_v62, %v1758_v30  ;;  %4522 = vmatmul.msk.bf16.gmra.mxu0 %vm6370_vm6, %v5991_v43  ;;  %v6393_v9 = vpack.c.bf16 %v2813_v51, %v2811_v18  ;;  %v3302_v8 = vshll.u32 %v6367_v3, 16 }
 0x1b6   : > { %4634 = vmatmul.msk.bf16.gmra.mxu1 %vm5947_vm14, %v5999_v21  ;;  %7627 = vst [vmem:[#allocation106_spill] sm:$0xff] %v6398_v57  ;;  %v932_v62 = vadd.s32 152, %v5652_v15  ;;  %v1652_v52 = vsel %vm7628_vm15, %v6398_v57, %v1651_v11  ;;  %v6405_v32 = vrot.slane %v2626_v5, 1  ;;  %v2630_v16 = vshrl.u32 %v6375_v47, 16 }
 0x1b7   : > { %7626 = vst [vmem:[#allocation105_spill] sm:$0xff] %v6393_v9  ;;  %v1903_v19 = vpop.f32.mrf.mxu3  ;;  %v6411_v24 = vrot.slane %v3302_v8, 1  ;;  %v7634_v8 = vmov 0 }
 0x1b8   : > { %7629 = vst [vmem:[#allocation107_spill] sm:$0xff] %v6405_v32  ;;  %v6409_v30 = vor.u32 %v2630_v16, %v6405_v32  ;;  %v1082_v51 = vand.u32 15, %v932_v62 }
 0x1b9   : > { %1800 = vmatmul.bf16.gmra.mxu2 %v1652_v52  ;;  %7631 = vst [vmem:[#allocation109_spill] sm:$0xff] %v6411_v24 }
 0x1ba   : > { %v2262_v7 = vpop.f32.mrf.mxu0  ;;  %7630 = vst [vmem:[#allocation108_spill] sm:$0xff] %v6409_v30  ;;  %v6417_v11 = vsel %vm7632_vm12, %v6409_v30, %v6411_v24  ;;  %vm5270_vm7 = vcmp.ne.s32.totalorder %v1082_v51, 15 }
 0x1bb   : > { %v2341_v27 = vadd.f32 %v2262_v7, %v6064_v37  ;;  %v2496_v18 = vpop.f32.mrf.mxu1  ;;  %7633 = vst [vmem:[#allocation110_spill] sm:$0xff] %v6417_v11  ;;  %vm6425_vm15 = vmpackc.low %vm5270_vm7, %vm7529_vm3  ;;  %v5219_v11 = vld [vmem:[%s7311_s3 + $0x1b0] sm:$0xff] }
 0x1bc   : > { %v1761_v6 = vpop.f32.mrf.mxu2  ;;  %v7635_v8 = vsel %vm6425_vm15, 4294967295, %v7634_v8  ;;  %3163 = vmatpush.bf16.msra.mxu0 %v5219_v11 }
 0x1bd   : > { %v6419_v5 = vadd.f32 %v2496_v18, %v2341_v27  ;;  %v6422_v52 = vadd.f32 %v6336_v58, %v1761_v6  ;;  %7636 = vst [vmem:[#allocation111_spill] sm:$0xff] %v7635_v8  ;;  %v5235_v18 = vld [vmem:[%s7311_s3 + $0x230] sm:$0xff] }
 0x1be   : > { %3597 = vmatpush.bf16.msra.mxu2 %v5235_v18 }
 0x1bf   : > { %v1905_v3 = vpop.f32.mrf.mxu3 }
 0x1c2   : > { %v2265_v16 = vpop.f32.mrf.mxu0 }
 0x1c3   : > { %v2342_v37 = vadd.f32 %v2265_v16, %v6084_v34  ;;  %v2499_v62 = vpop.f32.mrf.mxu1  ;;  %v934_v34 = vadd.s32 168, %v5652_v15 }
 0x1c4   : > { %v1763_v7 = vpop.f32.mrf.mxu2  ;;  %4766 = vmatmul.msk.bf16.gmra.mxu3 %vm6002_vm4, %v5740_v25 }
 0x1c5   : > { %v6433_v27 = vadd.f32 %v2499_v62, %v2342_v37  ;;  %v6435_v58 = vadd.f32 %v1900_v55, %v1763_v7  ;;  %4526 = vmatmul.msk.bf16.gmra.mxu0 %vm6425_vm15, %v6041_v38  ;;  %v1096_v37 = vand.u32 15, %v934_v34 }
 0x1c6   : > { %4638 = vmatmul.msk.bf16.gmra.mxu1 %vm5995_vm5, %v6049_v59  ;;  %v5222_v59 = vld [vmem:[%s7311_s3 + $0x1c8] sm:$0xff] }
 0x1c7   : > { %v1908_v6 = vpop.f32.mrf.mxu3  ;;  %vm5271_vm12 = vcmp.ne.s32.totalorder %v1096_v37, 15 }
 0x1c8   : > { %vm6460_vm7 = vmpackc.low %vm5271_vm12, %vm7529_vm3  ;;  %vm7639_vm12 = vnez %v7531_v39 }
 0x1c9   : > { %2696 = vmatmul.bf16.vlgmr.msrb.gmra.mxu2 %v5732_v14  ;;  %v5227_v14 = vld [vmem:[%s7311_s3 + $0x1f0] sm:$0xff] }
 0x1ca   : > { %v2267_v51 = vpop.f32.mrf.mxu0  ;;  %3361 = vmatpush.bf16.msra.mxu1 %v5227_v14 }
 0x1cb   : > { %v2343_v55 = vadd.f32 %v2267_v51, %v6112_v10  ;;  %v2501_v16 = vpop.f32.mrf.mxu1 }
 0x1cc   : > { %v1766_v62 = vpop.f32.mrf.mxu2 }
 0x1cd   : > { %v6449_v7 = vadd.f32 %v2501_v16, %v2343_v55  ;;  %v6451_v24 = vadd.f32 %v1903_v19, %v1766_v62 }
 0x1cf   : > { %v1910_v63 = vpop.f32.mrf.mxu3 }
 0x1d2   : > { %v2270_v10 = vpop.f32.mrf.mxu0 }
 0x1d3   : > { %v2344_v19 = vadd.f32 %v2270_v10, %v6135_v61  ;;  %v2504_v18 = vpop.f32.mrf.mxu1  ;;  %v936_v61 = vadd.s32 184, %v5652_v15 }
 0x1d4   : > { %v1768_v51 = vpop.f32.mrf.mxu2  ;;  %4770 = vmatmul.msk.bf16.gmra.mxu3 %vm6052_vm10, %v5773_v0 }
 0x1d5   : > { %v6468_v55 = vadd.f32 %v2504_v18, %v2344_v19  ;;  %v6470_v16 = vadd.f32 %v1905_v3, %v1768_v51  ;;  %4530 = vmatmul.msk.bf16.gmra.mxu0 %vm6460_vm7, %v6086_v35  ;;  %v1110_v10 = vand.u32 15, %v936_v61 }
 0x1d6   : > { %4642 = vmatmul.msk.bf16.gmra.mxu1 %vm7639_vm12, %v6094_v45 }
 0x1d7   : > { %v1913_v11 = vpop.f32.mrf.mxu3  ;;  %vm5272_vm10 = vcmp.ne.s32.totalorder %v1110_v10, 15  ;;  %v5218_v10 = vld [vmem:[%s7311_s3 + $0x1a8] sm:$0xff] }
 0x1d8   : > { %vm6486_vm4 = vmpackc.low %vm5272_vm10, %vm7529_vm3  ;;  %vm7642_vm10 = vnez %v7545_v20  ;;  %3164 = vmatpush.bf16.msra.mxu0 %v5218_v10  ;;  %v7647_v10 = vld [vmem:[#allocation73_spill] sm:$0xff] }
 0x1d9   : > { %2701 = vmatmul.bf16.gmra.mxu2 %v5762_v50 }
 0x1da   : > { %v2272_v37 = vpop.f32.mrf.mxu0 }
 0x1db   : > { %v2345_v62 = vadd.f32 %v2272_v37, %v6160_v22  ;;  %v2506_v14 = vpop.f32.mrf.mxu1 }
 0x1dc   : > { %v1771_v3 = vpop.f32.mrf.mxu2 }
 0x1dd   : > { %v6481_v19 = vadd.f32 %v2506_v14, %v2345_v62  ;;  %v6483_v18 = vadd.f32 %v1908_v6, %v1771_v3  ;;  %v5226_v3 = vld [vmem:[%s7311_s3 + $0x1e8] sm:$0xff] }
 0x1de   : > { %3362 = vmatpush.bf16.msra.mxu1 %v5226_v3 }
 0x1df   : > { %v1915_v51 = vpop.f32.mrf.mxu3 }
 0x1e2   : > { %v2275_v4 = vpop.f32.mrf.mxu0 }
 0x1e3   : > { %v2346_v39 = vadd.f32 %v2275_v4, %v6185_v31  ;;  %v2509_v33 = vpop.f32.mrf.mxu1  ;;  %v938_v4 = vadd.s32 200, %v5652_v15 }
 0x1e4   : > { %v1773_v25 = vpop.f32.mrf.mxu2  ;;  %4774 = vmatmul.msk.bf16.gmra.mxu3 %vm6097_vm2, %v5809_v46 }
 0x1e5   : > { %v6494_v22 = vadd.f32 %v2509_v33, %v2346_v39  ;;  %v6496_v6 = vadd.f32 %v1910_v63, %v1773_v25  ;;  %4534 = vmatmul.msk.bf16.gmra.mxu0 %vm6486_vm4, %v6137_v40  ;;  %v5234_v33 = vld [vmem:[%s7311_s3 + $0x228] sm:$0xff]  ;;  %v1124_v31 = vand.u32 15, %v938_v4 }
 0x1e6   : > { %4646 = vmatmul.msk.bf16.gmra.mxu1 %vm7642_vm10, %v6145_v26  ;;  %3598 = vmatpush.bf16.msra.mxu2 %v5234_v33 }
 0x1e7   : > { %v1918_v61 = vpop.f32.mrf.mxu3  ;;  %vm5273_vm2 = vcmp.ne.s32.totalorder %v1124_v31, 15  ;;  %v7646_v31 = vld [vmem:[#allocation79_spill] sm:$0xff] }
 0x1e8   : > { %vm6521_vm10 = vmpackc.low %vm5273_vm2, %vm7529_vm3  ;;  %vm7648_vm2 = vnez %v7647_v10  ;;  %v5217_v10 = vld [vmem:[%s7311_s3 + $0x1a0] sm:$0xff] }
 0x1e9   : > { %2706 = vmatmul.bf16.gmra.mxu2 %v5801_v29  ;;  %3165 = vmatpush.bf16.msra.mxu0 %v5217_v10 }
 0x1ea   : > { %v2277_v39 = vpop.f32.mrf.mxu0 }
 0x1eb   : > { %v2347_v25 = vadd.f32 %v2277_v39, %v6218_v23  ;;  %v2511_v63 = vpop.f32.mrf.mxu1 }
 0x1ec   : > { %v1776_v37 = vpop.f32.mrf.mxu2 }
 0x1ed   : > { %v6510_v62 = vadd.f32 %v2511_v63, %v2347_v25  ;;  %v6512_v14 = vadd.f32 %v1913_v11, %v1776_v37 }
 0x1ef   : > { %v1920_v60 = vpop.f32.mrf.mxu3 }
 0x1f2   : > { %v2280_v23 = vpop.f32.mrf.mxu0 }
 0x1f3   : > { %v2348_v11 = vadd.f32 %v2280_v23, %v6250_v42  ;;  %v2514_v33 = vpop.f32.mrf.mxu1  ;;  %v940_v42 = vadd.s32 216, %v5652_v15  ;;  %v7649_v23 = vld [vmem:[#allocation30_spill] sm:$0xff] }
 0x1f4   : > { %v1778_v39 = vpop.f32.mrf.mxu2  ;;  %4778 = vmatmul.msk.bf16.gmra.mxu3 %vm6148_vm0, %v5866_v49 }
 0x1f5   : > { %v6529_v63 = vadd.f32 %v2514_v33, %v2348_v11  ;;  %v6531_v37 = vadd.f32 %v1915_v51, %v1778_v39  ;;  %4538 = vmatmul.msk.bf16.gmra.mxu0 %vm6521_vm10, %v7646_v31  ;;  %v1138_v33 = vand.u32 15, %v940_v42  ;;  %v7652_v42 = vld [vmem:[#allocation38_spill] sm:$0xff] }
 0x1f6   : > { %4650 = vmatmul.msk.bf16.gmra.mxu1 %vm7648_vm2, %v6200_v44  ;;  %v5225_v44 = vld [vmem:[%s7311_s3 + $0x1e0] sm:$0xff] }
 0x1f7   : > { %v1923_v3 = vpop.f32.mrf.mxu3  ;;  %vm5274_vm0 = vcmp.ne.s32.totalorder %v1138_v33, 15  ;;  %3363 = vmatpush.bf16.msra.mxu1 %v5225_v44  ;;  %v7655_v44 = vld [vmem:[#allocation80_spill] sm:$0xff] }
 0x1f8   : > { %vm6553_vm2 = vmpackc.low %vm5274_vm0, %vm7529_vm3  ;;  %vm7656_vm0 = vnez %v7655_v44 }
 0x1f9   : > { %2711 = vmatmul.bf16.gmra.mxu2 %v7649_v23 }
 0x1fa   : > { %v2282_v46 = vpop.f32.mrf.mxu0 }
 0x1fb   : > { %v2349_v25 = vadd.f32 %v2282_v46, %v6279_v54  ;;  %v2516_v11 = vpop.f32.mrf.mxu1 }
 0x1fc   : > { %v1781_v51 = vpop.f32.mrf.mxu2 }
 0x1fd   : > { %v6542_v39 = vadd.f32 %v2516_v11, %v2349_v25  ;;  %v6544_v49 = vadd.f32 %v1918_v61, %v1781_v51  ;;  %v5223_v11 = vld [vmem:[%s7311_s3 + $0x1d0] sm:$0xff] }
 0x1ff   : > { %v1925_v20 = vpop.f32.mrf.mxu3 }
 0x202   : > { %v2285_v26 = vpop.f32.mrf.mxu0 }
 0x203   : > { %v2350_v54 = vadd.f32 %v2285_v26, %v6300_v53  ;;  %v2519_v61 = vpop.f32.mrf.mxu1  ;;  %v5216_v53 = vld [vmem:[%s7311_s3 + $0x198] sm:$0xff] }
 0x204   : > { %v1783_v25 = vpop.f32.mrf.mxu2  ;;  %4782 = vmatmul.msk.bf16.gmra.mxu3 %vm6203_vm9, %v7652_v42  ;;  %v5224_v26 = vld [vmem:[%s7311_s3 + $0x1d8] sm:$0xff]  ;;  %3166 = vmatpush.bf16.msra.mxu0 %v5216_v53 }
 0x205   : > { %v6561_v33 = vadd.f32 %v2519_v61, %v2350_v54  ;;  %v6563_v51 = vadd.f32 %v1920_v60, %v1783_v25  ;;  %4542 = vmatmul.msk.bf16.gmra.mxu0 %vm6553_vm2, %v7654_v13  ;;  %v942_v60 = vadd.s32 232, %v5652_v15  ;;  %3364 = vmatpush.bf16.msra.mxu1 %v5224_v26  ;;  %v7657_v54 = vld [vmem:[#allocation36_spill] sm:$0xff]  ;;  %v5233_v61 = vld [vmem:[%s7311_s3 + $0x220] sm:$0xff] }
 0x206   : > { %4654 = vmatmul.msk.bf16.gmra.mxu1 %vm7656_vm0, %v6263_v1  ;;  %v5215_v25 = vld [vmem:[%s7311_s3 + $0x190] sm:$0xff]  ;;  %3599 = vmatpush.bf16.msra.mxu2 %v5233_v61 }
 0x207   : > { %v1928_v10 = vpop.f32.mrf.mxu3  ;;  %v1152_v53 = vand.u32 15, %v942_v60 }
 0x208   : > { %3167 = vmatpush.bf16.msra.mxu0 %v5215_v25 }
 0x209   : > { %2716 = vmatmul.bf16.gmra.mxu2 %v7657_v54  ;;  %3365 = vmatpush.bf16.msra.mxu1 %v5223_v11  ;;  %vm5275_vm9 = vcmp.ne.s32.totalorder %v1152_v53, 15  ;;  %v7664_v53 = vld [vmem:[#allocation93_spill] sm:$0xff] }
 0x20a   : > { %v2287_v42 = vpop.f32.mrf.mxu0  ;;  %vm6606_vm0 = vmpackc.low %vm5275_vm9, %vm7529_vm3 }
 0x20b   : > { %v2351_v44 = vadd.f32 %v2287_v42, %v6327_v41  ;;  %v2521_v1 = vpop.f32.mrf.mxu1  ;;  %v5213_v41 = vld [vmem:[%s7311_s3 + $0x180] sm:$0xff]  ;;  %v7658_v42 = vmov 0 }
 0x20c   : > { %v1786_v26 = vpop.f32.mrf.mxu2  ;;  %3168 = vmatpush.bf16.msra.mxu0 %v5214_v17  ;;  %v7659_v42 = vsel %vm6606_vm0, 4294967295, %v7658_v42 }
 0x20d   : > { %v6589_v45 = vadd.f32 %v2521_v1, %v2351_v44  ;;  %v6591_v30 = vadd.f32 %v1923_v3, %v1786_v26  ;;  %3366 = vmatpush.bf16.msra.mxu1 %v5222_v59  ;;  %v5221_v1 = vld [vmem:[%s7311_s3 + $0x1c0] sm:$0xff]  ;;  %7660 = vst [vmem:[#allocation79_spill] sm:$0xff] %v7659_v42  ;;  %v7661_v59 = vld [vmem:[#allocation45_spill] sm:$0xff]  ;;  %v7665_v26 = vld [vmem:[#allocation87_spill] sm:$0xff] }
 0x20e   : > { %vm7666_vm9 = vnez %v7665_v26  ;;  %v7669_v26 = vmov 0 }
 0x20f   : > { %v1930_v56 = vpop.f32.mrf.mxu3 }
 0x210   : > { %3169 = vmatpush.bf16.msra.mxu0 %v5213_v41  ;;  %v944_v41 = vadd.s32 248, %v5652_v15 }
 0x211   : > { %3367 = vmatpush.bf16.msra.mxu1 %v5221_v1 }
 0x212   : > { %v2290_v3 = vpop.f32.mrf.mxu0 }
 0x213   : > { %v2352_v11 = vadd.f32 %v2290_v3, %v6351_v28  ;;  %v2524_v44 = vpop.f32.mrf.mxu1  ;;  %v7667_v3 = vld [vmem:[#allocation42_spill] sm:$0xff] }
 0x214   : > { %v1788_v17 = vpop.f32.mrf.mxu2  ;;  %4786 = vmatmul.msk.bf16.gmra.mxu3 %vm6266_vm11, %v7661_v59 }
 0x215   : > { %v6614_v61 = vadd.f32 %v2524_v44, %v2352_v11  ;;  %v6616_v25 = vadd.f32 %v1925_v20, %v1788_v17  ;;  %4546 = vmatmul.msk.bf16.gmra.mxu0 %vm6606_vm0, %v7664_v53  ;;  %v1166_v44 = vand.u32 15, %v944_v41  ;;  %v7674_v41 = vld [vmem:[#allocation100_spill] sm:$0xff] }
 0x216   : > { %4658 = vmatmul.msk.bf16.gmra.mxu1 %vm7666_vm9, %v6312_v48 }
 0x217   : > { %7663 = vst [vmem:[#allocation30_spill] sm:$0xff] %v6614_v61  ;;  %v1933_v28 = vpop.f32.mrf.mxu3  ;;  %vm5276_vm11 = vcmp.ne.s32.totalorder %v1166_v44, 15 }
 0x218   : > { %vm6632_vm9 = vmpackc.low %vm5276_vm11, %vm7529_vm3 }
 0x219   : > { %2721 = vmatmul.bf16.gmra.mxu2 %v7667_v3  ;;  %v7670_v26 = vsel %vm6632_vm9, 4294967295, %v7669_v26 }
 0x21a   : > { %v2292_v60 = vpop.f32.mrf.mxu0  ;;  %7671 = vst [vmem:[#allocation36_spill] sm:$0xff] %v7670_v26 }
 0x21b   : > { %v2353_v1 = vadd.f32 %v2292_v60, %v6388_v2  ;;  %v2526_v11 = vpop.f32.mrf.mxu1 }
 0x21c   : > { %v1791_v20 = vpop.f32.mrf.mxu2 }
 0x21d   : > { %v6627_v17 = vadd.f32 %v2526_v11, %v2353_v1  ;;  %v6629_v59 = vadd.f32 %v1928_v10, %v1791_v20 }
 0x21f   : > { %7668 = vst [vmem:[#allocation86_spill] sm:$0xff] %v6627_v17  ;;  %v1935_v61 = vpop.f32.mrf.mxu3 }
 0x222   : > { %v2295_v57 = vpop.f32.mrf.mxu0 }
 0x223   : > { %v2354_v15 = vadd.f32 %v2295_v57, %v6422_v52  ;;  %v2529_v48 = vpop.f32.mrf.mxu1  ;;  %v7676_v57 = vld [vmem:[#allocation51_spill] sm:$0xff]  ;;  %v5232_v52 = vld [vmem:[%s7311_s3 + $0x218] sm:$0xff] }
 0x224   : > { %v1793_v32 = vpop.f32.mrf.mxu2  ;;  %4790 = vmatmul.msk.bf16.gmra.mxu3 %vm6315_vm13, %v5991_v43  ;;  %3600 = vmatpush.bf16.msra.mxu2 %v5232_v52  ;;  %v7677_v52 = vld [vmem:[#allocation13_spill] sm:$0xff] }
 0x225   : > { %v6640_v60 = vadd.f32 %v2529_v48, %v2354_v15  ;;  %v6642_v10 = vadd.f32 %v1930_v56, %v1793_v32  ;;  %4550 = vmatmul.msk.bf16.gmra.mxu0 %vm6632_vm9, %v7674_v41 }
 0x226   : > { %4662 = vmatmul.msk.bf16.gmra.mxu1 %vm6308_vm8, %v6375_v47 }
 0x227   : > { %7673 = vst [vmem:[#allocation93_spill] sm:$0xff] %v6640_v60  ;;  %v1938_v11 = vpop.f32.mrf.mxu3 }
 0x229   : > { %2726 = vmatmul.bf16.gmra.mxu2 %v7676_v57 }
 0x22a   : > { %v2297_v44 = vpop.f32.mrf.mxu0 }
 0x22b   : > { %v2355_v48 = vadd.f32 %v2297_v44, %v6435_v58  ;;  %v2531_v56 = vpop.f32.mrf.mxu1  ;;  %v7678_v44 = vld [vmem:[#allocation50_spill] sm:$0xff] }
 0x22c   : > { %v1796_v32 = vpop.f32.mrf.mxu2  ;;  %vm7679_vm3 = vnez %v7678_v44 }
 0x22d   : > { %v6655_v20 = vadd.f32 %v2531_v56, %v2355_v48  ;;  %v6657_v15 = vadd.f32 %v1933_v28, %v1796_v32  ;;  %v7680_v48 = vld [vmem:[#allocation57_spill] sm:$0xff] }
 0x22f   : > { %v1940_v2 = vpop.f32.mrf.mxu3 }
 0x232   : > { %v2300_v43 = vpop.f32.mrf.mxu0 }
 0x233   : > { %v2356_v1 = vadd.f32 %v2300_v43, %v6451_v24  ;;  %v2534_v47 = vpop.f32.mrf.mxu1 }
 0x234   : > { %v1798_v60 = vpop.f32.mrf.mxu2  ;;  %4794 = vmatmul.msk.bf16.gmra.mxu3 %vm6370_vm6, %v6041_v38 }
 0x235   : > { %v6663_v17 = vadd.f32 %v2534_v47, %v2356_v1  ;;  %v6665_v58 = vadd.f32 %v1935_v61, %v1798_v60  ;;  %4874 = vmatmul.msk.bf16.vlgmr.msra.gmra.mxu0 %vm7679_vm3, %v7677_v52  ;;  %v5244_v61 = vld [vmem:[%s7313_s5 + $0x38] sm:$0xff] }
 0x236   : > { %3368 = vmatmul.bf16.vlgmr.msra.gmra.mxu1 %v5762_v50  ;;  %3869 = vmatpush.bf16.msra.mxu3 %v5244_v61 }
 0x237   : > { %v2938_v28 = vpop.f32.mrf.mxu3 }
 0x239   : > { %2731 = vmatmul.bf16.gmra.mxu2 %v7680_v48 }
 0x23a   : > { %v2302_v43 = vpop.f32.mrf.mxu0 }
 0x23b   : > { %v2357_v24 = vadd.f32 %v2302_v43, %v6470_v16  ;;  %v2536_v56 = vpop.f32.mrf.mxu1 }
 0x23c   : > { %v1801_v32 = vpop.f32.mrf.mxu2 }
 0x23d   : > { %v6673_v36 = vadd.f32 %v2536_v56, %v2357_v24  ;;  %v6675_v47 = vadd.f32 %v1938_v11, %v1801_v32  ;;  %v7681_v11 = vld [vmem:[#allocation18_spill] sm:$0xff]  ;;  %v7682_v24 = vld [vmem:[#allocation8_spill] sm:$0xff] }
 0x23e   : > { %vm7683_vm11 = vnez %v7682_v24  ;;  %v7684_v32 = vld [vmem:[#allocation64_spill] sm:$0xff] }
 0x23f   : > { %v2940_v60 = vpop.f32.mrf.mxu3 }
 0x242   : > { %v2305_v1 = vpop.f32.mrf.mxu0 }
 0x243   : > { %v2358_v50 = vadd.f32 %v2305_v1, %v6483_v18  ;;  %v2539_v52 = vpop.f32.mrf.mxu1  ;;  %v5231_v18 = vld [vmem:[%s7311_s3 + $0x210] sm:$0xff] }
 0x244   : > { %v1803_v44 = vpop.f32.mrf.mxu2  ;;  %4798 = vmatmul.msk.bf16.gmra.mxu3 %vm6425_vm15, %v6086_v35  ;;  %3601 = vmatpush.bf16.msra.mxu2 %v5231_v18 }
 0x245   : > { %v6684_v16 = vadd.f32 %v2539_v52, %v2358_v50  ;;  %v6686_v43 = vadd.f32 %v1940_v2, %v1803_v44  ;;  %4878 = vmatmul.msk.bf16.gmra.mxu0 %vm7683_vm11, %v7681_v11 }
 0x246   : > { %3373 = vmatmul.bf16.gmra.mxu1 %v5801_v29 }
 0x247   : > { %v2943_v56 = vpop.f32.mrf.mxu3 }
 0x249   : > { %2736 = vmatmul.bf16.gmra.mxu2 %v7684_v32 }
 0x24a   : > { %v2307_v61 = vpop.f32.mrf.mxu0 }
 0x24b   : > { %v2359_v1 = vadd.f32 %v2307_v61, %v6496_v6  ;;  %v2541_v50 = vpop.f32.mrf.mxu1  ;;  %v7685_v61 = vld [vmem:[#allocation23_spill] sm:$0xff] }
 0x24c   : > { %v2697_v2 = vpop.f32.mrf.mxu2 }
 0x24d   : > { %v6697_v52 = vadd.f32 %v2541_v50, %v2359_v1  ;;  %v2777_v44 = vadd.f32 %v2697_v2, %v6385_v12  ;;  %v7686_v1 = vld [vmem:[#allocation12_spill] sm:$0xff] }
 0x24e   : > { %vm7687_vm3 = vnez %v7686_v1 }
 0x24f   : > { %v2945_v11 = vpop.f32.mrf.mxu3  ;;  %v6700_v24 = vadd.f32 %v2938_v28, %v2777_v44 }
 0x252   : > { %v2310_v29 = vpop.f32.mrf.mxu0 }
 0x253   : > { %v2360_v8 = vadd.f32 %v2310_v29, %v6512_v14  ;;  %v2544_v35 = vpop.f32.mrf.mxu1  ;;  %v7688_v14 = vld [vmem:[#allocation71_spill] sm:$0xff] }
 0x254   : > { %v2699_v38 = vpop.f32.mrf.mxu2  ;;  %4802 = vmatmul.msk.bf16.gmra.mxu3 %vm6460_vm7, %v6137_v40 }
 0x255   : > { %v6706_v6 = vadd.f32 %v2544_v35, %v2360_v8  ;;  %v2778_v18 = vadd.f32 %v2699_v38, %v6419_v5  ;;  %4882 = vmatmul.msk.bf16.gmra.mxu0 %vm7687_vm3, %v7685_v61  ;;  %v5243_v5 = vld [vmem:[%s7313_s5 + $0x30] sm:$0xff] }
 0x256   : > { %3378 = vmatmul.bf16.gmra.mxu1 %v7649_v23  ;;  %3870 = vmatpush.bf16.msra.mxu3 %v5243_v5 }
 0x257   : > { %v2948_v12 = vpop.f32.mrf.mxu3  ;;  %v6713_v28 = vadd.f32 %v2940_v60, %v2778_v18 }
 0x259   : > { %2741 = vmatmul.bf16.gmra.mxu2 %v7688_v14 }
 0x25a   : > { %v2312_v50 = vpop.f32.mrf.mxu0 }
 0x25b   : > { %v2361_v2 = vadd.f32 %v2312_v50, %v6531_v37  ;;  %v2546_v44 = vpop.f32.mrf.mxu1  ;;  %v7689_v50 = vld [vmem:[#allocation28_spill] sm:$0xff] }
 0x25c   : > { %v2702_v29 = vpop.f32.mrf.mxu2 }
 0x25d   : > { %v6717_v35 = vadd.f32 %v2546_v44, %v2361_v2  ;;  %v2779_v38 = vadd.f32 %v2702_v29, %v6433_v27  ;;  %v7690_v2 = vld [vmem:[#allocation17_spill] sm:$0xff]  ;;  %v5230_v29 = vld [vmem:[%s7311_s3 + $0x208] sm:$0xff] }
 0x25e   : > { %vm7691_vm11 = vnez %v7690_v2  ;;  %3602 = vmatpush.bf16.msra.mxu2 %v5230_v29 }
 0x25f   : > { %v2950_v8 = vpop.f32.mrf.mxu3  ;;  %v6723_v23 = vadd.f32 %v2943_v56, %v2779_v38 }
 0x262   : > { %v2315_v60 = vpop.f32.mrf.mxu0 }
 0x263   : > { %v2362_v18 = vadd.f32 %v2315_v60, %v6544_v49  ;;  %v2549_v61 = vpop.f32.mrf.mxu1  ;;  %v7692_v49 = vld [vmem:[#allocation77_spill] sm:$0xff] }
 0x264   : > { %v2704_v1 = vpop.f32.mrf.mxu2  ;;  %4806 = vmatmul.msk.bf16.gmra.mxu3 %vm6486_vm4, %v7646_v31 }
 0x265   : > { %v6729_v37 = vadd.f32 %v2549_v61, %v2362_v18  ;;  %v2780_v27 = vadd.f32 %v2704_v1, %v6449_v7  ;;  %4886 = vmatmul.msk.bf16.gmra.mxu0 %vm7691_vm11, %v7689_v50 }
 0x266   : > { %3383 = vmatmul.bf16.gmra.mxu1 %v7657_v54 }
 0x267   : > { %v2953_v56 = vpop.f32.mrf.mxu3  ;;  %v6736_v44 = vadd.f32 %v2945_v11, %v2780_v27 }
 0x269   : > { %2746 = vmatmul.bf16.gmra.mxu2 %v7692_v49 }
 0x26a   : > { %v2317_v38 = vpop.f32.mrf.mxu0 }
 0x26b   : > { %v2363_v5 = vadd.f32 %v2317_v38, %v6563_v51  ;;  %v2551_v60 = vpop.f32.mrf.mxu1  ;;  %v7693_v38 = vld [vmem:[#allocation34_spill] sm:$0xff] }
 0x26c   : > { %v2707_v7 = vpop.f32.mrf.mxu2 }
 0x26d   : > { %v6743_v18 = vadd.f32 %v2551_v60, %v2363_v5  ;;  %v2781_v61 = vadd.f32 %v2707_v7, %v6468_v55  ;;  %v7694_v5 = vld [vmem:[#allocation22_spill] sm:$0xff] }
 0x26e   : > { %vm7695_vm3 = vnez %v7694_v5 }
 0x26f   : > { %v2955_v54 = vpop.f32.mrf.mxu3  ;;  %v6746_v1 = vadd.f32 %v2948_v12, %v2781_v61 }
 0x272   : > { %v2320_v11 = vpop.f32.mrf.mxu0 }
 0x273   : > { %v2364_v27 = vadd.f32 %v2320_v11, %v6591_v30  ;;  %v2554_v50 = vpop.f32.mrf.mxu1  ;;  %v7696_v30 = vld [vmem:[#allocation84_spill] sm:$0xff] }
 0x274   : > { %v2709_v2 = vpop.f32.mrf.mxu2  ;;  %4810 = vmatmul.msk.bf16.gmra.mxu3 %vm6521_vm10, %v7654_v13 }
 0x275   : > { %v6752_v51 = vadd.f32 %v2554_v50, %v2364_v27  ;;  %v2782_v29 = vadd.f32 %v2709_v2, %v6481_v19  ;;  %4890 = vmatmul.msk.bf16.gmra.mxu0 %vm7695_vm3, %v7693_v38  ;;  %v5242_v50 = vld [vmem:[%s7313_s5 + $0x28] sm:$0xff] }
 0x276   : > { %3388 = vmatmul.bf16.gmra.mxu1 %v7667_v3  ;;  %3871 = vmatpush.bf16.msra.mxu3 %v5242_v50 }
 0x277   : > { %v2958_v55 = vpop.f32.mrf.mxu3  ;;  %v6759_v12 = vadd.f32 %v2950_v8, %v2782_v29 }
 0x279   : > { %2751 = vmatmul.bf16.gmra.mxu2 %v7696_v30 }
 0x27a   : > { %v2322_v60 = vpop.f32.mrf.mxu0 }
 0x27b   : > { %v2365_v7 = vadd.f32 %v2322_v60, %v6616_v25  ;;  %v2556_v61 = vpop.f32.mrf.mxu1  ;;  %v7697_v60 = vld [vmem:[#allocation40_spill] sm:$0xff] }
 0x27c   : > { %v2712_v11 = vpop.f32.mrf.mxu2 }
 0x27d   : > { %v6763_v27 = vadd.f32 %v2556_v61, %v2365_v7  ;;  %v2783_v19 = vadd.f32 %v2712_v11, %v6494_v22  ;;  %v7698_v7 = vld [vmem:[#allocation27_spill] sm:$0xff]  ;;  %v5229_v11 = vld [vmem:[%s7311_s3 + $0x200] sm:$0xff] }
 0x27e   : > { %vm7699_vm11 = vnez %v7698_v7  ;;  %3603 = vmatpush.bf16.msra.mxu2 %v5229_v11 }
 0x27f   : > { %v6769_v2 = vpop.f32.mrf.mxu3  ;;  %v6771_v3 = vadd.f32 %v2953_v56, %v2783_v19 }
 0x282   : > { %v2325_v8 = vpop.f32.mrf.mxu0 }
 0x283   : > { %v2366_v29 = vadd.f32 %v2325_v8, %v6629_v59  ;;  %v2559_v38 = vpop.f32.mrf.mxu1  ;;  %v7700_v59 = vld [vmem:[#allocation91_spill] sm:$0xff] }
 0x284   : > { %v2714_v25 = vpop.f32.mrf.mxu2  ;;  %4814 = vmatmul.msk.bf16.gmra.mxu3 %vm6553_vm2, %v7664_v53 }
 0x285   : > { %v6777_v5 = vadd.f32 %v2559_v38, %v2366_v29  ;;  %v2784_v22 = vadd.f32 %v2714_v25, %v6510_v62  ;;  %4894 = vmatmul.msk.bf16.gmra.mxu0 %vm7699_vm11, %v7697_v60 }
 0x286   : > { %3393 = vmatmul.bf16.gmra.mxu1 %v7676_v57 }
 0x287   : > { %v2963_v56 = vpop.f32.mrf.mxu3  ;;  %v6784_v61 = vadd.f32 %v2955_v54, %v2784_v22 }
 0x289   : > { %2756 = vmatmul.bf16.gmra.mxu2 %v7700_v59 }
 0x28a   : > { %v2327_v19 = vpop.f32.mrf.mxu0 }
 0x28b   : > { %v2367_v50 = vadd.f32 %v2327_v19, %v6642_v10  ;;  %v2561_v8 = vpop.f32.mrf.mxu1  ;;  %v7701_v19 = vld [vmem:[#allocation47_spill] sm:$0xff] }
 0x28c   : > { %v2717_v62 = vpop.f32.mrf.mxu2 }
 0x28d   : > { %v6791_v29 = vadd.f32 %v2561_v8, %v2367_v50  ;;  %v2785_v38 = vadd.f32 %v2717_v62, %v6529_v63  ;;  %v7702_v63 = vld [vmem:[#allocation33_spill] sm:$0xff]  ;;  %v7704_v50 = vld [vmem:[#allocation98_spill] sm:$0xff] }
 0x28e   : > { %vm7703_vm3 = vnez %v7702_v63 }
 0x28f   : > { %v6794_v57 = vpop.f32.mrf.mxu3  ;;  %v6796_v54 = vadd.f32 %v2958_v55, %v2785_v38 }
 0x292   : > { %v2330_v25 = vpop.f32.mrf.mxu0 }
 0x293   : > { %v2368_v22 = vadd.f32 %v2330_v25, %v6657_v15  ;;  %v2564_v60 = vpop.f32.mrf.mxu1 }
 0x294   : > { %v2719_v7 = vpop.f32.mrf.mxu2  ;;  %4818 = vmatmul.msk.bf16.gmra.mxu3 %vm6606_vm0, %v7674_v41 }
 0x295   : > { %v6802_v10 = vadd.f32 %v2564_v60, %v2368_v22  ;;  %v6805_v11 = vadd.f32 %v2719_v7, %v6542_v39  ;;  %4898 = vmatmul.msk.bf16.gmra.mxu0 %vm7703_vm3, %v7701_v19  ;;  %v5241_v39 = vld [vmem:[%s7313_s5 + $0x20] sm:$0xff]  ;;  %vm7710_vm3 = vsmask.f32 7424 }
 0x296   : > { %3398 = vmatmul.bf16.gmra.mxu1 %v7680_v48  ;;  %3872 = vmatpush.bf16.msra.mxu3 %v5241_v39 }
 0x297   : > { %v2968_v55 = vpop.f32.mrf.mxu3 }
 0x299   : > { %2761 = vmatmul.bf16.gmra.mxu2 %v7704_v50 }
 0x29a   : > { %v2332_v15 = vpop.f32.mrf.mxu0 }
 0x29b   : > { %v2369_v8 = vadd.f32 %v2332_v15, %v6665_v58  ;;  %v2566_v62 = vpop.f32.mrf.mxu1 }
 0x29c   : > { %v2722_v38 = vpop.f32.mrf.mxu2 }
 0x29d   : > { %v6813_v25 = vadd.f32 %v2566_v62, %v2369_v8  ;;  %v2787_v22 = vadd.f32 %v2722_v38, %v6561_v33  ;;  %v7706_v8 = vld [vmem:[#allocation39_spill] sm:$0xff] }
 0x29e   : > { %vm7707_vm11 = vnez %v7706_v8  ;;  %v7708_v62 = vld [vmem:[#allocation107_spill] sm:$0xff] }
 0x29f   : > { %v6819_v60 = vpop.f32.mrf.mxu3  ;;  %v6821_v48 = vadd.f32 %v2963_v56, %v2787_v22 }
 0x2a0   : > { %7705 = vst [vmem:[#allocation42_spill] sm:$0xff] %v6819_v60 }
 0x2a2   : > { %v2335_v7 = vpop.f32.mrf.mxu0 }
 0x2a3   : > { %v2370_v19 = vadd.f32 %v2335_v7, %v6675_v47  ;;  %v2569_v63 = vpop.f32.mrf.mxu1  ;;  %v7709_v47 = vld [vmem:[#allocation106_spill] sm:$0xff] }
 0x2a4   : > { %v2724_v58 = vpop.f32.mrf.mxu2  ;;  %4822 = vmatmul.msk.bf16.gmra.mxu3 %vm6632_vm9, %v6393_v9  ;;  %v6839_v38 = vsel %vm7710_vm3, %v7709_v47, %v7708_v62 }
 0x2a5   : > { %v6827_v15 = vadd.f32 %v2569_v63, %v2370_v19  ;;  %v6830_v33 = vadd.f32 %v2724_v58, %v6589_v45  ;;  %4902 = vmatmul.msk.bf16.gmra.mxu0 %vm7707_vm11, %v5999_v21  ;;  %v7711_v63 = vld [vmem:[#allocation30_spill] sm:$0xff]  ;;  %v7712_v21 = vld [vmem:[#allocation101_spill] sm:$0xff]  ;;  %vm7718_vm11 = vmmov %vm7710_vm3 }
 0x2a6   : > { %3403 = vmatmul.bf16.gmra.mxu1 %v7684_v32  ;;  %v2607_v32 = vpack.c.bf16 %v7712_v21, %v7712_v21 }
 0x2a7   : > { %v2973_v56 = vpop.f32.mrf.mxu3 }
 0x2a8   : > { %v2634_v47 = vshll.u32 %v2607_v32, 16 }
 0x2a9   : > { %2766 = vmatmul.bf16.gmra.mxu2 %v6839_v38 }
 0x2aa   : > { %v2337_v22 = vpop.f32.mrf.mxu0 }
 0x2ab   : > { %v2371_v39 = vadd.f32 %v2337_v22, %v6686_v43  ;;  %v2571_v7 = vpop.f32.mrf.mxu1  ;;  %v7714_v22 = vld [vmem:[#allocation86_spill] sm:$0xff] }
 0x2ac   : > { %v2727_v45 = vpop.f32.mrf.mxu2 }
 0x2ad   : > { %v6843_v19 = vadd.f32 %v2571_v7, %v2371_v39  ;;  %v2789_v58 = vadd.f32 %v2727_v45, %v7711_v63  ;;  %v7715_v7 = vld [vmem:[#allocation61_spill] sm:$0xff]  ;;  %v2636_v63 = vrot.slane %v2634_v47, 1 }
 0x2af   : > { %v6848_v8 = vpop.f32.mrf.mxu3  ;;  %v6850_v26 = vadd.f32 %v2968_v55, %v2789_v58  ;;  %v7717_v58 = vld [vmem:[#allocation108_spill] sm:$0xff] }
 0x2b0   : > { %7713 = vst [vmem:[#allocation100_spill] sm:$0xff] %v6848_v8  ;;  %v2637_v32 = vsel %vm7718_vm11, %v7717_v58, %v2636_v63 }
 0x2b2   : > { %v3171_v62 = vpop.f32.mrf.mxu0 }
 0x2b3   : > { %v3251_v60 = vadd.f32 %v3171_v62, %v6700_v24  ;;  %v3369_v42 = vpop.f32.mrf.mxu1 }
 0x2b4   : > { %v2729_v9 = vpop.f32.mrf.mxu2 }
 0x2b5   : > { %v6853_v43 = vadd.f32 %v3369_v42, %v3251_v60  ;;  %v6856_v39 = vadd.f32 %v2729_v9, %v7714_v22  ;;  %4906 = vmatmul.msk.bf16.gmra.mxu0 %vm5947_vm14, %v7715_v7  ;;  %v7719_v9 = vld [vmem:[#allocation93_spill] sm:$0xff] }
 0x2b6   : > { %3408 = vmatmul.bf16.gmra.mxu1 %v7688_v14  ;;  %v5240_v7 = vld [vmem:[%s7313_s5 + $0x18] sm:$0xff] }
 0x2b7   : > { %v2978_v55 = vpop.f32.mrf.mxu3  ;;  %3873 = vmatpush.bf16.msra.mxu3 %v5240_v7 }
 0x2b9   : > { %2771 = vmatmul.bf16.gmra.mxu2 %v2637_v32 }
 0x2ba   : > { %v3173_v24 = vpop.f32.mrf.mxu0 }
 0x2bb   : > { %v3252_v62 = vadd.f32 %v3173_v24, %v6713_v28  ;;  %v3371_v42 = vpop.f32.mrf.mxu1 }
 0x2bc   : > { %v2732_v60 = vpop.f32.mrf.mxu2 }
 0x2bd   : > { %v6865_v8 = vadd.f32 %v3371_v42, %v3252_v62  ;;  %v2791_v22 = vadd.f32 %v2732_v60, %v7719_v9  ;;  %v7721_v62 = vld [vmem:[#allocation68_spill] sm:$0xff] }
 0x2be   : > { %v7723_v9 = vld [vmem:[#allocation16_spill] sm:$0xff] }
 0x2bf   : > { %v6871_v14 = vpop.f32.mrf.mxu3  ;;  %v6873_v47 = vadd.f32 %v2973_v56, %v2791_v22 }
 0x2c0   : > { %7720 = vst [vmem:[#allocation51_spill] sm:$0xff] %v6871_v14 }
 0x2c2   : > { %v3176_v45 = vpop.f32.mrf.mxu0 }
 0x2c3   : > { %v3253_v63 = vadd.f32 %v3176_v45, %v6723_v23  ;;  %v3374_v58 = vpop.f32.mrf.mxu1 }
 0x2c4   : > { %v2734_v28 = vpop.f32.mrf.mxu2 }
 0x2c5   : > { %v6876_v32 = vadd.f32 %v3374_v58, %v3253_v63  ;;  %v6879_v24 = vadd.f32 %v2734_v28, %v6655_v20  ;;  %4910 = vmatmul.msk.bf16.gmra.mxu0 %vm5995_vm5, %v7721_v62 }
 0x2c6   : > { %3413 = vmatmul.bf16.gmra.mxu1 %v7692_v49 }
 0x2c7   : > { %v2983_v60 = vpop.f32.mrf.mxu3 }
 0x2c9   : > { %5034 = vmatmul.msk.bf16.vlgmr.msra.gmra.mxu2 %vm5954_vm1, %v7723_v9 }
 0x2ca   : > { %v3178_v22 = vpop.f32.mrf.mxu0 }
 0x2cb   : > { %v3254_v23 = vadd.f32 %v3178_v22, %v6736_v44  ;;  %v3376_v7 = vpop.f32.mrf.mxu1  ;;  %v7725_v44 = vld [vmem:[#allocation74_spill] sm:$0xff] }
 0x2cc   : > { %v2737_v45 = vpop.f32.mrf.mxu2 }
 0x2cd   : > { %v6889_v63 = vadd.f32 %v3376_v7, %v3254_v23  ;;  %v2793_v20 = vadd.f32 %v2737_v45, %v6663_v17  ;;  %v7727_v17 = vld [vmem:[#allocation21_spill] sm:$0xff] }
 0x2cf   : > { %v6892_v58 = vadd.f32 %v2978_v55, %v2793_v20  ;;  %v6894_v28 = vpop.f32.mrf.mxu3  ;;  %v7728_v55 = vld [vmem:[#allocation55_spill] sm:$0xff] }
 0x2d0   : > { %vm7729_vm5 = vnez %v7728_v55 }
 0x2d2   : > { %v3181_v62 = vpop.f32.mrf.mxu0 }
 0x2d3   : > { %v3255_v49 = vadd.f32 %v3181_v62, %v6746_v1  ;;  %v3379_v42 = vpop.f32.mrf.mxu1 }
 0x2d4   : > { %v2739_v14 = vpop.f32.mrf.mxu2 }
 0x2d5   : > { %v6897_v56 = vadd.f32 %v3379_v42, %v3255_v49  ;;  %v6900_v9 = vadd.f32 %v2739_v14, %v6673_v36  ;;  %4914 = vmatmul.msk.bf16.gmra.mxu0 %vm7639_vm12, %v7725_v44  ;;  %v5239_v14 = vld [vmem:[%s7313_s5 + $0x10] sm:$0xff] }
 0x2d6   : > { %3418 = vmatmul.bf16.gmra.mxu1 %v7696_v30  ;;  %3874 = vmatpush.bf16.msra.mxu3 %v5239_v14 }
 0x2d7   : > { %v2988_v23 = vpop.f32.mrf.mxu3 }
 0x2d9   : > { %5038 = vmatmul.msk.bf16.gmra.mxu2 %vm7729_vm5, %v7727_v17 }
 0x2da   : > { %v3183_v7 = vpop.f32.mrf.mxu0 }
 0x2db   : > { %v3256_v1 = vadd.f32 %v3183_v7, %v6759_v12  ;;  %v3381_v45 = vpop.f32.mrf.mxu1  ;;  %v7731_v7 = vld [vmem:[#allocation67_spill] sm:$0xff] }
 0x2dc   : > { %v2742_v20 = vpop.f32.mrf.mxu2  ;;  %vm7732_vm14 = vnez %v7731_v7  ;;  %v7739_v7 = vld [vmem:[#allocation32_spill] sm:$0xff] }
 0x2dd   : > { %v6910_v62 = vadd.f32 %v3381_v45, %v3256_v1  ;;  %v2795_v36 = vadd.f32 %v2742_v20, %v6684_v16  ;;  %v7730_v16 = vld [vmem:[#allocation81_spill] sm:$0xff]  ;;  %v7734_v1 = vld [vmem:[#allocation62_spill] sm:$0xff] }
 0x2de   : > { %vm7735_vm1 = vnez %v7734_v1 }
 0x2df   : > { %v6916_v30 = vadd.f32 %v2983_v60, %v2795_v36  ;;  %v6919_v22 = vpop.f32.mrf.mxu3  ;;  %v7733_v60 = vld [vmem:[#allocation26_spill] sm:$0xff] }
 0x2e2   : > { %v3186_v49 = vpop.f32.mrf.mxu0 }
 0x2e3   : > { %v3257_v42 = vadd.f32 %v3186_v49, %v6771_v3  ;;  %v3384_v44 = vpop.f32.mrf.mxu1 }
 0x2e4   : > { %v2744_v12 = vpop.f32.mrf.mxu2 }
 0x2e5   : > { %v6921_v17 = vadd.f32 %v3384_v44, %v3257_v42  ;;  %v6924_v55 = vadd.f32 %v2744_v12, %v6697_v52  ;;  %4918 = vmatmul.msk.bf16.gmra.mxu0 %vm7732_vm14, %v7730_v16  ;;  %v7737_v16 = vld [vmem:[#allocation73_spill] sm:$0xff] }
 0x2e6   : > { %3423 = vmatmul.bf16.gmra.mxu1 %v7700_v59  ;;  %v7736_v59 = vld [vmem:[#allocation88_spill] sm:$0xff]  ;;  %vm7738_vm12 = vnez %v7737_v16 }
 0x2e7   : > { %v2993_v49 = vpop.f32.mrf.mxu3 }
 0x2e9   : > { %5042 = vmatmul.msk.bf16.gmra.mxu2 %vm7735_vm1, %v7733_v60  ;;  %v7740_v60 = vld [vmem:[#allocation69_spill] sm:$0xff] }
 0x2ea   : > { %v3188_v3 = vpop.f32.mrf.mxu0  ;;  %vm7741_vm3 = vnez %v7740_v60  ;;  %v7748_v60 = vld [vmem:[#allocation104_spill] sm:$0xff] }
 0x2eb   : > { %v3258_v45 = vadd.f32 %v3188_v3, %v6784_v61  ;;  %v3386_v20 = vpop.f32.mrf.mxu1 }
 0x2ec   : > { %v2747_v36 = vpop.f32.mrf.mxu2 }
 0x2ed   : > { %v6934_v14 = vadd.f32 %v3386_v20, %v3258_v45  ;;  %v2797_v52 = vadd.f32 %v2747_v36, %v6706_v6  ;;  %v7742_v20 = vld [vmem:[#allocation95_spill] sm:$0xff]  ;;  %v7743_v36 = vld [vmem:[#allocation80_spill] sm:$0xff] }
 0x2ee   : > { %vm7744_vm11 = vnez %v7743_v36 }
 0x2ef   : > { %v6937_v42 = vadd.f32 %v2988_v23, %v2797_v52  ;;  %v6946_v61 = vpop.f32.mrf.mxu3  ;;  %v7745_v52 = vld [vmem:[#allocation38_spill] sm:$0xff] }
 0x2f4   : > { %v2749_v44 = vpop.f32.mrf.mxu2 }
 0x2f5   : > { %v6940_v12 = vadd.f32 %v2749_v44, %v6717_v35  ;;  %4922 = vmatmul.msk.bf16.gmra.mxu0 %vm7738_vm12, %v7736_v59  ;;  %v5238_v35 = vld [vmem:[%s7313_s5 + $0x8] sm:$0xff]  ;;  %vm7759_vm12 = vsmask.f32 7424 }
 0x2f6   : > { %3428 = vmatmul.bf16.gmra.mxu1 %v7704_v50  ;;  %3875 = vmatpush.bf16.msra.mxu3 %v5238_v35  ;;  %v7752_v35 = vld [vmem:[#allocation45_spill] sm:$0xff] }
 0x2f7   : > { %v2998_v3 = vpop.f32.mrf.mxu3 }
 0x2f9   : > { %5046 = vmatmul.msk.bf16.gmra.mxu2 %vm7741_vm3, %v7739_v7 }
 0x2fc   : > { %v2752_v6 = vpop.f32.mrf.mxu2 }
 0x2fd   : > { %v2799_v23 = vadd.f32 %v2752_v6, %v6729_v37  ;;  %v7746_v37 = vld [vmem:[#allocation75_spill] sm:$0xff] }
 0x2fe   : > { %vm7747_vm5 = vnez %v7746_v37  ;;  %v7749_v6 = vld [vmem:[#allocation87_spill] sm:$0xff] }
 0x2ff   : > { %v6955_v1 = vadd.f32 %v2993_v49, %v2799_v23  ;;  %v6967_v44 = vpop.f32.mrf.mxu3  ;;  %vm7750_vm14 = vnez %v7749_v6  ;;  %v7751_v23 = vld [vmem:[#allocation110_spill] sm:$0xff] }
 0x304   : > { %v2754_v45 = vpop.f32.mrf.mxu2 }
 0x305   : > { %v6958_v50 = vadd.f32 %v2754_v45, %v6743_v18  ;;  %4926 = vmatmul.msk.bf16.gmra.mxu0 %vm7744_vm11, %v7742_v20  ;;  %v7753_v45 = vld [vmem:[#allocation82_spill] sm:$0xff] }
 0x306   : > { %3433 = vmatmul.bf16.gmra.mxu1 %v6839_v38  ;;  %vm7754_vm1 = vnez %v7753_v45  ;;  %v7761_v45 = vld [vmem:[#allocation89_spill] sm:$0xff] }
 0x307   : > { %v3003_v38 = vpop.f32.mrf.mxu3  ;;  %vm7762_vm3 = vnez %v7761_v45  ;;  %v7766_v45 = vld [vmem:[#allocation66_spill] sm:$0xff] }
 0x309   : > { %5050 = vmatmul.msk.bf16.gmra.mxu2 %vm7747_vm5, %v7745_v52 }
 0x30c   : > { %v2757_v59 = vpop.f32.mrf.mxu2 }
 0x30d   : > { %v2801_v49 = vadd.f32 %v2757_v59, %v6752_v51  ;;  %v7756_v59 = vld [vmem:[#allocation109_spill] sm:$0xff] }
 0x30f   : > { %v6970_v16 = vadd.f32 %v2998_v3, %v2801_v49  ;;  %v5237_v3 = vld [vmem:[%s7313_s5] sm:$0xff]  ;;  %v6989_v37 = vpop.f32.mrf.mxu3 }
 0x310   : > { %3876 = vmatpush.bf16.msra.mxu3 %v5237_v3 }
 0x314   : > { %v2759_v7 = vpop.f32.mrf.mxu2 }
 0x315   : > { %v6973_v18 = vadd.f32 %v2759_v7, %v6763_v27  ;;  %4930 = vmatmul.msk.bf16.gmra.mxu0 %vm7750_vm14, %v7748_v60  ;;  %v7755_v27 = vld [vmem:[#allocation102_spill] sm:$0xff] }
 0x316   : > { %3438 = vmatmul.bf16.gmra.mxu1 %v7751_v23  ;;  %v3306_v36 = vshrl.u32 %v7755_v27, 16 }
 0x318   : > { %v3308_v49 = vor.u32 %v3306_v36, %v7756_v59 }
 0x319   : > { %5054 = vmatmul.msk.bf16.gmra.mxu2 %vm7754_vm1, %v7752_v35  ;;  %v7760_v35 = vld [vmem:[#allocation53_spill] sm:$0xff] }
 0x31c   : > { %v2762_v20 = vpop.f32.mrf.mxu2 }
 0x31d   : > { %v2803_v51 = vadd.f32 %v2762_v20, %v6777_v5  ;;  %v7758_v5 = vld [vmem:[#allocation10_spill] sm:$0xff] }
 0x31e   : > { %v3309_v23 = vsel %vm7759_vm12, %v3308_v49, %v7758_v5 }
 0x31f   : > { %v6987_v52 = vadd.f32 %v3003_v38, %v2803_v51  ;;  %v3008_v38 = vpop.f32.mrf.mxu3 }
 0x324   : > { %v2764_v7 = vpop.f32.mrf.mxu2 }
 0x325   : > { %v6993_v60 = vadd.f32 %v2764_v7, %v6791_v29  ;;  %4934 = vmatmul.msk.bf16.gmra.mxu0 %vm6308_vm8, %v7755_v27  ;;  %v7763_v27 = vld [vmem:[#allocation59_spill] sm:$0xff]  ;;  %v3191_v7 = vpop.f32.mrf.mxu0 }
 0x326   : > { %3443 = vmatmul.bf16.gmra.mxu1 %v3309_v23  ;;  %v3259_v0 = vadd.f32 %v3191_v7, %v6796_v54 }
 0x327   : > { %v7006_v29 = vpop.f32.mrf.mxu3 }
 0x329   : > { %5058 = vmatmul.msk.bf16.gmra.mxu2 %vm7762_vm3, %v7760_v35 }
 0x32c   : > { %v2767_v20 = vpop.f32.mrf.mxu2 }
 0x32d   : > { %v2805_v51 = vadd.f32 %v2767_v20, %v6802_v10 }
 0x32f   : > { %v7004_v3 = vadd.f32 %v3008_v38, %v2805_v51  ;;  %v3013_v5 = vpop.f32.mrf.mxu3  ;;  %v7027_v51 = vld [vmem:[%s7312_s4] ss:$0 sm:$0xff]  ;;  %v3193_v38 = vpop.f32.mrf.mxu0 }
 0x334   : > { %v2769_v36 = vpop.f32.mrf.mxu2 }
 0x335   : > { %v7009_v59 = vadd.f32 %v2769_v36, %v6813_v25 }
 0x339   : > { %5062 = vmatmul.msk.bf16.gmra.mxu2 %vm6315_vm13, %v7763_v27 }
 0x33c   : > { %v2772_v49 = vpop.f32.mrf.mxu2 }
 0x33d   : > { %v2807_v6 = vadd.f32 %v2772_v49, %v6827_v15 }
 0x33f   : > { %v7015_v23 = vadd.f32 %v3013_v5, %v2807_v6 }
 0x344   : > { %v2774_v35 = vpop.f32.mrf.mxu2 }
 0x345   : > { %v7018_v10 = vadd.f32 %v2774_v35, %v6843_v19  ;;  %v3389_v35 = vpop.f32.mrf.mxu1 }
 0x347   : > { %7765 = vst [vmem:[#allocation13_spill] sm:$0xff] %v7018_v10 }
 0x349   : > { %5066 = vmatmul.msk.bf16.gmra.mxu2 %vm6370_vm6, %v7766_v45 }
 0x34c   : > { %v3605_v25 = vpop.f32.mrf.mxu2 }
 0x34d   : > { %v3685_v20 = vadd.f32 %v3605_v25, %v6853_v43 }
 0x34f   : > { %v3721_v36 = vadd.f32 %v7027_v51, %v3685_v20 }
 0x351   : > { %v3753_v49 = vmax.f32 %v3721_v36, 0.0 }
 0x354   : > { %v3607_v15 = vpop.f32.mrf.mxu2 }
 0x355   : > { %v3686_v27 = vadd.f32 %v3607_v15, %v6865_v8  ;;  %v3391_v15 = vpop.f32.mrf.mxu1 }
 0x357   : > { %v3722_v19 = vadd.f32 %v7027_v51, %v3686_v27 }
 0x359   : > { %v3754_v6 = vmax.f32 %v3722_v19, 0.0  ;;  %5070 = vmatmul.msk.bf16.gmra.mxu2 %vm6425_vm15, %v6137_v40  ;;  %v3196_v40 = vpop.f32.mrf.mxu0 }
 0x35b   : > { %v3785_v43 = vpack.c.bf16 %v3754_v6, %v3753_v49 }
 0x35c   : > { %v3610_v45 = vpop.f32.mrf.mxu2 }
 0x35d   : > { %3877 = vmatmul.bf16.vlgmr.msra.gmra.mxu3 %v3785_v43  ;;  %v3687_v25 = vadd.f32 %v3610_v45, %v6876_v32  ;;  %v3394_v5 = vpop.f32.mrf.mxu1 }
 0x35f   : > { %v3723_v20 = vadd.f32 %v7027_v51, %v3687_v25 }
 0x361   : > { %v3755_v27 = vmax.f32 %v3723_v20, 0.0  ;;  %v3198_v43 = vpop.f32.mrf.mxu0 }
 0x364   : > { %v3612_v10 = vpop.f32.mrf.mxu2 }
 0x365   : > { %v3688_v8 = vadd.f32 %v3612_v10, %v6889_v63  ;;  %v3396_v34 = vpop.f32.mrf.mxu1 }
 0x367   : > { %v3724_v36 = vadd.f32 %v7027_v51, %v3688_v8 }
 0x369   : > { %v3756_v19 = vmax.f32 %v3724_v36, 0.0  ;;  %5074 = vmatmul.msk.bf16.gmra.mxu2 %vm6460_vm7, %v7646_v31 }
 0x36b   : > { %v3786_v49 = vpack.c.bf16 %v3756_v19, %v3755_v27  ;;  %v3201_v27 = vpop.f32.mrf.mxu0 }
 0x36c   : > { %v3615_v6 = vpop.f32.mrf.mxu2 }
 0x36d   : > { %3882 = vmatmul.bf16.gmra.mxu3 %v3786_v49  ;;  %v3689_v32 = vadd.f32 %v3615_v6, %v6897_v56  ;;  %v3399_v19 = vpop.f32.mrf.mxu1 }
 0x36f   : > { %v3725_v63 = vadd.f32 %v7027_v51, %v3689_v32 }
 0x371   : > { %v3757_v20 = vmax.f32 %v3725_v63, 0.0 }
 0x374   : > { %v3617_v45 = vpop.f32.mrf.mxu2 }
 0x375   : > { %v3690_v10 = vadd.f32 %v3617_v45, %v6910_v62  ;;  %v3203_v45 = vpop.f32.mrf.mxu0 }
 0x377   : > { %v3726_v25 = vadd.f32 %v7027_v51, %v3690_v10 }
 0x379   : > { %v3758_v8 = vmax.f32 %v3726_v25, 0.0  ;;  %5078 = vmatmul.msk.bf16.gmra.mxu2 %vm6486_vm4, %v7654_v13  ;;  %vm7774_vm4 = vcmask 1045504  }
 0x37b   : > { %v3787_v31 = vpack.c.bf16 %v3758_v8, %v3757_v20  ;;  %v3401_v20 = vpop.f32.mrf.mxu1  ;;  %v3457_v8 = vadd.f32 %v3389_v35, %v3259_v0 }
 0x37c   : > { %v3620_v36 = vpop.f32.mrf.mxu2 }
 0x37d   : > { %3887 = vmatmul.bf16.gmra.mxu3 %v3787_v31  ;;  %v3691_v56 = vadd.f32 %v3620_v36, %v6921_v17  ;;  %v3027_v17 = vadd.f32 %v6769_v2, %v6805_v11  ;;  %v3206_v36 = vpop.f32.mrf.mxu0  ;;  %v3261_v2 = vadd.f32 %v3196_v40, %v6821_v48 }
 0x37f   : > { %v3727_v6 = vadd.f32 %v7027_v51, %v3691_v56 }
 0x381   : > { %v3759_v63 = vmax.f32 %v3727_v6, 0.0 }
 0x384   : > { %v3622_v49 = vpop.f32.mrf.mxu2 }
 0x385   : > { %v3692_v62 = vadd.f32 %v3622_v49, %v6934_v14  ;;  %v3260_v14 = vadd.f32 %v3193_v38, %v3027_v17  ;;  %v3208_v35 = vpop.f32.mrf.mxu0 }
 0x387   : > { %v3728_v32 = vadd.f32 %v7027_v51, %v3692_v62  ;;  %v3458_v56 = vadd.f32 %v3391_v15, %v3260_v14  ;;  %v3029_v15 = vadd.f32 %v6794_v57, %v6830_v33  ;;  %v7769_v14 = vld [vmem:[#allocation105_spill] sm:$0xff]  ;;  %v3263_v57 = vadd.f32 %v3201_v27, %v6850_v26 }
 0x389   : > { %v3760_v10 = vmax.f32 %v3728_v32, 0.0  ;;  %5082 = vmatmul.msk.bf16.gmra.mxu2 %vm6521_vm10, %v7664_v53  ;;  %v3404_v53 = vpop.f32.mrf.mxu1  ;;  %v3459_v32 = vadd.f32 %v3394_v5, %v3261_v2  ;;  %v7772_v2 = vld [vmem:[#allocation44_spill] sm:$0xff] }
 0x38b   : > { %v3788_v13 = vpack.c.bf16 %v3760_v10, %v3759_v63  ;;  %v3262_v63 = vadd.f32 %v3198_v43, %v3029_v15 }
 0x38c   : > { %v3625_v25 = vpop.f32.mrf.mxu2 }
 0x38d   : > { %3892 = vmatmul.bf16.gmra.mxu3 %v3788_v13  ;;  %v3693_v31 = vadd.f32 %v3625_v25, %v3457_v8  ;;  %v3460_v13 = vadd.f32 %v3396_v34, %v3262_v63  ;;  %v3211_v46 = vpop.f32.mrf.mxu0  ;;  %v7771_v34 = vld [vmem:[#allocation42_spill] sm:$0xff] }
 0x38f   : > { %v3729_v6 = vadd.f32 %v7027_v51, %v3693_v31 }
 0x391   : > { %v3761_v54 = vmax.f32 %v3729_v6, 0.0  ;;  %v3406_v0 = vpop.f32.mrf.mxu1 }
 0x394   : > { %v3627_v49 = vpop.f32.mrf.mxu2 }
 0x395   : > { %v3694_v62 = vadd.f32 %v3627_v49, %v3458_v56  ;;  %v3031_v56 = vadd.f32 %v7771_v34, %v6856_v39  ;;  %v3461_v49 = vadd.f32 %v3399_v19, %v3263_v57 }
 0x397   : > { %v3730_v4 = vadd.f32 %v7027_v51, %v3694_v62  ;;  %v3264_v6 = vadd.f32 %v3203_v45, %v3031_v56  ;;  %v3213_v62 = vpop.f32.mrf.mxu0  ;;  %v3037_v45 = vadd.f32 %v6894_v28, %v6924_v55 }
 0x399   : > { %v3762_v7 = vmax.f32 %v3730_v4, 0.0  ;;  %5086 = vmatmul.msk.bf16.gmra.mxu2 %vm6553_vm2, %v7674_v41  ;;  %v3409_v5 = vpop.f32.mrf.mxu1 }
 0x39b   : > { %v3789_v11 = vpack.c.bf16 %v3762_v7, %v3761_v54  ;;  %v3462_v54 = vadd.f32 %v3401_v20, %v3264_v6 }
 0x39c   : > { %v3630_v38 = vpop.f32.mrf.mxu2 }
 0x39d   : > { %3897 = vmatmul.bf16.gmra.mxu3 %v3789_v11  ;;  %v3695_v10 = vadd.f32 %v3630_v38, %v3459_v32  ;;  %v7773_v11 = vrot.slane %v7712_v21, 2 }
 0x39f   : > { %v3731_v17 = vadd.f32 %v7027_v51, %v3695_v10  ;;  %v3481_v38 = vsel %vm7774_vm4, %v7773_v11, %v7772_v2  ;;  %v3216_v20 = vpop.f32.mrf.mxu0  ;;  %v3265_v10 = vadd.f32 %v3206_v36, %v6873_v47 }
 0x3a0   : > { %v5093_v39 = vpack.c.bf16 %v7772_v2, %v3481_v38 }
 0x3a1   : > { %v3763_v48 = vmax.f32 %v3731_v17, 0.0  ;;  %v3411_v15 = vpop.f32.mrf.mxu1 }
 0x3a4   : > { %v3632_v25 = vpop.f32.mrf.mxu2 }
 0x3a5   : > { %v3696_v8 = vadd.f32 %v3632_v25, %v3460_v13  ;;  %v7776_v25 = vld [vmem:[#allocation100_spill] sm:$0xff] }
 0x3a6   : > { %v3033_v17 = vadd.f32 %v7776_v25, %v6879_v24 }
 0x3a7   : > { %v3732_v41 = vadd.f32 %v7027_v51, %v3696_v8  ;;  %v3463_v8 = vadd.f32 %v3404_v53, %v3265_v10  ;;  %v3218_v31 = vpop.f32.mrf.mxu0  ;;  %v7777_v53 = vld [vmem:[#allocation51_spill] sm:$0xff]  ;;  %v7107_v10 = vld [vmem:[%s7314_s6] ss:$0 sm:$0xff] }
 0x3a9   : > { %v3764_v40 = vmax.f32 %v3732_v41, 0.0  ;;  %5090 = vmatmul.msk.bf16.gmra.mxu2 %vm6606_vm0, %v7769_v14  ;;  %v3266_v41 = vadd.f32 %v3208_v35, %v3033_v17  ;;  %v3035_v35 = vadd.f32 %v7777_v53, %v6900_v9  ;;  %v5325_v9 = vld [vmem:[%s7310_s2] sm:$0x3] }
 0x3ab   : > { %v3790_v33 = vpack.c.bf16 %v3764_v40, %v3763_v48  ;;  %v3414_v48 = vpop.f32.mrf.mxu1  ;;  %v3464_v14 = vadd.f32 %v3406_v0, %v3266_v41 }
 0x3ac   : > { %v3635_v43 = vpop.f32.mrf.mxu2 }
 0x3ad   : > { %3902 = vmatmul.bf16.gmra.mxu3 %v3790_v33  ;;  %v3697_v4 = vadd.f32 %v3635_v43, %v3461_v49  ;;  %v3267_v49 = vadd.f32 %v3211_v46, %v6892_v58  ;;  %v7094_v58 = vpop.f32.mrf.mxu3 }
 0x3af   : > { %v3733_v26 = vadd.f32 %v7027_v51, %v3697_v4  ;;  %v3221_v4 = vpop.f32.mrf.mxu0  ;;  %v3465_v0 = vadd.f32 %v3409_v5, %v3267_v49  ;;  %v7099_v5 = vperm.slane %v5325_v9, 1 }
 0x3b1   : > { %v3765_v63 = vmax.f32 %v3733_v26, 0.0 }
 0x3b3   : > { %v3416_v36 = vpop.f32.mrf.mxu1 }
 0x3b4   : > { %v3637_v7 = vpop.f32.mrf.mxu2 }
 0x3b5   : > { %v3698_v27 = vadd.f32 %v3637_v7, %v3462_v54  ;;  %v3268_v54 = vadd.f32 %v3213_v62, %v3035_v35  ;;  %v3269_v62 = vadd.f32 %v3216_v20, %v6916_v30  ;;  %v3271_v35 = vadd.f32 %v3221_v4, %v6937_v42 }
 0x3b7   : > { %v3734_v32 = vadd.f32 %v7027_v51, %v3698_v27  ;;  %v3466_v2 = vadd.f32 %v3411_v15, %v3268_v54  ;;  %v3223_v46 = vpop.f32.mrf.mxu0  ;;  %v3467_v17 = vadd.f32 %v3414_v48, %v3269_v62 }
 0x3b9   : > { %v3766_v19 = vmax.f32 %v3734_v32, 0.0  ;;  %5094 = vmatmul.msk.bf16.gmra.mxu2 %vm6632_vm9, %v5093_v39 }
 0x3bb   : > { %v3791_v13 = vpack.c.bf16 %v3766_v19, %v3765_v63  ;;  %v3419_v11 = vpop.f32.mrf.mxu1 }
 0x3bc   : > { %v3640_v21 = vpop.f32.mrf.mxu2 }
 0x3bd   : > { %3907 = vmatmul.bf16.gmra.mxu3 %v3791_v13  ;;  %v3699_v40 = vadd.f32 %v3640_v21, %v3463_v8  ;;  %v7778_v21 = vld [vmem:[#allocation6_spill] sm:$0xff]  ;;  %v3270_v8 = vadd.f32 %v3218_v31, %v3037_v45 }
 0x3be   : > { %v606_v25 = vadd.f32 %v7778_v21, %v7099_v5 }
 0x3bf   : > { %v3735_v33 = vadd.f32 %v7027_v51, %v3699_v40  ;;  %v3226_v28 = vpop.f32.mrf.mxu0  ;;  %v3468_v40 = vadd.f32 %v3416_v36, %v3270_v8  ;;  %v7781_v8 = vld [vmem:[#allocation11_spill] sm:$0xff] }
 0x3c0   : > { %v686_v55 = vmax.f32 %v606_v25, 0.0 }
 0x3c1   : > { %v3767_v56 = vmax.f32 %v3735_v33, 0.0 }
 0x3c3   : > { %v3421_v13 = vpop.f32.mrf.mxu1 }
 0x3c4   : > { %v3642_v57 = vpop.f32.mrf.mxu2 }
 0x3c5   : > { %v3700_v43 = vadd.f32 %v3642_v57, %v3464_v14 }
 0x3c7   : > { %v3736_v34 = vadd.f32 %v7027_v51, %v3700_v43 }
 0x3c9   : > { %v3768_v47 = vmax.f32 %v3736_v34, 0.0 }
 0x3cb   : > { %v3792_v6 = vpack.c.bf16 %v3768_v47, %v3767_v56  ;;  %v7779_v56 = vld [vmem:[#allocation7_spill] sm:$0xff]  ;;  %v3424_v31 = vpop.f32.mrf.mxu1 }
 0x3cc   : > { %v3645_v24 = vpop.f32.mrf.mxu2  ;;  %v608_v47 = vadd.f32 %v7779_v56, %v7099_v5 }
 0x3cd   : > { %3912 = vmatmul.bf16.gmra.mxu3 %v3792_v6  ;;  %v3701_v7 = vadd.f32 %v3645_v24, %v3465_v0 }
 0x3ce   : > { %v688_v53 = vmax.f32 %v608_v47, 0.0  ;;  %v7782_v47 = vld [vmem:[#allocation14_spill] sm:$0xff] }
 0x3cf   : > { %v3737_v26 = vadd.f32 %v7027_v51, %v3701_v7  ;;  %v3228_v7 = vpop.f32.mrf.mxu0 }
 0x3d1   : > { %v3769_v39 = vmax.f32 %v3737_v26, 0.0 }
 0x3d3   : > { %v3426_v4 = vpop.f32.mrf.mxu1 }
 0x3d4   : > { %v3647_v38 = vpop.f32.mrf.mxu2 }
 0x3d5   : > { %v3702_v27 = vadd.f32 %v3647_v38, %v3466_v2  ;;  %v3039_v38 = vadd.f32 %v6919_v22, %v6940_v12 }
 0x3d7   : > { %v3738_v32 = vadd.f32 %v7027_v51, %v3702_v27  ;;  %v7780_v27 = vld [vmem:[#allocation9_spill] sm:$0xff] }
 0x3d9   : > { %v3770_v63 = vmax.f32 %v3738_v32, 0.0  ;;  %v611_v32 = vadd.f32 %v7780_v27, %v7099_v5 }
 0x3db   : > { %v3793_v15 = vpack.c.bf16 %v3770_v63, %v3769_v39  ;;  %v3469_v39 = vadd.f32 %v3419_v11, %v3271_v35  ;;  %v3272_v63 = vadd.f32 %v3223_v46, %v3039_v38  ;;  %v613_v11 = vadd.f32 %v7781_v8, %v7099_v5 }
 0x3dc   : > { %v3650_v19 = vpop.f32.mrf.mxu2 }
 0x3dd   : > { %3917 = vmatmul.bf16.gmra.mxu3 %v3793_v15  ;;  %v3703_v30 = vadd.f32 %v3650_v19, %v3467_v17  ;;  %v690_v15 = vmax.f32 %v611_v32, 0.0  ;;  %v3470_v19 = vadd.f32 %v3421_v13, %v3272_v63  ;;  %v3231_v17 = vpop.f32.mrf.mxu0  ;;  %v692_v13 = vmax.f32 %v613_v11, 0.0 }
 0x3df   : > { %v3739_v33 = vadd.f32 %v7027_v51, %v3703_v30 }
 0x3e0   : > { %v3878_v41 = vpop.f32.mrf.mxu3 }
 0x3e1   : > { %v3879_v20 = vadd.f32 %v7107_v10, %v3878_v41  ;;  %v3771_v6 = vmax.f32 %v3739_v33, 0.0  ;;  %v3429_v33 = vpop.f32.mrf.mxu1 }
 0x3e3   : > { %v3958_v14 = vmax.f32 %v3879_v20, 0.0 }
 0x3e4   : > { %v3652_v57 = vpop.f32.mrf.mxu2 }
 0x3e5   : > { %v4022_v43 = vadd.f32 %v3958_v14, %v686_v55  ;;  %v3704_v34 = vadd.f32 %v3652_v57, %v3468_v40  ;;  %v3273_v40 = vadd.f32 %v3226_v28, %v6955_v1 }
 0x3e7   : > { %4054 = vst [vmem:[%s7118_s19] sm:$0xff] %v4022_v43  ;;  %v3740_v48 = vadd.f32 %v7027_v51, %v3704_v34  ;;  %v3041_v34 = vadd.f32 %v6946_v61, %v6958_v50 }
 0x3e8   : > { %v3880_v49 = vpop.f32.mrf.mxu3 }
 0x3e9   : > { %v3772_v36 = vmax.f32 %v3740_v48, 0.0  ;;  %v3881_v24 = vadd.f32 %v7107_v10, %v3880_v49  ;;  %v616_v48 = vadd.f32 %v7782_v47, %v7099_v5  ;;  %v3471_v49 = vadd.f32 %v3424_v31, %v3273_v40  ;;  %v3431_v38 = vpop.f32.mrf.mxu1 }
 0x3eb   : > { %v3959_v0 = vmax.f32 %v3881_v24, 0.0  ;;  %v3794_v54 = vpack.c.bf16 %v3772_v36, %v3771_v6  ;;  %v3274_v6 = vadd.f32 %v3228_v7, %v3041_v34  ;;  %v3233_v36 = vpop.f32.mrf.mxu0  ;;  %v694_v28 = vmax.f32 %v616_v48, 0.0 }
 0x3ec   : > { %v3655_v2 = vpop.f32.mrf.mxu2 }
 0x3ed   : > { %v4023_v26 = vadd.f32 %v3959_v0, %v688_v53  ;;  %3922 = vmatmul.bf16.gmra.mxu3 %v3794_v54  ;;  %v3705_v62 = vadd.f32 %v3655_v2, %v3469_v39  ;;  %v3472_v35 = vadd.f32 %v3426_v4, %v3274_v6 }
 0x3ef   : > { %4055 = vst [vmem:[%s7118_s19 + $0x8] sm:$0xff] %v4023_v26  ;;  %v3741_v22 = vadd.f32 %v7027_v51, %v3705_v62  ;;  %v7783_v26 = vld [vmem:[#allocation15_spill] sm:$0xff] }
 0x3f0   : > { %v3883_v9 = vpop.f32.mrf.mxu3  ;;  %v618_v31 = vadd.f32 %v7783_v26, %v7099_v5 }
 0x3f1   : > { %v3884_v42 = vadd.f32 %v7107_v10, %v3883_v9  ;;  %v3773_v30 = vmax.f32 %v3741_v22, 0.0  ;;  %v7784_v22 = vld [vmem:[#allocation19_spill] sm:$0xff]  ;;  %v3434_v11 = vpop.f32.mrf.mxu1 }
 0x3f2   : > { %v696_v62 = vmax.f32 %v618_v31, 0.0 }
 0x3f3   : > { %v3960_v45 = vmax.f32 %v3884_v42, 0.0  ;;  %v3236_v9 = vpop.f32.mrf.mxu0  ;;  %v3275_v42 = vadd.f32 %v3231_v17, %v6970_v16 }
 0x3f4   : > { %v3657_v21 = vpop.f32.mrf.mxu2  ;;  %v3277_v6 = vadd.f32 %v3236_v9, %v6987_v52 }
 0x3f5   : > { %v4024_v12 = vadd.f32 %v3960_v45, %v690_v15  ;;  %v3706_v25 = vadd.f32 %v3657_v21, %v3470_v19  ;;  %v3043_v45 = vadd.f32 %v6967_v44, %v6973_v18 }
 0x3f7   : > { %4056 = vst [vmem:[%s7118_s19 + $0x10] sm:$0xff] %v4024_v12  ;;  %v3742_v46 = vadd.f32 %v7027_v51, %v3706_v25  ;;  %v621_v12 = vadd.f32 %v7784_v22, %v7099_v5  ;;  %v3473_v25 = vadd.f32 %v3429_v33, %v3275_v42  ;;  %v3276_v8 = vadd.f32 %v3233_v36, %v3043_v45 }
 0x3f8   : > { %v3885_v41 = vpop.f32.mrf.mxu3 }
 0x3f9   : > { %v3774_v20 = vmax.f32 %v3742_v46, 0.0  ;;  %v3886_v55 = vadd.f32 %v7107_v10, %v3885_v41  ;;  %v698_v17 = vmax.f32 %v621_v12, 0.0  ;;  %v3436_v48 = vpop.f32.mrf.mxu1 }
 0x3fb   : > { %v3961_v14 = vmax.f32 %v3886_v55, 0.0  ;;  %v3795_v57 = vpack.c.bf16 %v3774_v20, %v3773_v30  ;;  %v3474_v30 = vadd.f32 %v3431_v38, %v3276_v8  ;;  %v3238_v55 = vpop.f32.mrf.mxu0 }
 0x3fc   : > { %v3660_v43 = vpop.f32.mrf.mxu2 }
 0x3fd   : > { %v4025_v56 = vadd.f32 %v3961_v14, %v692_v13  ;;  %3927 = vmatmul.bf16.gmra.mxu3 %v3795_v57  ;;  %v3707_v53 = vadd.f32 %v3660_v43, %v3471_v49  ;;  %v7785_v14 = vld [vmem:[#allocation20_spill] sm:$0xff] }
 0x3fe   : > { %v623_v57 = vadd.f32 %v7785_v14, %v7099_v5 }
 0x3ff   : > { %4057 = vst [vmem:[%s7118_s19 + $0x18] sm:$0xff] %v4025_v56  ;;  %v3743_v61 = vadd.f32 %v7027_v51, %v3707_v53 }
 0x400   : > { %v3888_v24 = vpop.f32.mrf.mxu3  ;;  %v700_v49 = vmax.f32 %v623_v57, 0.0 }
 0x401   : > { %v3889_v1 = vadd.f32 %v7107_v10, %v3888_v24  ;;  %v3775_v32 = vmax.f32 %v3743_v61, 0.0  ;;  %v3475_v61 = vadd.f32 %v3434_v11, %v3277_v6  ;;  %v3047_v11 = vadd.f32 %v7006_v29, %v7009_v59 }
 0x403   : > { %v3962_v0 = vmax.f32 %v3889_v1, 0.0  ;;  %v3045_v1 = vadd.f32 %v6989_v37, %v6993_v60 }
 0x404   : > { %v3662_v54 = vpop.f32.mrf.mxu2 }
 0x405   : > { %v4026_v50 = vadd.f32 %v3962_v0, %v694_v28  ;;  %v3708_v2 = vadd.f32 %v3662_v54, %v3472_v35  ;;  %v3241_v35 = vpop.f32.mrf.mxu0  ;;  %v7786_v0 = vld [vmem:[#allocation24_spill] sm:$0xff] }
 0x406   : > { %v626_v54 = vadd.f32 %v7786_v0, %v7099_v5  ;;  %v3279_v22 = vadd.f32 %v3241_v35, %v7004_v3 }
 0x407   : > { %4058 = vst [vmem:[%s7118_s19 + $0x20] sm:$0xff] %v4026_v50  ;;  %v3744_v7 = vadd.f32 %v7027_v51, %v3708_v2  ;;  %v3278_v50 = vadd.f32 %v3238_v55, %v3045_v1 }
 0x408   : > { %v3890_v27 = vpop.f32.mrf.mxu3  ;;  %v702_v26 = vmax.f32 %v626_v54, 0.0  ;;  %v7790_v54 = vld [vmem:[#allocation13_spill] sm:$0xff] }
 0x409   : > { %v3776_v39 = vmax.f32 %v3744_v7, 0.0  ;;  %v3891_v63 = vadd.f32 %v7107_v10, %v3890_v27  ;;  %v3476_v31 = vadd.f32 %v3436_v48, %v3278_v50  ;;  %v3439_v27 = vpop.f32.mrf.mxu1 }
 0x40b   : > { %v3963_v4 = vmax.f32 %v3891_v63, 0.0  ;;  %v3796_v15 = vpack.c.bf16 %v3776_v39, %v3775_v32  ;;  %v7787_v63 = vld [vmem:[#allocation25_spill] sm:$0xff] }
 0x40c   : > { %v3665_v19 = vpop.f32.mrf.mxu2  ;;  %v628_v9 = vadd.f32 %v7787_v63, %v7099_v5 }
 0x40d   : > { %v4027_v21 = vadd.f32 %v3963_v4, %v696_v62  ;;  %3932 = vmatmul.bf16.gmra.mxu3 %v3796_v15  ;;  %v3709_v41 = vadd.f32 %v3665_v19, %v3473_v25  ;;  %v3243_v42 = vpop.f32.mrf.mxu0 }
 0x40f   : > { %4059 = vst [vmem:[%s7118_s19 + $0x28] sm:$0xff] %v4027_v21  ;;  %v3745_v44 = vadd.f32 %v7027_v51, %v3709_v41  ;;  %v704_v21 = vmax.f32 %v628_v9, 0.0 }
 0x410   : > { %v3893_v46 = vpop.f32.mrf.mxu3 }
 0x411   : > { %v3894_v16 = vadd.f32 %v7107_v10, %v3893_v46  ;;  %v3777_v34 = vmax.f32 %v3745_v44, 0.0  ;;  %v3441_v41 = vpop.f32.mrf.mxu1 }
 0x413   : > { %v3964_v20 = vmax.f32 %v3894_v16, 0.0  ;;  %v7788_v16 = vld [vmem:[#allocation29_spill] sm:$0xff] }
 0x414   : > { %v3667_v13 = vpop.f32.mrf.mxu2 }
 0x415   : > { %v4028_v18 = vadd.f32 %v3964_v20, %v698_v17  ;;  %v3710_v40 = vadd.f32 %v3667_v13, %v3474_v30  ;;  %v631_v17 = vadd.f32 %v7788_v16, %v7099_v5  ;;  %v3477_v30 = vadd.f32 %v3439_v27, %v3279_v22  ;;  %v3246_v44 = vpop.f32.mrf.mxu0 }
 0x416   : > { %v3280_v20 = vadd.f32 %v3243_v42, %v3047_v11  ;;  %v7793_v11 = vld [vmem:[#allocation41_spill] sm:$0xff] }
 0x417   : > { %4060 = vst [vmem:[%s7118_s19 + $0x30] sm:$0xff] %v4028_v18  ;;  %v3746_v33 = vadd.f32 %v7027_v51, %v3710_v40  ;;  %v706_v18 = vmax.f32 %v631_v17, 0.0 }
 0x418   : > { %v3895_v43 = vpop.f32.mrf.mxu3  ;;  %v3478_v40 = vadd.f32 %v3441_v41, %v3280_v20  ;;  %v7794_v20 = vld [vmem:[#allocation43_spill] sm:$0xff] }
 0x419   : > { %v3778_v56 = vmax.f32 %v3746_v33, 0.0  ;;  %v3896_v47 = vadd.f32 %v7107_v10, %v3895_v43  ;;  %v7789_v43 = vld [vmem:[#allocation31_spill] sm:$0xff] }
 0x41b   : > { %v3965_v36 = vmax.f32 %v3896_v47, 0.0  ;;  %v3797_v24 = vpack.c.bf16 %v3778_v56, %v3777_v34  ;;  %v633_v34 = vadd.f32 %v7789_v43, %v7099_v5  ;;  %v3444_v47 = vpop.f32.mrf.mxu1 }
 0x41c   : > { %v3670_v53 = vpop.f32.mrf.mxu2 }
 0x41d   : > { %v4029_v28 = vadd.f32 %v3965_v36, %v700_v49  ;;  %3937 = vmatmul.bf16.gmra.mxu3 %v3797_v24  ;;  %v3711_v38 = vadd.f32 %v3670_v53, %v3475_v61  ;;  %v708_v24 = vmax.f32 %v633_v34, 0.0  ;;  %v3281_v53 = vadd.f32 %v3246_v44, %v7015_v23  ;;  %v3248_v35 = vpop.f32.mrf.mxu0 }
 0x41e   : > { %v3049_v61 = vadd.f32 %v7094_v58, %v7790_v54 }
 0x41f   : > { %4061 = vst [vmem:[%s7118_s19 + $0x38] sm:$0xff] %v4029_v28  ;;  %v3747_v37 = vadd.f32 %v7027_v51, %v3711_v38 }
 0x420   : > { %v3898_v2 = vpop.f32.mrf.mxu3 }
 0x421   : > { %v3899_v52 = vadd.f32 %v7107_v10, %v3898_v2  ;;  %v3779_v15 = vmax.f32 %v3747_v37, 0.0  ;;  %v7791_v2 = vld [vmem:[#allocation35_spill] sm:$0xff] }
 0x422   : > { %v636_v38 = vadd.f32 %v7791_v2, %v7099_v5 }
 0x423   : > { %v3966_v7 = vmax.f32 %v3899_v52, 0.0  ;;  %v3479_v52 = vadd.f32 %v3444_v47, %v3281_v53  ;;  %v3446_v27 = vpop.f32.mrf.mxu1  ;;  %v7797_v53 = vld [vmem:[#allocation56_spill] sm:$0xff] }
 0x424   : > { %v3672_v32 = vpop.f32.mrf.mxu2 }
 0x425   : > { %v4030_v60 = vadd.f32 %v3966_v7, %v702_v26  ;;  %v3712_v39 = vadd.f32 %v3672_v32, %v3476_v31  ;;  %v3282_v26 = vadd.f32 %v3248_v35, %v3049_v61  ;;  %v710_v32 = vmax.f32 %v636_v38, 0.0 }
 0x427   : > { %4062 = vst [vmem:[%s7118_s19 + $0x40] sm:$0xff] %v4030_v60  ;;  %v3748_v62 = vadd.f32 %v7027_v51, %v3712_v39  ;;  %v3480_v37 = vadd.f32 %v3446_v27, %v3282_v26 }
 0x428   : > { %v3900_v4 = vpop.f32.mrf.mxu3 }
 0x429   : > { %v3780_v19 = vmax.f32 %v3748_v62, 0.0  ;;  %v3901_v45 = vadd.f32 %v7107_v10, %v3900_v4  ;;  %v7792_v62 = vld [vmem:[#allocation37_spill] sm:$0xff] }
 0x42a   : > { %v638_v42 = vadd.f32 %v7792_v62, %v7099_v5 }
 0x42b   : > { %v3967_v12 = vmax.f32 %v3901_v45, 0.0  ;;  %v3798_v25 = vpack.c.bf16 %v3780_v19, %v3779_v15 }
 0x42c   : > { %v3675_v8 = vpop.f32.mrf.mxu2  ;;  %v712_v22 = vmax.f32 %v638_v42, 0.0 }
 0x42d   : > { %v4031_v46 = vadd.f32 %v3967_v12, %v704_v21  ;;  %3942 = vmatmul.bf16.gmra.mxu3 %v3798_v25  ;;  %v3713_v13 = vadd.f32 %v3675_v8, %v3477_v30 }
 0x42f   : > { %4063 = vst [vmem:[%s7118_s19 + $0x48] sm:$0xff] %v4031_v46  ;;  %v3749_v29 = vadd.f32 %v7027_v51, %v3713_v13  ;;  %v641_v46 = vadd.f32 %v7793_v11, %v7099_v5 }
 0x430   : > { %v3903_v55 = vpop.f32.mrf.mxu3 }
 0x431   : > { %v3904_v3 = vadd.f32 %v7107_v10, %v3903_v55  ;;  %v3781_v49 = vmax.f32 %v3749_v29, 0.0  ;;  %v643_v55 = vadd.f32 %v7794_v20, %v7099_v5 }
 0x433   : > { %v3968_v14 = vmax.f32 %v3904_v3, 0.0  ;;  %v716_v44 = vmax.f32 %v643_v55, 0.0  ;;  %v7803_v55 = vld [vmem:[#allocation76_spill] sm:$0xff] }
 0x434   : > { %v3677_v57 = vpop.f32.mrf.mxu2 }
 0x435   : > { %v4032_v59 = vadd.f32 %v3968_v14, %v706_v18  ;;  %v3714_v33 = vadd.f32 %v3677_v57, %v3478_v40  ;;  %v7795_v14 = vld [vmem:[#allocation49_spill] sm:$0xff] }
 0x436   : > { %v646_v57 = vadd.f32 %v7795_v14, %v7099_v5 }
 0x437   : > { %4064 = vst [vmem:[%s7118_s19 + $0x50] sm:$0xff] %v4032_v59  ;;  %v3750_v56 = vadd.f32 %v7027_v51, %v3714_v33 }
 0x438   : > { %v3905_v48 = vpop.f32.mrf.mxu3  ;;  %v718_v33 = vmax.f32 %v646_v57, 0.0  ;;  %v7804_v57 = vld [vmem:[#allocation78_spill] sm:$0xff] }
 0x439   : > { %v3782_v6 = vmax.f32 %v3750_v56, 0.0  ;;  %v3906_v36 = vadd.f32 %v7107_v10, %v3905_v48  ;;  %v7796_v56 = vld [vmem:[#allocation52_spill] sm:$0xff] }
 0x43a   : > { %v648_v47 = vadd.f32 %v7796_v56, %v7099_v5 }
 0x43b   : > { %v3969_v1 = vmax.f32 %v3906_v36, 0.0  ;;  %v3799_v28 = vpack.c.bf16 %v3782_v6, %v3781_v49 }
 0x43c   : > { %v3680_v0 = vpop.f32.mrf.mxu2  ;;  %v720_v6 = vmax.f32 %v648_v47, 0.0  ;;  %v7805_v47 = vld [vmem:[#allocation83_spill] sm:$0xff] }
 0x43d   : > { %v4033_v50 = vadd.f32 %v3969_v1, %v708_v24  ;;  %3947 = vmatmul.bf16.gmra.mxu3 %v3799_v28  ;;  %v3715_v7 = vadd.f32 %v3680_v0, %v3479_v52  ;;  %v651_v1 = vadd.f32 %v7797_v53, %v7099_v5 }
 0x43f   : > { %4065 = vst [vmem:[%s7118_s19 + $0x58] sm:$0xff] %v4033_v50  ;;  %v3751_v58 = vadd.f32 %v7027_v51, %v3715_v7  ;;  %v722_v0 = vmax.f32 %v651_v1, 0.0  ;;  %v7798_v50 = vld [vmem:[#allocation58_spill] sm:$0xff]  ;;  %v7806_v1 = vld [vmem:[#allocation85_spill] sm:$0xff] }
 0x440   : > { %v3908_v31 = vpop.f32.mrf.mxu3  ;;  %v653_v2 = vadd.f32 %v7798_v50, %v7099_v5 }
 0x441   : > { %v3909_v23 = vadd.f32 %v7107_v10, %v3908_v31  ;;  %v3783_v19 = vmax.f32 %v3751_v58, 0.0 }
 0x442   : > { %v724_v26 = vmax.f32 %v653_v2, 0.0  ;;  %v7807_v2 = vld [vmem:[#allocation90_spill] sm:$0xff] }
 0x443   : > { %v3970_v60 = vmax.f32 %v3909_v23, 0.0  ;;  %v7799_v23 = vld [vmem:[#allocation63_spill] sm:$0xff] }
 0x444   : > { %v3682_v39 = vpop.f32.mrf.mxu2  ;;  %v656_v27 = vadd.f32 %v7799_v23, %v7099_v5 }
 0x445   : > { %v4034_v63 = vadd.f32 %v3970_v60, %v710_v32  ;;  %v3716_v9 = vadd.f32 %v3682_v39, %v3480_v37 }
 0x446   : > { %v726_v60 = vmax.f32 %v656_v27, 0.0  ;;  %v7808_v27 = vld [vmem:[#allocation92_spill] sm:$0xff] }
 0x447   : > { %4066 = vst [vmem:[%s7118_s19 + $0x60] sm:$0xff] %v4034_v63  ;;  %v3752_v4 = vadd.f32 %v7027_v51, %v3716_v9  ;;  %v714_v51 = vmax.f32 %v641_v46, 0.0  ;;  %v7800_v63 = vld [vmem:[#allocation65_spill] sm:$0xff]  ;;  %v7802_v46 = vld [vmem:[#allocation72_spill] sm:$0xff] }
 0x448   : > { %v3910_v15 = vpop.f32.mrf.mxu3  ;;  %v658_v9 = vadd.f32 %v7800_v63, %v7099_v5 }
 0x449   : > { %v3784_v45 = vmax.f32 %v3752_v4, 0.0  ;;  %v3911_v21 = vadd.f32 %v7107_v10, %v3910_v15 }
 0x44a   : > { %v728_v4 = vmax.f32 %v658_v9, 0.0  ;;  %v7809_v9 = vld [vmem:[#allocation97_spill] sm:$0xff] }
 0x44b   : > { %v3971_v12 = vmax.f32 %v3911_v21, 0.0  ;;  %v3800_v25 = vpack.c.bf16 %v3784_v45, %v3783_v19  ;;  %v7801_v45 = vld [vmem:[#allocation70_spill] sm:$0xff] }
 0x44c   : > { %v661_v21 = vadd.f32 %v7801_v45, %v7099_v5 }
 0x44d   : > { %v4035_v8 = vadd.f32 %v3971_v12, %v712_v22  ;;  %3952 = vmatmul.bf16.gmra.mxu3 %v3800_v25 }
 0x44e   : > { %v730_v25 = vmax.f32 %v661_v21, 0.0  ;;  %v7810_v21 = vld [vmem:[#allocation99_spill] sm:$0xff] }
 0x44f   : > { %4067 = vst [vmem:[%s7118_s19 + $0x68] sm:$0xff] %v4035_v8 }
 0x450   : > { %v3913_v41 = vpop.f32.mrf.mxu3 }
 0x451   : > { %v3914_v16 = vadd.f32 %v7107_v10, %v3913_v41  ;;  %v663_v41 = vadd.f32 %v7802_v46, %v7099_v5 }
 0x453   : > { %v3972_v17 = vmax.f32 %v3914_v16, 0.0 }
 0x455   : > { %v4036_v30 = vadd.f32 %v3972_v17, %v714_v51  ;;  %v732_v17 = vmax.f32 %v663_v41, 0.0 }
 0x457   : > { %4068 = vst [vmem:[%s7118_s19 + $0x70] sm:$0xff] %v4036_v30 }
 0x458   : > { %v3915_v13 = vpop.f32.mrf.mxu3 }
 0x459   : > { %v3916_v3 = vadd.f32 %v7107_v10, %v3915_v13  ;;  %v666_v13 = vadd.f32 %v7803_v55, %v7099_v5 }
 0x45b   : > { %v3973_v18 = vmax.f32 %v3916_v3, 0.0 }
 0x45d   : > { %v4037_v40 = vadd.f32 %v3973_v18, %v716_v44  ;;  %v734_v18 = vmax.f32 %v666_v13, 0.0 }
 0x45f   : > { %4069 = vst [vmem:[%s7118_s19 + $0x78] sm:$0xff] %v4037_v40 }
 0x460   : > { %v3918_v29 = vpop.f32.mrf.mxu3 }
 0x461   : > { %v3919_v59 = vadd.f32 %v7107_v10, %v3918_v29  ;;  %v668_v29 = vadd.f32 %v7804_v57, %v7099_v5 }
 0x463   : > { %v3974_v43 = vmax.f32 %v3919_v59, 0.0 }
 0x465   : > { %v4038_v34 = vadd.f32 %v3974_v43, %v718_v33  ;;  %v736_v43 = vmax.f32 %v668_v29, 0.0 }
 0x467   : > { %4070 = vst [vmem:[%s7118_s19 + $0x80] sm:$0xff] %v4038_v34 }
 0x468   : > { %v3920_v48 = vpop.f32.mrf.mxu3 }
 0x469   : > { %v3921_v49 = vadd.f32 %v7107_v10, %v3920_v48  ;;  %v671_v48 = vadd.f32 %v7805_v47, %v7099_v5 }
 0x46b   : > { %v3975_v36 = vmax.f32 %v3921_v49, 0.0 }
 0x46d   : > { %v4039_v24 = vadd.f32 %v3975_v36, %v720_v6  ;;  %v738_v36 = vmax.f32 %v671_v48, 0.0 }
 0x46f   : > { %4071 = vst [vmem:[%s7118_s19 + $0x88] sm:$0xff] %v4039_v24 }
 0x470   : > { %v3923_v28 = vpop.f32.mrf.mxu3 }
 0x471   : > { %v3924_v35 = vadd.f32 %v7107_v10, %v3923_v28  ;;  %v673_v28 = vadd.f32 %v7806_v1, %v7099_v5 }
 0x473   : > { %v3976_v54 = vmax.f32 %v3924_v35, 0.0 }
 0x475   : > { %v4040_v61 = vadd.f32 %v3976_v54, %v722_v0  ;;  %v740_v54 = vmax.f32 %v673_v28, 0.0 }
 0x477   : > { %4072 = vst [vmem:[%s7118_s19 + $0x90] sm:$0xff] %v4040_v61 }
 0x478   : > { %v3925_v38 = vpop.f32.mrf.mxu3 }
 0x479   : > { %v3926_v52 = vadd.f32 %v7107_v10, %v3925_v38  ;;  %v676_v38 = vadd.f32 %v7807_v2, %v7099_v5 }
 0x47b   : > { %v3977_v31 = vmax.f32 %v3926_v52, 0.0 }
 0x47d   : > { %v4041_v7 = vadd.f32 %v3977_v31, %v724_v26  ;;  %v742_v31 = vmax.f32 %v676_v38, 0.0 }
 0x47f   : > { %4073 = vst [vmem:[%s7118_s19 + $0x98] sm:$0xff] %v4041_v7 }
 0x480   : > { %v3928_v32 = vpop.f32.mrf.mxu3 }
 0x481   : > { %v3929_v37 = vadd.f32 %v7107_v10, %v3928_v32  ;;  %v678_v32 = vadd.f32 %v7808_v27, %v7099_v5 }
 0x483   : > { %v3978_v39 = vmax.f32 %v3929_v37, 0.0 }
 0x485   : > { %v4042_v58 = vadd.f32 %v3978_v39, %v726_v60  ;;  %v744_v39 = vmax.f32 %v678_v32, 0.0 }
 0x487   : > { %4074 = vst [vmem:[%s7118_s19 + $0xa0] sm:$0xff] %v4042_v58 }
 0x488   : > { %v3930_v62 = vpop.f32.mrf.mxu3 }
 0x489   : > { %v3931_v42 = vadd.f32 %v7107_v10, %v3930_v62  ;;  %v681_v62 = vadd.f32 %v7809_v9, %v7099_v5 }
 0x48b   : > { %v3979_v15 = vmax.f32 %v3931_v42, 0.0 }
 0x48d   : > { %v4043_v19 = vadd.f32 %v3979_v15, %v728_v4  ;;  %v746_v15 = vmax.f32 %v681_v62, 0.0 }
 0x48f   : > { %4075 = vst [vmem:[%s7118_s19 + $0xa8] sm:$0xff] %v4043_v19 }
 0x490   : > { %v3933_v22 = vpop.f32.mrf.mxu3 }
 0x491   : > { %v3934_v12 = vadd.f32 %v7107_v10, %v3933_v22  ;;  %v683_v22 = vadd.f32 %v7810_v21, %v7099_v5 }
 0x493   : > { %v3980_v8 = vmax.f32 %v3934_v12, 0.0 }
 0x495   : > { %v4044_v11 = vadd.f32 %v3980_v8, %v730_v25  ;;  %v748_v8 = vmax.f32 %v683_v22, 0.0 }
 0x497   : > { %4076 = vst [vmem:[%s7118_s19 + $0xb0] sm:$0xff] %v4044_v11 }
 0x498   : > { %v3935_v16 = vpop.f32.mrf.mxu3 }
 0x499   : > { %v3936_v51 = vadd.f32 %v7107_v10, %v3935_v16 }
 0x49b   : > { %v3981_v30 = vmax.f32 %v3936_v51, 0.0 }
 0x49d   : > { %v4045_v20 = vadd.f32 %v3981_v30, %v732_v17 }
 0x49f   : > { %4077 = vst [vmem:[%s7118_s19 + $0xb8] sm:$0xff] %v4045_v20 }
 0x4a0   : > { %v3938_v3 = vpop.f32.mrf.mxu3 }
 0x4a1   : > { %v3939_v44 = vadd.f32 %v7107_v10, %v3938_v3 }
 0x4a3   : > { %v3982_v40 = vmax.f32 %v3939_v44, 0.0 }
 0x4a5   : > { %v4046_v14 = vadd.f32 %v3982_v40, %v734_v18 }
 0x4a7   : > { %4078 = vst [vmem:[%s7118_s19 + $0xc0] sm:$0xff] %v4046_v14 }
 0x4a8   : > { %v3940_v59 = vpop.f32.mrf.mxu3 }
 0x4a9   : > { %v3941_v33 = vadd.f32 %v7107_v10, %v3940_v59 }
 0x4ab   : > { %v3983_v34 = vmax.f32 %v3941_v33, 0.0 }
 0x4ad   : > { %v4047_v56 = vadd.f32 %v3983_v34, %v736_v43 }
 0x4af   : > { %4079 = vst [vmem:[%s7118_s19 + $0xc8] sm:$0xff] %v4047_v56 }
 0x4b0   : > { %v3943_v49 = vpop.f32.mrf.mxu3 }
 0x4b1   : > { %v3944_v6 = vadd.f32 %v7107_v10, %v3943_v49 }
 0x4b3   : > { %v3984_v24 = vmax.f32 %v3944_v6, 0.0 }
 0x4b5   : > { %v4048_v53 = vadd.f32 %v3984_v24, %v738_v36 }
 0x4b7   : > { %4080 = vst [vmem:[%s7118_s19 + $0xd0] sm:$0xff] %v4048_v53 }
 0x4b8   : > { %v3945_v35 = vpop.f32.mrf.mxu3 }
 0x4b9   : > { %v3946_v0 = vadd.f32 %v7107_v10, %v3945_v35 }
 0x4bb   : > { %v3985_v61 = vmax.f32 %v3946_v0, 0.0 }
 0x4bd   : > { %v4049_v50 = vadd.f32 %v3985_v61, %v740_v54 }
 0x4bf   : > { %4081 = vst [vmem:[%s7118_s19 + $0xd8] sm:$0xff] %v4049_v50 }
 0x4c0   : > { %v3948_v52 = vpop.f32.mrf.mxu3 }
 0x4c1   : > { %v3949_v26 = vadd.f32 %v7107_v10, %v3948_v52 }
 0x4c3   : > { %v3986_v7 = vmax.f32 %v3949_v26, 0.0 }
 0x4c5   : > { %v4050_v23 = vadd.f32 %v3986_v7, %v742_v31 }
 0x4c7   : > { %4082 = vst [vmem:[%s7118_s19 + $0xe0] sm:$0xff] %v4050_v23 }
 0x4c8   : > { %v3950_v37 = vpop.f32.mrf.mxu3 }
 0x4c9   : > { %v3951_v60 = vadd.f32 %v7107_v10, %v3950_v37 }
 0x4cb   : > { %v3987_v58 = vmax.f32 %v3951_v60, 0.0 }
 0x4cd   : > { %v4051_v63 = vadd.f32 %v3987_v58, %v744_v39 }
 0x4cf   : > { %4083 = vst [vmem:[%s7118_s19 + $0xe8] sm:$0xff] %v4051_v63 }
 0x4d0   : > { %v3953_v42 = vpop.f32.mrf.mxu3 }
 0x4d1   : > { %v3954_v4 = vadd.f32 %v7107_v10, %v3953_v42 }
 0x4d3   : > { %v3988_v19 = vmax.f32 %v3954_v4, 0.0 }
 0x4d5   : > { %v4052_v45 = vadd.f32 %v3988_v19, %v746_v15 }
 0x4d7   : > { %4084 = vst [vmem:[%s7118_s19 + $0xf0] sm:$0xff] %v4052_v45 }
 0x4d8   : > { %v3955_v12 = vpop.f32.mrf.mxu3 }
 0x4d9   : > { %v3956_v25 = vadd.f32 %v7107_v10, %v3955_v12 }
 0x4db   : > { %v3989_v11 = vmax.f32 %v3956_v25, 0.0 }
 0x4dd   : > { %v4053_v46 = vadd.f32 %v3989_v11, %v748_v8 }
 0x4df   : > { %4085 = vst [vmem:[%s7118_s19 + $0xf8] sm:$0xff] %v4053_v46 }
 0x4e0   : > { %5353 = shalt.err (!%p5350_p3)
}
 0x4e1   : > { %s5394_s17 = smov 128   ;;  %s5395_s19 = smov 8  }
 0x4e2   : > { %5278 = dma.vmem_to_hbm [thread:$0]  (%p5474_p5), %s4100_s29, 4096, %s4102_s8, %s4087_s28, %s5394_s17, %s5394_s17, %s5395_s19  }
 0x4e3 PF: > { %p5284_p4 = scmp.ge.s32.totalorder %s5388_s27, 2  ;;  %s4116_s9 = sand.u32 1, %s5376_s24  }
 0x4e4   : > { %s4117_s21 = scalar_lea.sflag [#allocation4], %s4116_s9 }
 0x4e5   : > { %p5281_p7 = pnand %p5284_p4, %p5478_p6 }
 0x4e7   : > { %p5282_p8 = pneg %p5281_p7 }
 0x4e9   : > { %5371 = dma.done.wait (%p5282_p8), %s4117_s21, 4096  }
 0x4ea   : > { %5373 = vsyncadd (%p5282_p8), %s4117_s21, 4294963200  ;;  %p17_p9 = scmp.ge.s32.totalorder %s5461_s30, 4   ;;  %s7811_s24 = smov %s5380_s25 }
 0x4eb   : > { %s7812_s25 = smov %s5384_s26  ;;  %s7813_s26 = smov %s5472_s10 }
 0x4ec   : > { %s7814_s27 = smov %s5461_s30  ;;  %19 = sbr.rel (!%p17_p9) target bundleno = 3 (0x3), region = 91 }
 0x4f1   :  { %4123 = vsyncpa [#allocation4], 1 }
 0x4f2   :  { %4125 = vsyncpa [#allocation4 + $0x1], 1 }

</bundles_post_ra>
